<compile_context>
chip_gen: v5e
topology: v5e:2x2
jax: 0.10.0
libtpu: 0.0.40
codegen_flags: <defaults>
</compile_context>

<pallas_src>
import functools

import jax
import jax.numpy as jnp
import numpy as np
from jax.experimental import pallas as pl
from jax.experimental.pallas import tpu as pltpu


def _kron_vpu_kernel(b_ref, f_ref, o_ref, *, a2, num_c):
    # b_ref: (1, a2, C, Gblk)     B[ij, c, g]  = back[n, c, y*a+i, x*a+j]
    # f_ref: (1, C, a2, Gblk)     F[c, kl, g]  = front[n, c, y*a+k, x*a+l]
    # o_ref: (1, a2, a2, Gblk)    out[ij, kl, g]
    #
    # a2 and C are small, static module constants -> fully unrolled VPU MAC loop.
    inv_c = 1.0 / float(num_c)
    for ij in range(a2):
        acc = None
        for cc in range(num_c):
            # Scale the small operand (1 x Gblk row) instead of the (a2 x Gblk) acc.
            b_row = b_ref[0, ij, cc:cc + 1, :].astype(jnp.float32) * inv_c  # (1, Gblk)
            f_cc = f_ref[0, cc].astype(jnp.float32)                         # (a2, Gblk)
            term = b_row * f_cc                                             # broadcast MAC
            acc = term if acc is None else acc + term
        o_ref[0, ij] = acc.astype(o_ref.dtype)


def _pick_g_block(g_total, max_lanes=1024):
    """Largest lane-dense block along the g axis: full G, or a multiple of 128."""
    if g_total <= max_lanes:
        return g_total
    for cand in range(max_lanes - (max_lanes % 128), 127, -128):
        if g_total % cand == 0:
            return cand
    return g_total  # fallback: single (full-extent) block


def tensor_display_forward(layers, angular):
    a = int(angular)
    n, two, ch, h, w = layers.shape
    assert two == 2
    assert h % a == 0 and w % a == 0
    ha, wa = h // a, w // a
    g_total = ha * wa
    a2 = a * a

    back = layers[:, 0]   # (N, C, H, W)
    front = layers[:, 1]  # (N, C, H, W)

    # Unfold glue (single relayout pass each, done by XLA outside the kernel):
    #   bb[n, i*a+j, c, y*wa+x] = back[n, c, y*a+i, x*a+j]
    bb = back.reshape(n, ch, ha, a, wa, a)        # (n, c, y, i, x, j)
    bb = bb.transpose(0, 3, 5, 1, 2, 4)           # (n, i, j, c, y, x)
    bb = bb.reshape(n, a2, ch, g_total)
    #   ff[n, c, k*a+l, y*wa+x] = front[n, c, y*a+k, x*a+l]
    ff = front.reshape(n, ch, ha, a, wa, a)       # (n, c, y, k, x, l)
    ff = ff.transpose(0, 1, 3, 5, 2, 4)           # (n, c, k, l, y, x)
    ff = ff.reshape(n, ch, a2, g_total)

    gblk = _pick_g_block(g_total)
    grid = (n, g_total // gblk)

    kernel = functools.partial(_kron_vpu_kernel, a2=a2, num_c=ch)

    out_bytes = n * a2 * a2 * g_total * 4
    cost = pl.CostEstimate(
        flops=2 * n * g_total * a2 * a2 * ch,
        transcendentals=0,
        bytes_accessed=int(bb.size * bb.dtype.itemsize
                           + ff.size * ff.dtype.itemsize
                           + out_bytes),
    )

    out_blocks = pl.pallas_call(
        kernel,
        out_shape=jax.ShapeDtypeStruct((n, a2, a2, g_total), jnp.float32),
        grid=grid,
        in_specs=[
            pl.BlockSpec((1, a2, ch, gblk), lambda i, gb: (i, 0, 0, gb)),
            pl.BlockSpec((1, ch, a2, gblk), lambda i, gb: (i, 0, 0, gb)),
        ],
        out_specs=pl.BlockSpec((1, a2, a2, gblk), lambda i, gb: (i, 0, 0, gb)),
        compiler_params=pltpu.CompilerParams(
            dimension_semantics=("parallel", "parallel")),
        cost_estimate=cost,
    )(bb, ff)

    # Fold glue (equivalent of F.fold with kernel=a, stride=a):
    #   out[n, i*a+j, y*a+k, x*a+l] = out_blocks[n, i*a+j, k*a+l, y*wa+x]
    out = out_blocks.reshape(n, a2, a, a, ha, wa)   # (n, ij, k, l, y, x)
    out = out.transpose(0, 1, 4, 2, 5, 3)           # (n, ij, y, k, x, l)
    return out.reshape(n, a2, h, w)


def _reference(layers, angular):
    # Pure-JAX reference matching the PyTorch forward exactly.
    a = int(angular)
    n, _, ch, h, w = layers.shape
    ha, wa = h // a, w // a
    back = layers[:, 0].reshape(n, ch, ha, a, wa, a)
    front = layers[:, 1].reshape(n, ch, ha, a, wa, a)
    ref = jnp.einsum('ncyixj,ncykxl->nijykxl', back, front,
                     precision=jax.lax.Precision.HIGHEST)
    return ref.reshape(n, a * a, h, w) / ch


if __name__ == "__main__":
    N, C, H, W = 2, 4, 16, 16
    angular = 4

    key = jax.random.PRNGKey(0)
    layers = jax.random.normal(key, (N, 2, C, H, W), dtype=jnp.float32)

    fwd = jax.jit(functools.partial(tensor_display_forward, angular=angular))
    out = fwd(layers)
    out = jax.block_until_ready(out)

    ref = _reference(layers, angular)
    assert out.shape == (N, angular * angular, H, W)
    np.testing.assert_allclose(np.asarray(out), np.asarray(ref), rtol=1e-5, atol=1e-5)
    print("KERNEL_OK")
</pallas_src>

<mosaic_0001>
module attributes {stable_mosaic.version = 11 : i64} {
  func.func @_kron_vpu_kernel(%arg0: i32, %arg1: i32, %arg2: memref<1x16x4x16xf32, #tpu.memory_space<vmem>>, %arg3: memref<1x4x16x16xf32, #tpu.memory_space<vmem>>, %arg4: memref<1x16x16x16xf32, #tpu.memory_space<vmem>>) attributes {dimension_semantics = [#tpu.dimension_semantics<parallel>, #tpu.dimension_semantics<parallel>], iteration_bounds = array<i64: 2, 1>, scalar_prefetch = 0 : i64, scratch_operands = 0 : i64, tpu.core_type = #tpu.core_type<tc>, window_params = [{transform_indices = @transform_0, window_bounds = array<i64: 1, 16, 4, 16>}, {transform_indices = @transform_1, window_bounds = array<i64: 1, 4, 16, 16>}, {transform_indices = @transform_2, window_bounds = array<i64: 1, 16, 16, 16>}]} {
    %c0 = arith.constant 0 : index
    %c0_0 = arith.constant 0 : index
    %c0_1 = arith.constant 0 : index
    %c0_2 = arith.constant 0 : index
    %0 = vector.load %arg2[%c0, %c0_0, %c0_1, %c0_2] : memref<1x16x4x16xf32, #tpu.memory_space<vmem>>, vector<1x1x1x16xf32>
    %1 = vector.shape_cast %0 : vector<1x1x1x16xf32> to vector<1x16xf32>
    %cst = arith.constant 2.500000e-01 : f32
    %2 = vector.broadcast %cst : f32 to vector<1x16xf32>
    %3 = arith.mulf %1, %2 : vector<1x16xf32>
    %c0_3 = arith.constant 0 : index
    %c0_4 = arith.constant 0 : index
    %c0_5 = arith.constant 0 : index
    %c0_6 = arith.constant 0 : index
    %4 = vector.load %arg3[%c0_3, %c0_4, %c0_5, %c0_6] : memref<1x4x16x16xf32, #tpu.memory_space<vmem>>, vector<1x1x16x16xf32>
    %5 = vector.shape_cast %4 : vector<1x1x16x16xf32> to vector<16x16xf32>
    %6 = vector.broadcast %3 : vector<1x16xf32> to vector<16x16xf32>
    %7 = arith.mulf %6, %5 : vector<16x16xf32>
    %c0_7 = arith.constant 0 : index
    %c0_8 = arith.constant 0 : index
    %c1 = arith.constant 1 : index
    %c0_9 = arith.constant 0 : index
    %8 = vector.load %arg2[%c0_7, %c0_8, %c1, %c0_9] : memref<1x16x4x16xf32, #tpu.memory_space<vmem>>, vector<1x1x1x16xf32>
    %9 = vector.shape_cast %8 : vector<1x1x1x16xf32> to vector<1x16xf32>
    %cst_10 = arith.constant 2.500000e-01 : f32
    %10 = vector.broadcast %cst_10 : f32 to vector<1x16xf32>
    %11 = arith.mulf %9, %10 : vector<1x16xf32>
    %c0_11 = arith.constant 0 : index
    %c1_12 = arith.constant 1 : index
    %c0_13 = arith.constant 0 : index
    %c0_14 = arith.constant 0 : index
    %12 = vector.load %arg3[%c0_11, %c1_12, %c0_13, %c0_14] : memref<1x4x16x16xf32, #tpu.memory_space<vmem>>, vector<1x1x16x16xf32>
    %13 = vector.shape_cast %12 : vector<1x1x16x16xf32> to vector<16x16xf32>
    %14 = vector.broadcast %11 : vector<1x16xf32> to vector<16x16xf32>
    %15 = arith.mulf %14, %13 : vector<16x16xf32>
    %16 = arith.addf %7, %15 : vector<16x16xf32>
    %c0_15 = arith.constant 0 : index
    %c0_16 = arith.constant 0 : index
    %c2 = arith.constant 2 : index
    %c0_17 = arith.constant 0 : index
    %17 = vector.load %arg2[%c0_15, %c0_16, %c2, %c0_17] : memref<1x16x4x16xf32, #tpu.memory_space<vmem>>, vector<1x1x1x16xf32>
    %18 = vector.shape_cast %17 : vector<1x1x1x16xf32> to vector<1x16xf32>
    %cst_18 = arith.constant 2.500000e-01 : f32
    %19 = vector.broadcast %cst_18 : f32 to vector<1x16xf32>
    %20 = arith.mulf %18, %19 : vector<1x16xf32>
    %c0_19 = arith.constant 0 : index
    %c2_20 = arith.constant 2 : index
    %c0_21 = arith.constant 0 : index
    %c0_22 = arith.constant 0 : index
    %21 = vector.load %arg3[%c0_19, %c2_20, %c0_21, %c0_22] : memref<1x4x16x16xf32, #tpu.memory_space<vmem>>, vector<1x1x16x16xf32>
    %22 = vector.shape_cast %21 : vector<1x1x16x16xf32> to vector<16x16xf32>
    %23 = vector.broadcast %20 : vector<1x16xf32> to vector<16x16xf32>
    %24 = arith.mulf %23, %22 : vector<16x16xf32>
    %25 = arith.addf %16, %24 : vector<16x16xf32>
    %c0_23 = arith.constant 0 : index
    %c0_24 = arith.constant 0 : index
    %c3 = arith.constant 3 : index
    %c0_25 = arith.constant 0 : index
    %26 = vector.load %arg2[%c0_23, %c0_24, %c3, %c0_25] : memref<1x16x4x16xf32, #tpu.memory_space<vmem>>, vector<1x1x1x16xf32>
    %27 = vector.shape_cast %26 : vector<1x1x1x16xf32> to vector<1x16xf32>
    %cst_26 = arith.constant 2.500000e-01 : f32
    %28 = vector.broadcast %cst_26 : f32 to vector<1x16xf32>
    %29 = arith.mulf %27, %28 : vector<1x16xf32>
    %c0_27 = arith.constant 0 : index
    %c3_28 = arith.constant 3 : index
    %c0_29 = arith.constant 0 : index
    %c0_30 = arith.constant 0 : index
    %30 = vector.load %arg3[%c0_27, %c3_28, %c0_29, %c0_30] : memref<1x4x16x16xf32, #tpu.memory_space<vmem>>, vector<1x1x16x16xf32>
    %31 = vector.shape_cast %30 : vector<1x1x16x16xf32> to vector<16x16xf32>
    %32 = vector.broadcast %29 : vector<1x16xf32> to vector<16x16xf32>
    %33 = arith.mulf %32, %31 : vector<16x16xf32>
    %34 = arith.addf %25, %33 : vector<16x16xf32>
    %c0_31 = arith.constant 0 : index
    %c0_32 = arith.constant 0 : index
    %c0_33 = arith.constant 0 : index
    %c0_34 = arith.constant 0 : index
    %35 = vector.load %arg4[%c0_31, %c0_32, %c0_33, %c0_34] : memref<1x16x16x16xf32, #tpu.memory_space<vmem>>, vector<1x1x16x16xf32>
    %36 = vector.shape_cast %35 : vector<1x1x16x16xf32> to vector<16x16xf32>
    %37 = vector.shape_cast %34 : vector<16x16xf32> to vector<1x1x16x16xf32>
    tpu.vector_store %arg4[%c0_31, %c0_32, %c0_33, %c0_34], %37 {strides = array<i32>} : memref<1x16x16x16xf32, #tpu.memory_space<vmem>>, vector<1x1x16x16xf32>,
    %c0_35 = arith.constant 0 : index
    %c1_36 = arith.constant 1 : index
    %c0_37 = arith.constant 0 : index
    %c0_38 = arith.constant 0 : index
    %38 = vector.load %arg2[%c0_35, %c1_36, %c0_37, %c0_38] : memref<1x16x4x16xf32, #tpu.memory_space<vmem>>, vector<1x1x1x16xf32>
    %39 = vector.shape_cast %38 : vector<1x1x1x16xf32> to vector<1x16xf32>
    %cst_39 = arith.constant 2.500000e-01 : f32
    %40 = vector.broadcast %cst_39 : f32 to vector<1x16xf32>
    %41 = arith.mulf %39, %40 : vector<1x16xf32>
    %c0_40 = arith.constant 0 : index
    %c0_41 = arith.constant 0 : index
    %c0_42 = arith.constant 0 : index
    %c0_43 = arith.constant 0 : index
    %42 = vector.load %arg3[%c0_40, %c0_41, %c0_42, %c0_43] : memref<1x4x16x16xf32, #tpu.memory_space<vmem>>, vector<1x1x16x16xf32>
    %43 = vector.shape_cast %42 : vector<1x1x16x16xf32> to vector<16x16xf32>
    %44 = vector.broadcast %41 : vector<1x16xf32> to vector<16x16xf32>
    %45 = arith.mulf %44, %43 : vector<16x16xf32>
    %c0_44 = arith.constant 0 : index
    %c1_45 = arith.constant 1 : index
    %c1_46 = arith.constant 1 : index
    %c0_47 = arith.constant 0 : index
    %46 = vector.load %arg2[%c0_44, %c1_45, %c1_46, %c0_47] : memref<1x16x4x16xf32, #tpu.memory_space<vmem>>, vector<1x1x1x16xf32>
    %47 = vector.shape_cast %46 : vector<1x1x1x16xf32> to vector<1x16xf32>
    %cst_48 = arith.constant 2.500000e-01 : f32
    %48 = vector.broadcast %cst_48 : f32 to vector<1x16xf32>
    %49 = arith.mulf %47, %48 : vector<1x16xf32>
    %c0_49 = arith.constant 0 : index
    %c1_50 = arith.constant 1 : index
    %c0_51 = arith.constant 0 : index
    %c0_52 = arith.constant 0 : index
    %50 = vector.load %arg3[%c0_49, %c1_50, %c0_51, %c0_52] : memref<1x4x16x16xf32, #tpu.memory_space<vmem>>, vector<1x1x16x16xf32>
    %51 = vector.shape_cast %50 : vector<1x1x16x16xf32> to vector<16x16xf32>
    %52 = vector.broadcast %49 : vector<1x16xf32> to vector<16x16xf32>
    %53 = arith.mulf %52, %51 : vector<16x16xf32>
    %54 = arith.addf %45, %53 : vector<16x16xf32>
    %c0_53 = arith.constant 0 : index
    %c1_54 = arith.constant 1 : index
    %c2_55 = arith.constant 2 : index
    %c0_56 = arith.constant 0 : index
    %55 = vector.load %arg2[%c0_53, %c1_54, %c2_55, %c0_56] : memref<1x16x4x16xf32, #tpu.memory_space<vmem>>, vector<1x1x1x16xf32>
    %56 = vector.shape_cast %55 : vector<1x1x1x16xf32> to vector<1x16xf32>
    %cst_57 = arith.constant 2.500000e-01 : f32
    %57 = vector.broadcast %cst_57 : f32 to vector<1x16xf32>
    %58 = arith.mulf %56, %57 : vector<1x16xf32>
    %c0_58 = arith.constant 0 : index
    %c2_59 = arith.constant 2 : index
    %c0_60 = arith.constant 0 : index
    %c0_61 = arith.constant 0 : index
    %59 = vector.load %arg3[%c0_58, %c2_59, %c0_60, %c0_61] : memref<1x4x16x16xf32, #tpu.memory_space<vmem>>, vector<1x1x16x16xf32>
    %60 = vector.shape_cast %59 : vector<1x1x16x16xf32> to vector<16x16xf32>
    %61 = vector.broadcast %58 : vector<1x16xf32> to vector<16x16xf32>
    %62 = arith.mulf %61, %60 : vector<16x16xf32>
    %63 = arith.addf %54, %62 : vector<16x16xf32>
    %c0_62 = arith.constant 0 : index
    %c1_63 = arith.constant 1 : index
    %c3_64 = arith.constant 3 : index
    %c0_65 = arith.constant 0 : index
    %64 = vector.load %arg2[%c0_62, %c1_63, %c3_64, %c0_65] : memref<1x16x4x16xf32, #tpu.memory_space<vmem>>, vector<1x1x1x16xf32>
    %65 = vector.shape_cast %64 : vector<1x1x1x16xf32> to vector<1x16xf32>
    %cst_66 = arith.constant 2.500000e-01 : f32
    %66 = vector.broadcast %cst_66 : f32 to vector<1x16xf32>
    %67 = arith.mulf %65, %66 : vector<1x16xf32>
    %c0_67 = arith.constant 0 : index
    %c3_68 = arith.constant 3 : index
    %c0_69 = arith.constant 0 : index
    %c0_70 = arith.constant 0 : index
    %68 = vector.load %arg3[%c0_67, %c3_68, %c0_69, %c0_70] : memref<1x4x16x16xf32, #tpu.memory_space<vmem>>, vector<1x1x16x16xf32>
    %69 = vector.shape_cast %68 : vector<1x1x16x16xf32> to vector<16x16xf32>
    %70 = vector.broadcast %67 : vector<1x16xf32> to vector<16x16xf32>
    %71 = arith.mulf %70, %69 : vector<16x16xf32>
    %72 = arith.addf %63, %71 : vector<16x16xf32>
    %c0_71 = arith.constant 0 : index
    %c1_72 = arith.constant 1 : index
    %c0_73 = arith.constant 0 : index
    %c0_74 = arith.constant 0 : index
    %73 = vector.load %arg4[%c0_71, %c1_72, %c0_73, %c0_74] : memref<1x16x16x16xf32, #tpu.memory_space<vmem>>, vector<1x1x16x16xf32>
    %74 = vector.shape_cast %73 : vector<1x1x16x16xf32> to vector<16x16xf32>
    %75 = vector.shape_cast %72 : vector<16x16xf32> to vector<1x1x16x16xf32>
    tpu.vector_store %arg4[%c0_71, %c1_72, %c0_73, %c0_74], %75 {strides = array<i32>} : memref<1x16x16x16xf32, #tpu.memory_space<vmem>>, vector<1x1x16x16xf32>,
    %c0_75 = arith.constant 0 : index
    %c2_76 = arith.constant 2 : index
    %c0_77 = arith.constant 0 : index
    %c0_78 = arith.constant 0 : index
    %76 = vector.load %arg2[%c0_75, %c2_76, %c0_77, %c0_78] : memref<1x16x4x16xf32, #tpu.memory_space<vmem>>, vector<1x1x1x16xf32>
    %77 = vector.shape_cast %76 : vector<1x1x1x16xf32> to vector<1x16xf32>
    %cst_79 = arith.constant 2.500000e-01 : f32
    %78 = vector.broadcast %cst_79 : f32 to vector<1x16xf32>
    %79 = arith.mulf %77, %78 : vector<1x16xf32>
    %c0_80 = arith.constant 0 : index
    %c0_81 = arith.constant 0 : index
    %c0_82 = arith.constant 0 : index
    %c0_83 = arith.constant 0 : index
    %80 = vector.load %arg3[%c0_80, %c0_81, %c0_82, %c0_83] : memref<1x4x16x16xf32, #tpu.memory_space<vmem>>, vector<1x1x16x16xf32>
    %81 = vector.shape_cast %80 : vector<1x1x16x16xf32> to vector<16x16xf32>
    %82 = vector.broadcast %79 : vector<1x16xf32> to vector<16x16xf32>
    %83 = arith.mulf %82, %81 : vector<16x16xf32>
    %c0_84 = arith.constant 0 : index
    %c2_85 = arith.constant 2 : index
    %c1_86 = arith.constant 1 : index
    %c0_87 = arith.constant 0 : index
    %84 = vector.load %arg2[%c0_84, %c2_85, %c1_86, %c0_87] : memref<1x16x4x16xf32, #tpu.memory_space<vmem>>, vector<1x1x1x16xf32>
    %85 = vector.shape_cast %84 : vector<1x1x1x16xf32> to vector<1x16xf32>
    %cst_88 = arith.constant 2.500000e-01 : f32
    %86 = vector.broadcast %cst_88 : f32 to vector<1x16xf32>
    %87 = arith.mulf %85, %86 : vector<1x16xf32>
    %c0_89 = arith.constant 0 : index
    %c1_90 = arith.constant 1 : index
    %c0_91 = arith.constant 0 : index
    %c0_92 = arith.constant 0 : index
    %88 = vector.load %arg3[%c0_89, %c1_90, %c0_91, %c0_92] : memref<1x4x16x16xf32, #tpu.memory_space<vmem>>, vector<1x1x16x16xf32>
    %89 = vector.shape_cast %88 : vector<1x1x16x16xf32> to vector<16x16xf32>
    %90 = vector.broadcast %87 : vector<1x16xf32> to vector<16x16xf32>
    %91 = arith.mulf %90, %89 : vector<16x16xf32>
    %92 = arith.addf %83, %91 : vector<16x16xf32>
    %c0_93 = arith.constant 0 : index
    %c2_94 = arith.constant 2 : index
    %c2_95 = arith.constant 2 : index
    %c0_96 = arith.constant 0 : index
    %93 = vector.load %arg2[%c0_93, %c2_94, %c2_95, %c0_96] : memref<1x16x4x16xf32, #tpu.memory_space<vmem>>, vector<1x1x1x16xf32>
    %94 = vector.shape_cast %93 : vector<1x1x1x16xf32> to vector<1x16xf32>
    %cst_97 = arith.constant 2.500000e-01 : f32
    %95 = vector.broadcast %cst_97 : f32 to vector<1x16xf32>
    %96 = arith.mulf %94, %95 : vector<1x16xf32>
    %c0_98 = arith.constant 0 : index
    %c2_99 = arith.constant 2 : index
    %c0_100 = arith.constant 0 : index
    %c0_101 = arith.constant 0 : index
    %97 = vector.load %arg3[%c0_98, %c2_99, %c0_100, %c0_101] : memref<1x4x16x16xf32, #tpu.memory_space<vmem>>, vector<1x1x16x16xf32>
    %98 = vector.shape_cast %97 : vector<1x1x16x16xf32> to vector<16x16xf32>
    %99 = vector.broadcast %96 : vector<1x16xf32> to vector<16x16xf32>
    %100 = arith.mulf %99, %98 : vector<16x16xf32>
    %101 = arith.addf %92, %100 : vector<16x16xf32>
    %c0_102 = arith.constant 0 : index
    %c2_103 = arith.constant 2 : index
    %c3_104 = arith.constant 3 : index
    %c0_105 = arith.constant 0 : index
    %102 = vector.load %arg2[%c0_102, %c2_103, %c3_104, %c0_105] : memref<1x16x4x16xf32, #tpu.memory_space<vmem>>, vector<1x1x1x16xf32>
    %103 = vector.shape_cast %102 : vector<1x1x1x16xf32> to vector<1x16xf32>
    %cst_106 = arith.constant 2.500000e-01 : f32
    %104 = vector.broadcast %cst_106 : f32 to vector<1x16xf32>
    %105 = arith.mulf %103, %104 : vector<1x16xf32>
    %c0_107 = arith.constant 0 : index
    %c3_108 = arith.constant 3 : index
    %c0_109 = arith.constant 0 : index
    %c0_110 = arith.constant 0 : index
    %106 = vector.load %arg3[%c0_107, %c3_108, %c0_109, %c0_110] : memref<1x4x16x16xf32, #tpu.memory_space<vmem>>, vector<1x1x16x16xf32>
    %107 = vector.shape_cast %106 : vector<1x1x16x16xf32> to vector<16x16xf32>
    %108 = vector.broadcast %105 : vector<1x16xf32> to vector<16x16xf32>
    %109 = arith.mulf %108, %107 : vector<16x16xf32>
    %110 = arith.addf %101, %109 : vector<16x16xf32>
    %c0_111 = arith.constant 0 : index
    %c2_112 = arith.constant 2 : index
    %c0_113 = arith.constant 0 : index
    %c0_114 = arith.constant 0 : index
    %111 = vector.load %arg4[%c0_111, %c2_112, %c0_113, %c0_114] : memref<1x16x16x16xf32, #tpu.memory_space<vmem>>, vector<1x1x16x16xf32>
    %112 = vector.shape_cast %111 : vector<1x1x16x16xf32> to vector<16x16xf32>
    %113 = vector.shape_cast %110 : vector<16x16xf32> to vector<1x1x16x16xf32>
    tpu.vector_store %arg4[%c0_111, %c2_112, %c0_113, %c0_114], %113 {strides = array<i32>} : memref<1x16x16x16xf32, #tpu.memory_space<vmem>>, vector<1x1x16x16xf32>,
    %c0_115 = arith.constant 0 : index
    %c3_116 = arith.constant 3 : index
    %c0_117 = arith.constant 0 : index
    %c0_118 = arith.constant 0 : index
    %114 = vector.load %arg2[%c0_115, %c3_116, %c0_117, %c0_118] : memref<1x16x4x16xf32, #tpu.memory_space<vmem>>, vector<1x1x1x16xf32>
    %115 = vector.shape_cast %114 : vector<1x1x1x16xf32> to vector<1x16xf32>
    %cst_119 = arith.constant 2.500000e-01 : f32
    %116 = vector.broadcast %cst_119 : f32 to vector<1x16xf32>
    %117 = arith.mulf %115, %116 : vector<1x16xf32>
    %c0_120 = arith.constant 0 : index
    %c0_121 = arith.constant 0 : index
    %c0_122 = arith.constant 0 : index
    %c0_123 = arith.constant 0 : index
    %118 = vector.load %arg3[%c0_120, %c0_121, %c0_122, %c0_123] : memref<1x4x16x16xf32, #tpu.memory_space<vmem>>, vector<1x1x16x16xf32>
    %119 = vector.shape_cast %118 : vector<1x1x16x16xf32> to vector<16x16xf32>
    %120 = vector.broadcast %117 : vector<1x16xf32> to vector<16x16xf32>
    %121 = arith.mulf %120, %119 : vector<16x16xf32>
    %c0_124 = arith.constant 0 : index
    %c3_125 = arith.constant 3 : index
    %c1_126 = arith.constant 1 : index
    %c0_127 = arith.constant 0 : index
    %122 = vector.load %arg2[%c0_124, %c3_125, %c1_126, %c0_127] : memref<1x16x4x16xf32, #tpu.memory_space<vmem>>, vector<1x1x1x16xf32>
    %123 = vector.shape_cast %122 : vector<1x1x1x16xf32> to vector<1x16xf32>
    %cst_128 = arith.constant 2.500000e-01 : f32
    %124 = vector.broadcast %cst_128 : f32 to vector<1x16xf32>
    %125 = arith.mulf %123, %124 : vector<1x16xf32>
    %c0_129 = arith.constant 0 : index
    %c1_130 = arith.constant 1 : index
    %c0_131 = arith.constant 0 : index
    %c0_132 = arith.constant 0 : index
    %126 = vector.load %arg3[%c0_129, %c1_130, %c0_131, %c0_132] : memref<1x4x16x16xf32, #tpu.memory_space<vmem>>, vector<1x1x16x16xf32>
    %127 = vector.shape_cast %126 : vector<1x1x16x16xf32> to vector<16x16xf32>
    %128 = vector.broadcast %125 : vector<1x16xf32> to vector<16x16xf32>
    %129 = arith.mulf %128, %127 : vector<16x16xf32>
    %130 = arith.addf %121, %129 : vector<16x16xf32>
    %c0_133 = arith.constant 0 : index
    %c3_134 = arith.constant 3 : index
    %c2_135 = arith.constant 2 : index
    %c0_136 = arith.constant 0 : index
    %131 = vector.load %arg2[%c0_133, %c3_134, %c2_135, %c0_136] : memref<1x16x4x16xf32, #tpu.memory_space<vmem>>, vector<1x1x1x16xf32>
    %132 = vector.shape_cast %131 : vector<1x1x1x16xf32> to vector<1x16xf32>
    %cst_137 = arith.constant 2.500000e-01 : f32
    %133 = vector.broadcast %cst_137 : f32 to vector<1x16xf32>
    %134 = arith.mulf %132, %133 : vector<1x16xf32>
    %c0_138 = arith.constant 0 : index
    %c2_139 = arith.constant 2 : index
    %c0_140 = arith.constant 0 : index
    %c0_141 = arith.constant 0 : index
    %135 = vector.load %arg3[%c0_138, %c2_139, %c0_140, %c0_141] : memref<1x4x16x16xf32, #tpu.memory_space<vmem>>, vector<1x1x16x16xf32>
    %136 = vector.shape_cast %135 : vector<1x1x16x16xf32> to vector<16x16xf32>
    %137 = vector.broadcast %134 : vector<1x16xf32> to vector<16x16xf32>
    %138 = arith.mulf %137, %136 : vector<16x16xf32>
    %139 = arith.addf %130, %138 : vector<16x16xf32>
    %c0_142 = arith.constant 0 : index
    %c3_143 = arith.constant 3 : index
    %c3_144 = arith.constant 3 : index
    %c0_145 = arith.constant 0 : index
    %140 = vector.load %arg2[%c0_142, %c3_143, %c3_144, %c0_145] : memref<1x16x4x16xf32, #tpu.memory_space<vmem>>, vector<1x1x1x16xf32>
    %141 = vector.shape_cast %140 : vector<1x1x1x16xf32> to vector<1x16xf32>
    %cst_146 = arith.constant 2.500000e-01 : f32
    %142 = vector.broadcast %cst_146 : f32 to vector<1x16xf32>
    %143 = arith.mulf %141, %142 : vector<1x16xf32>
    %c0_147 = arith.constant 0 : index
    %c3_148 = arith.constant 3 : index
    %c0_149 = arith.constant 0 : index
    %c0_150 = arith.constant 0 : index
    %144 = vector.load %arg3[%c0_147, %c3_148, %c0_149, %c0_150] : memref<1x4x16x16xf32, #tpu.memory_space<vmem>>, vector<1x1x16x16xf32>
    %145 = vector.shape_cast %144 : vector<1x1x16x16xf32> to vector<16x16xf32>
    %146 = vector.broadcast %143 : vector<1x16xf32> to vector<16x16xf32>
    %147 = arith.mulf %146, %145 : vector<16x16xf32>
    %148 = arith.addf %139, %147 : vector<16x16xf32>
    %c0_151 = arith.constant 0 : index
    %c3_152 = arith.constant 3 : index
    %c0_153 = arith.constant 0 : index
    %c0_154 = arith.constant 0 : index
    %149 = vector.load %arg4[%c0_151, %c3_152, %c0_153, %c0_154] : memref<1x16x16x16xf32, #tpu.memory_space<vmem>>, vector<1x1x16x16xf32>
    %150 = vector.shape_cast %149 : vector<1x1x16x16xf32> to vector<16x16xf32>
    %151 = vector.shape_cast %148 : vector<16x16xf32> to vector<1x1x16x16xf32>
    tpu.vector_store %arg4[%c0_151, %c3_152, %c0_153, %c0_154], %151 {strides = array<i32>} : memref<1x16x16x16xf32, #tpu.memory_space<vmem>>, vector<1x1x16x16xf32>,
    %c0_155 = arith.constant 0 : index
    %c4 = arith.constant 4 : index
    %c0_156 = arith.constant 0 : index
    %c0_157 = arith.constant 0 : index
    %152 = vector.load %arg2[%c0_155, %c4, %c0_156, %c0_157] : memref<1x16x4x16xf32, #tpu.memory_space<vmem>>, vector<1x1x1x16xf32>
    %153 = vector.shape_cast %152 : vector<1x1x1x16xf32> to vector<1x16xf32>
    %cst_158 = arith.constant 2.500000e-01 : f32
    %154 = vector.broadcast %cst_158 : f32 to vector<1x16xf32>
    %155 = arith.mulf %153, %154 : vector<1x16xf32>
    %c0_159 = arith.constant 0 : index
    %c0_160 = arith.constant 0 : index
    %c0_161 = arith.constant 0 : index
    %c0_162 = arith.constant 0 : index
    %156 = vector.load %arg3[%c0_159, %c0_160, %c0_161, %c0_162] : memref<1x4x16x16xf32, #tpu.memory_space<vmem>>, vector<1x1x16x16xf32>
    %157 = vector.shape_cast %156 : vector<1x1x16x16xf32> to vector<16x16xf32>
    %158 = vector.broadcast %155 : vector<1x16xf32> to vector<16x16xf32>
    %159 = arith.mulf %158, %157 : vector<16x16xf32>
    %c0_163 = arith.constant 0 : index
    %c4_164 = arith.constant 4 : index
    %c1_165 = arith.constant 1 : index
    %c0_166 = arith.constant 0 : index
    %160 = vector.load %arg2[%c0_163, %c4_164, %c1_165, %c0_166] : memref<1x16x4x16xf32, #tpu.memory_space<vmem>>, vector<1x1x1x16xf32>
    %161 = vector.shape_cast %160 : vector<1x1x1x16xf32> to vector<1x16xf32>
    %cst_167 = arith.constant 2.500000e-01 : f32
    %162 = vector.broadcast %cst_167 : f32 to vector<1x16xf32>
    %163 = arith.mulf %161, %162 : vector<1x16xf32>
    %c0_168 = arith.constant 0 : index
    %c1_169 = arith.constant 1 : index
    %c0_170 = arith.constant 0 : index
    %c0_171 = arith.constant 0 : index
    %164 = vector.load %arg3[%c0_168, %c1_169, %c0_170, %c0_171] : memref<1x4x16x16xf32, #tpu.memory_space<vmem>>, vector<1x1x16x16xf32>
    %165 = vector.shape_cast %164 : vector<1x1x16x16xf32> to vector<16x16xf32>
    %166 = vector.broadcast %163 : vector<1x16xf32> to vector<16x16xf32>
    %167 = arith.mulf %166, %165 : vector<16x16xf32>
    %168 = arith.addf %159, %167 : vector<16x16xf32>
    %c0_172 = arith.constant 0 : index
    %c4_173 = arith.constant 4 : index
    %c2_174 = arith.constant 2 : index
    %c0_175 = arith.constant 0 : index
    %169 = vector.load %arg2[%c0_172, %c4_173, %c2_174, %c0_175] : memref<1x16x4x16xf32, #tpu.memory_space<vmem>>, vector<1x1x1x16xf32>
    %170 = vector.shape_cast %169 : vector<1x1x1x16xf32> to vector<1x16xf32>
    %cst_176 = arith.constant 2.500000e-01 : f32
    %171 = vector.broadcast %cst_176 : f32 to vector<1x16xf32>
    %172 = arith.mulf %170, %171 : vector<1x16xf32>
    %c0_177 = arith.constant 0 : index
    %c2_178 = arith.constant 2 : index
    %c0_179 = arith.constant 0 : index
    %c0_180 = arith.constant 0 : index
    %173 = vector.load %arg3[%c0_177, %c2_178, %c0_179, %c0_180] : memref<1x4x16x16xf32, #tpu.memory_space<vmem>>, vector<1x1x16x16xf32>
    %174 = vector.shape_cast %173 : vector<1x1x16x16xf32> to vector<16x16xf32>
    %175 = vector.broadcast %172 : vector<1x16xf32> to vector<16x16xf32>
    %176 = arith.mulf %175, %174 : vector<16x16xf32>
    %177 = arith.addf %168, %176 : vector<16x16xf32>
    %c0_181 = arith.constant 0 : index
    %c4_182 = arith.constant 4 : index
    %c3_183 = arith.constant 3 : index
    %c0_184 = arith.constant 0 : index
    %178 = vector.load %arg2[%c0_181, %c4_182, %c3_183, %c0_184] : memref<1x16x4x16xf32, #tpu.memory_space<vmem>>, vector<1x1x1x16xf32>
    %179 = vector.shape_cast %178 : vector<1x1x1x16xf32> to vector<1x16xf32>
    %cst_185 = arith.constant 2.500000e-01 : f32
    %180 = vector.broadcast %cst_185 : f32 to vector<1x16xf32>
    %181 = arith.mulf %179, %180 : vector<1x16xf32>
    %c0_186 = arith.constant 0 : index
    %c3_187 = arith.constant 3 : index
    %c0_188 = arith.constant 0 : index
    %c0_189 = arith.constant 0 : index
    %182 = vector.load %arg3[%c0_186, %c3_187, %c0_188, %c0_189] : memref<1x4x16x16xf32, #tpu.memory_space<vmem>>, vector<1x1x16x16xf32>
    %183 = vector.shape_cast %182 : vector<1x1x16x16xf32> to vector<16x16xf32>
    %184 = vector.broadcast %181 : vector<1x16xf32> to vector<16x16xf32>
    %185 = arith.mulf %184, %183 : vector<16x16xf32>
    %186 = arith.addf %177, %185 : vector<16x16xf32>
    %c0_190 = arith.constant 0 : index
    %c4_191 = arith.constant 4 : index
    %c0_192 = arith.constant 0 : index
    %c0_193 = arith.constant 0 : index
    %187 = vector.load %arg4[%c0_190, %c4_191, %c0_192, %c0_193] : memref<1x16x16x16xf32, #tpu.memory_space<vmem>>, vector<1x1x16x16xf32>
    %188 = vector.shape_cast %187 : vector<1x1x16x16xf32> to vector<16x16xf32>
    %189 = vector.shape_cast %186 : vector<16x16xf32> to vector<1x1x16x16xf32>
    tpu.vector_store %arg4[%c0_190, %c4_191, %c0_192, %c0_193], %189 {strides = array<i32>} : memref<1x16x16x16xf32, #tpu.memory_space<vmem>>, vector<1x1x16x16xf32>,
    %c0_194 = arith.constant 0 : index
    %c5 = arith.constant 5 : index
    %c0_195 = arith.constant 0 : index
    %c0_196 = arith.constant 0 : index
    %190 = vector.load %arg2[%c0_194, %c5, %c0_195, %c0_196] : memref<1x16x4x16xf32, #tpu.memory_space<vmem>>, vector<1x1x1x16xf32>
    %191 = vector.shape_cast %190 : vector<1x1x1x16xf32> to vector<1x16xf32>
    %cst_197 = arith.constant 2.500000e-01 : f32
    %192 = vector.broadcast %cst_197 : f32 to vector<1x16xf32>
    %193 = arith.mulf %191, %192 : vector<1x16xf32>
    %c0_198 = arith.constant 0 : index
    %c0_199 = arith.constant 0 : index
    %c0_200 = arith.constant 0 : index
    %c0_201 = arith.constant 0 : index
    %194 = vector.load %arg3[%c0_198, %c0_199, %c0_200, %c0_201] : memref<1x4x16x16xf32, #tpu.memory_space<vmem>>, vector<1x1x16x16xf32>
    %195 = vector.shape_cast %194 : vector<1x1x16x16xf32> to vector<16x16xf32>
    %196 = vector.broadcast %193 : vector<1x16xf32> to vector<16x16xf32>
    %197 = arith.mulf %196, %195 : vector<16x16xf32>
    %c0_202 = arith.constant 0 : index
    %c5_203 = arith.constant 5 : index
    %c1_204 = arith.constant 1 : index
    %c0_205 = arith.constant 0 : index
    %198 = vector.load %arg2[%c0_202, %c5_203, %c1_204, %c0_205] : memref<1x16x4x16xf32, #tpu.memory_space<vmem>>, vector<1x1x1x16xf32>
    %199 = vector.shape_cast %198 : vector<1x1x1x16xf32> to vector<1x16xf32>
    %cst_206 = arith.constant 2.500000e-01 : f32
    %200 = vector.broadcast %cst_206 : f32 to vector<1x16xf32>
    %201 = arith.mulf %199, %200 : vector<1x16xf32>
    %c0_207 = arith.constant 0 : index
    %c1_208 = arith.constant 1 : index
    %c0_209 = arith.constant 0 : index
    %c0_210 = arith.constant 0 : index
    %202 = vector.load %arg3[%c0_207, %c1_208, %c0_209, %c0_210] : memref<1x4x16x16xf32, #tpu.memory_space<vmem>>, vector<1x1x16x16xf32>
    %203 = vector.shape_cast %202 : vector<1x1x16x16xf32> to vector<16x16xf32>
    %204 = vector.broadcast %201 : vector<1x16xf32> to vector<16x16xf32>
    %205 = arith.mulf %204, %203 : vector<16x16xf32>
    %206 = arith.addf %197, %205 : vector<16x16xf32>
    %c0_211 = arith.constant 0 : index
    %c5_212 = arith.constant 5 : index
    %c2_213 = arith.constant 2 : index
    %c0_214 = arith.constant 0 : index
    %207 = vector.load %arg2[%c0_211, %c5_212, %c2_213, %c0_214] : memref<1x16x4x16xf32, #tpu.memory_space<vmem>>, vector<1x1x1x16xf32>
    %208 = vector.shape_cast %207 : vector<1x1x1x16xf32> to vector<1x16xf32>
    %cst_215 = arith.constant 2.500000e-01 : f32
    %209 = vector.broadcast %cst_215 : f32 to vector<1x16xf32>
    %210 = arith.mulf %208, %209 : vector<1x16xf32>
    %c0_216 = arith.constant 0 : index
    %c2_217 = arith.constant 2 : index
    %c0_218 = arith.constant 0 : index
    %c0_219 = arith.constant 0 : index
    %211 = vector.load %arg3[%c0_216, %c2_217, %c0_218, %c0_219] : memref<1x4x16x16xf32, #tpu.memory_space<vmem>>, vector<1x1x16x16xf32>
    %212 = vector.shape_cast %211 : vector<1x1x16x16xf32> to vector<16x16xf32>
    %213 = vector.broadcast %210 : vector<1x16xf32> to vector<16x16xf32>
    %214 = arith.mulf %213, %212 : vector<16x16xf32>
    %215 = arith.addf %206, %214 : vector<16x16xf32>
    %c0_220 = arith.constant 0 : index
    %c5_221 = arith.constant 5 : index
    %c3_222 = arith.constant 3 : index
    %c0_223 = arith.constant 0 : index
    %216 = vector.load %arg2[%c0_220, %c5_221, %c3_222, %c0_223] : memref<1x16x4x16xf32, #tpu.memory_space<vmem>>, vector<1x1x1x16xf32>
    %217 = vector.shape_cast %216 : vector<1x1x1x16xf32> to vector<1x16xf32>
    %cst_224 = arith.constant 2.500000e-01 : f32
    %218 = vector.broadcast %cst_224 : f32 to vector<1x16xf32>
    %219 = arith.mulf %217, %218 : vector<1x16xf32>
    %c0_225 = arith.constant 0 : index
    %c3_226 = arith.constant 3 : index
    %c0_227 = arith.constant 0 : index
    %c0_228 = arith.constant 0 : index
    %220 = vector.load %arg3[%c0_225, %c3_226, %c0_227, %c0_228] : memref<1x4x16x16xf32, #tpu.memory_space<vmem>>, vector<1x1x16x16xf32>
    %221 = vector.shape_cast %220 : vector<1x1x16x16xf32> to vector<16x16xf32>
    %222 = vector.broadcast %219 : vector<1x16xf32> to vector<16x16xf32>
    %223 = arith.mulf %222, %221 : vector<16x16xf32>
    %224 = arith.addf %215, %223 : vector<16x16xf32>
    %c0_229 = arith.constant 0 : index
    %c5_230 = arith.constant 5 : index
    %c0_231 = arith.constant 0 : index
    %c0_232 = arith.constant 0 : index
    %225 = vector.load %arg4[%c0_229, %c5_230, %c0_231, %c0_232] : memref<1x16x16x16xf32, #tpu.memory_space<vmem>>, vector<1x1x16x16xf32>
    %226 = vector.shape_cast %225 : vector<1x1x16x16xf32> to vector<16x16xf32>
    %227 = vector.shape_cast %224 : vector<16x16xf32> to vector<1x1x16x16xf32>
    tpu.vector_store %arg4[%c0_229, %c5_230, %c0_231, %c0_232], %227 {strides = array<i32>} : memref<1x16x16x16xf32, #tpu.memory_space<vmem>>, vector<1x1x16x16xf32>,
    %c0_233 = arith.constant 0 : index
    %c6 = arith.constant 6 : index
    %c0_234 = arith.constant 0 : index
    %c0_235 = arith.constant 0 : index
    %228 = vector.load %arg2[%c0_233, %c6, %c0_234, %c0_235] : memref<1x16x4x16xf32, #tpu.memory_space<vmem>>, vector<1x1x1x16xf32>
    %229 = vector.shape_cast %228 : vector<1x1x1x16xf32> to vector<1x16xf32>
    %cst_236 = arith.constant 2.500000e-01 : f32
    %230 = vector.broadcast %cst_236 : f32 to vector<1x16xf32>
    %231 = arith.mulf %229, %230 : vector<1x16xf32>
    %c0_237 = arith.constant 0 : index
    %c0_238 = arith.constant 0 : index
    %c0_239 = arith.constant 0 : index
    %c0_240 = arith.constant 0 : index
    %232 = vector.load %arg3[%c0_237, %c0_238, %c0_239, %c0_240] : memref<1x4x16x16xf32, #tpu.memory_space<vmem>>, vector<1x1x16x16xf32>
    %233 = vector.shape_cast %232 : vector<1x1x16x16xf32> to vector<16x16xf32>
    %234 = vector.broadcast %231 : vector<1x16xf32> to vector<16x16xf32>
    %235 = arith.mulf %234, %233 : vector<16x16xf32>
    %c0_241 = arith.constant 0 : index
    %c6_242 = arith.constant 6 : index
    %c1_243 = arith.constant 1 : index
    %c0_244 = arith.constant 0 : index
    %236 = vector.load %arg2[%c0_241, %c6_242, %c1_243, %c0_244] : memref<1x16x4x16xf32, #tpu.memory_space<vmem>>, vector<1x1x1x16xf32>
    %237 = vector.shape_cast %236 : vector<1x1x1x16xf32> to vector<1x16xf32>
    %cst_245 = arith.constant 2.500000e-01 : f32
    %238 = vector.broadcast %cst_245 : f32 to vector<1x16xf32>
    %239 = arith.mulf %237, %238 : vector<1x16xf32>
    %c0_246 = arith.constant 0 : index
    %c1_247 = arith.constant 1 : index
    %c0_248 = arith.constant 0 : index
    %c0_249 = arith.constant 0 : index
    %240 = vector.load %arg3[%c0_246, %c1_247, %c0_248, %c0_249] : memref<1x4x16x16xf32, #tpu.memory_space<vmem>>, vector<1x1x16x16xf32>
    %241 = vector.shape_cast %240 : vector<1x1x16x16xf32> to vector<16x16xf32>
    %242 = vector.broadcast %239 : vector<1x16xf32> to vector<16x16xf32>
    %243 = arith.mulf %242, %241 : vector<16x16xf32>
    %244 = arith.addf %235, %243 : vector<16x16xf32>
    %c0_250 = arith.constant 0 : index
    %c6_251 = arith.constant 6 : index
    %c2_252 = arith.constant 2 : index
    %c0_253 = arith.constant 0 : index
    %245 = vector.load %arg2[%c0_250, %c6_251, %c2_252, %c0_253] : memref<1x16x4x16xf32, #tpu.memory_space<vmem>>, vector<1x1x1x16xf32>
    %246 = vector.shape_cast %245 : vector<1x1x1x16xf32> to vector<1x16xf32>
    %cst_254 = arith.constant 2.500000e-01 : f32
    %247 = vector.broadcast %cst_254 : f32 to vector<1x16xf32>
    %248 = arith.mulf %246, %247 : vector<1x16xf32>
    %c0_255 = arith.constant 0 : index
    %c2_256 = arith.constant 2 : index
    %c0_257 = arith.constant 0 : index
    %c0_258 = arith.constant 0 : index
    %249 = vector.load %arg3[%c0_255, %c2_256, %c0_257, %c0_258] : memref<1x4x16x16xf32, #tpu.memory_space<vmem>>, vector<1x1x16x16xf32>
    %250 = vector.shape_cast %249 : vector<1x1x16x16xf32> to vector<16x16xf32>
    %251 = vector.broadcast %248 : vector<1x16xf32> to vector<16x16xf32>
    %252 = arith.mulf %251, %250 : vector<16x16xf32>
    %253 = arith.addf %244, %252 : vector<16x16xf32>
    %c0_259 = arith.constant 0 : index
    %c6_260 = arith.constant 6 : index
    %c3_261 = arith.constant 3 : index
    %c0_262 = arith.constant 0 : index
    %254 = vector.load %arg2[%c0_259, %c6_260, %c3_261, %c0_262] : memref<1x16x4x16xf32, #tpu.memory_space<vmem>>, vector<1x1x1x16xf32>
    %255 = vector.shape_cast %254 : vector<1x1x1x16xf32> to vector<1x16xf32>
    %cst_263 = arith.constant 2.500000e-01 : f32
    %256 = vector.broadcast %cst_263 : f32 to vector<1x16xf32>
    %257 = arith.mulf %255, %256 : vector<1x16xf32>
    %c0_264 = arith.constant 0 : index
    %c3_265 = arith.constant 3 : index
    %c0_266 = arith.constant 0 : index
    %c0_267 = arith.constant 0 : index
    %258 = vector.load %arg3[%c0_264, %c3_265, %c0_266, %c0_267] : memref<1x4x16x16xf32, #tpu.memory_space<vmem>>, vector<1x1x16x16xf32>
    %259 = vector.shape_cast %258 : vector<1x1x16x16xf32> to vector<16x16xf32>
    %260 = vector.broadcast %257 : vector<1x16xf32> to vector<16x16xf32>
    %261 = arith.mulf %260, %259 : vector<16x16xf32>
    %262 = arith.addf %253, %261 : vector<16x16xf32>
    %c0_268 = arith.constant 0 : index
    %c6_269 = arith.constant 6 : index
    %c0_270 = arith.constant 0 : index
    %c0_271 = arith.constant 0 : index
    %263 = vector.load %arg4[%c0_268, %c6_269, %c0_270, %c0_271] : memref<1x16x16x16xf32, #tpu.memory_space<vmem>>, vector<1x1x16x16xf32>
    %264 = vector.shape_cast %263 : vector<1x1x16x16xf32> to vector<16x16xf32>
    %265 = vector.shape_cast %262 : vector<16x16xf32> to vector<1x1x16x16xf32>
    tpu.vector_store %arg4[%c0_268, %c6_269, %c0_270, %c0_271], %265 {strides = array<i32>} : memref<1x16x16x16xf32, #tpu.memory_space<vmem>>, vector<1x1x16x16xf32>,
    %c0_272 = arith.constant 0 : index
    %c7 = arith.constant 7 : index
    %c0_273 = arith.constant 0 : index
    %c0_274 = arith.constant 0 : index
    %266 = vector.load %arg2[%c0_272, %c7, %c0_273, %c0_274] : memref<1x16x4x16xf32, #tpu.memory_space<vmem>>, vector<1x1x1x16xf32>
    %267 = vector.shape_cast %266 : vector<1x1x1x16xf32> to vector<1x16xf32>
    %cst_275 = arith.constant 2.500000e-01 : f32
    %268 = vector.broadcast %cst_275 : f32 to vector<1x16xf32>
    %269 = arith.mulf %267, %268 : vector<1x16xf32>
    %c0_276 = arith.constant 0 : index
    %c0_277 = arith.constant 0 : index
    %c0_278 = arith.constant 0 : index
    %c0_279 = arith.constant 0 : index
    %270 = vector.load %arg3[%c0_276, %c0_277, %c0_278, %c0_279] : memref<1x4x16x16xf32, #tpu.memory_space<vmem>>, vector<1x1x16x16xf32>
    %271 = vector.shape_cast %270 : vector<1x1x16x16xf32> to vector<16x16xf32>
    %272 = vector.broadcast %269 : vector<1x16xf32> to vector<16x16xf32>
    %273 = arith.mulf %272, %271 : vector<16x16xf32>
    %c0_280 = arith.constant 0 : index
    %c7_281 = arith.constant 7 : index
    %c1_282 = arith.constant 1 : index
    %c0_283 = arith.constant 0 : index
    %274 = vector.load %arg2[%c0_280, %c7_281, %c1_282, %c0_283] : memref<1x16x4x16xf32, #tpu.memory_space<vmem>>, vector<1x1x1x16xf32>
    %275 = vector.shape_cast %274 : vector<1x1x1x16xf32> to vector<1x16xf32>
    %cst_284 = arith.constant 2.500000e-01 : f32
    %276 = vector.broadcast %cst_284 : f32 to vector<1x16xf32>
    %277 = arith.mulf %275, %276 : vector<1x16xf32>
    %c0_285 = arith.constant 0 : index
    %c1_286 = arith.constant 1 : index
    %c0_287 = arith.constant 0 : index
    %c0_288 = arith.constant 0 : index
    %278 = vector.load %arg3[%c0_285, %c1_286, %c0_287, %c0_288] : memref<1x4x16x16xf32, #tpu.memory_space<vmem>>, vector<1x1x16x16xf32>
    %279 = vector.shape_cast %278 : vector<1x1x16x16xf32> to vector<16x16xf32>
    %280 = vector.broadcast %277 : vector<1x16xf32> to vector<16x16xf32>
    %281 = arith.mulf %280, %279 : vector<16x16xf32>
    %282 = arith.addf %273, %281 : vector<16x16xf32>
    %c0_289 = arith.constant 0 : index
    %c7_290 = arith.constant 7 : index
    %c2_291 = arith.constant 2 : index
    %c0_292 = arith.constant 0 : index
    %283 = vector.load %arg2[%c0_289, %c7_290, %c2_291, %c0_292] : memref<1x16x4x16xf32, #tpu.memory_space<vmem>>, vector<1x1x1x16xf32>
    %284 = vector.shape_cast %283 : vector<1x1x1x16xf32> to vector<1x16xf32>
    %cst_293 = arith.constant 2.500000e-01 : f32
    %285 = vector.broadcast %cst_293 : f32 to vector<1x16xf32>
    %286 = arith.mulf %284, %285 : vector<1x16xf32>
    %c0_294 = arith.constant 0 : index
    %c2_295 = arith.constant 2 : index
    %c0_296 = arith.constant 0 : index
    %c0_297 = arith.constant 0 : index
    %287 = vector.load %arg3[%c0_294, %c2_295, %c0_296, %c0_297] : memref<1x4x16x16xf32, #tpu.memory_space<vmem>>, vector<1x1x16x16xf32>
    %288 = vector.shape_cast %287 : vector<1x1x16x16xf32> to vector<16x16xf32>
    %289 = vector.broadcast %286 : vector<1x16xf32> to vector<16x16xf32>
    %290 = arith.mulf %289, %288 : vector<16x16xf32>
    %291 = arith.addf %282, %290 : vector<16x16xf32>
    %c0_298 = arith.constant 0 : index
    %c7_299 = arith.constant 7 : index
    %c3_300 = arith.constant 3 : index
    %c0_301 = arith.constant 0 : index
    %292 = vector.load %arg2[%c0_298, %c7_299, %c3_300, %c0_301] : memref<1x16x4x16xf32, #tpu.memory_space<vmem>>, vector<1x1x1x16xf32>
    %293 = vector.shape_cast %292 : vector<1x1x1x16xf32> to vector<1x16xf32>
    %cst_302 = arith.constant 2.500000e-01 : f32
    %294 = vector.broadcast %cst_302 : f32 to vector<1x16xf32>
    %295 = arith.mulf %293, %294 : vector<1x16xf32>
    %c0_303 = arith.constant 0 : index
    %c3_304 = arith.constant 3 : index
    %c0_305 = arith.constant 0 : index
    %c0_306 = arith.constant 0 : index
    %296 = vector.load %arg3[%c0_303, %c3_304, %c0_305, %c0_306] : memref<1x4x16x16xf32, #tpu.memory_space<vmem>>, vector<1x1x16x16xf32>
    %297 = vector.shape_cast %296 : vector<1x1x16x16xf32> to vector<16x16xf32>
    %298 = vector.broadcast %295 : vector<1x16xf32> to vector<16x16xf32>
    %299 = arith.mulf %298, %297 : vector<16x16xf32>
    %300 = arith.addf %291, %299 : vector<16x16xf32>
    %c0_307 = arith.constant 0 : index
    %c7_308 = arith.constant 7 : index
    %c0_309 = arith.constant 0 : index
    %c0_310 = arith.constant 0 : index
    %301 = vector.load %arg4[%c0_307, %c7_308, %c0_309, %c0_310] : memref<1x16x16x16xf32, #tpu.memory_space<vmem>>, vector<1x1x16x16xf32>
    %302 = vector.shape_cast %301 : vector<1x1x16x16xf32> to vector<16x16xf32>
    %303 = vector.shape_cast %300 : vector<16x16xf32> to vector<1x1x16x16xf32>
    tpu.vector_store %arg4[%c0_307, %c7_308, %c0_309, %c0_310], %303 {strides = array<i32>} : memref<1x16x16x16xf32, #tpu.memory_space<vmem>>, vector<1x1x16x16xf32>,
    %c0_311 = arith.constant 0 : index
    %c8 = arith.constant 8 : index
    %c0_312 = arith.constant 0 : index
    %c0_313 = arith.constant 0 : index
    %304 = vector.load %arg2[%c0_311, %c8, %c0_312, %c0_313] : memref<1x16x4x16xf32, #tpu.memory_space<vmem>>, vector<1x1x1x16xf32>
    %305 = vector.shape_cast %304 : vector<1x1x1x16xf32> to vector<1x16xf32>
    %cst_314 = arith.constant 2.500000e-01 : f32
    %306 = vector.broadcast %cst_314 : f32 to vector<1x16xf32>
    %307 = arith.mulf %305, %306 : vector<1x16xf32>
    %c0_315 = arith.constant 0 : index
    %c0_316 = arith.constant 0 : index
    %c0_317 = arith.constant 0 : index
    %c0_318 = arith.constant 0 : index
    %308 = vector.load %arg3[%c0_315, %c0_316, %c0_317, %c0_318] : memref<1x4x16x16xf32, #tpu.memory_space<vmem>>, vector<1x1x16x16xf32>
    %309 = vector.shape_cast %308 : vector<1x1x16x16xf32> to vector<16x16xf32>
    %310 = vector.broadcast %307 : vector<1x16xf32> to vector<16x16xf32>
    %311 = arith.mulf %310, %309 : vector<16x16xf32>
    %c0_319 = arith.constant 0 : index
    %c8_320 = arith.constant 8 : index
    %c1_321 = arith.constant 1 : index
    %c0_322 = arith.constant 0 : index
    %312 = vector.load %arg2[%c0_319, %c8_320, %c1_321, %c0_322] : memref<1x16x4x16xf32, #tpu.memory_space<vmem>>, vector<1x1x1x16xf32>
    %313 = vector.shape_cast %312 : vector<1x1x1x16xf32> to vector<1x16xf32>
    %cst_323 = arith.constant 2.500000e-01 : f32
    %314 = vector.broadcast %cst_323 : f32 to vector<1x16xf32>
    %315 = arith.mulf %313, %314 : vector<1x16xf32>
    %c0_324 = arith.constant 0 : index
    %c1_325 = arith.constant 1 : index
    %c0_326 = arith.constant 0 : index
    %c0_327 = arith.constant 0 : index
    %316 = vector.load %arg3[%c0_324, %c1_325, %c0_326, %c0_327] : memref<1x4x16x16xf32, #tpu.memory_space<vmem>>, vector<1x1x16x16xf32>
    %317 = vector.shape_cast %316 : vector<1x1x16x16xf32> to vector<16x16xf32>
    %318 = vector.broadcast %315 : vector<1x16xf32> to vector<16x16xf32>
    %319 = arith.mulf %318, %317 : vector<16x16xf32>
    %320 = arith.addf %311, %319 : vector<16x16xf32>
    %c0_328 = arith.constant 0 : index
    %c8_329 = arith.constant 8 : index
    %c2_330 = arith.constant 2 : index
    %c0_331 = arith.constant 0 : index
    %321 = vector.load %arg2[%c0_328, %c8_329, %c2_330, %c0_331] : memref<1x16x4x16xf32, #tpu.memory_space<vmem>>, vector<1x1x1x16xf32>
    %322 = vector.shape_cast %321 : vector<1x1x1x16xf32> to vector<1x16xf32>
    %cst_332 = arith.constant 2.500000e-01 : f32
    %323 = vector.broadcast %cst_332 : f32 to vector<1x16xf32>
    %324 = arith.mulf %322, %323 : vector<1x16xf32>
    %c0_333 = arith.constant 0 : index
    %c2_334 = arith.constant 2 : index
    %c0_335 = arith.constant 0 : index
    %c0_336 = arith.constant 0 : index
    %325 = vector.load %arg3[%c0_333, %c2_334, %c0_335, %c0_336] : memref<1x4x16x16xf32, #tpu.memory_space<vmem>>, vector<1x1x16x16xf32>
    %326 = vector.shape_cast %325 : vector<1x1x16x16xf32> to vector<16x16xf32>
    %327 = vector.broadcast %324 : vector<1x16xf32> to vector<16x16xf32>
    %328 = arith.mulf %327, %326 : vector<16x16xf32>
    %329 = arith.addf %320, %328 : vector<16x16xf32>
    %c0_337 = arith.constant 0 : index
    %c8_338 = arith.constant 8 : index
    %c3_339 = arith.constant 3 : index
    %c0_340 = arith.constant 0 : index
    %330 = vector.load %arg2[%c0_337, %c8_338, %c3_339, %c0_340] : memref<1x16x4x16xf32, #tpu.memory_space<vmem>>, vector<1x1x1x16xf32>
    %331 = vector.shape_cast %330 : vector<1x1x1x16xf32> to vector<1x16xf32>
    %cst_341 = arith.constant 2.500000e-01 : f32
    %332 = vector.broadcast %cst_341 : f32 to vector<1x16xf32>
    %333 = arith.mulf %331, %332 : vector<1x16xf32>
    %c0_342 = arith.constant 0 : index
    %c3_343 = arith.constant 3 : index
    %c0_344 = arith.constant 0 : index
    %c0_345 = arith.constant 0 : index
    %334 = vector.load %arg3[%c0_342, %c3_343, %c0_344, %c0_345] : memref<1x4x16x16xf32, #tpu.memory_space<vmem>>, vector<1x1x16x16xf32>
    %335 = vector.shape_cast %334 : vector<1x1x16x16xf32> to vector<16x16xf32>
    %336 = vector.broadcast %333 : vector<1x16xf32> to vector<16x16xf32>
    %337 = arith.mulf %336, %335 : vector<16x16xf32>
    %338 = arith.addf %329, %337 : vector<16x16xf32>
    %c0_346 = arith.constant 0 : index
    %c8_347 = arith.constant 8 : index
    %c0_348 = arith.constant 0 : index
    %c0_349 = arith.constant 0 : index
    %339 = vector.load %arg4[%c0_346, %c8_347, %c0_348, %c0_349] : memref<1x16x16x16xf32, #tpu.memory_space<vmem>>, vector<1x1x16x16xf32>
    %340 = vector.shape_cast %339 : vector<1x1x16x16xf32> to vector<16x16xf32>
    %341 = vector.shape_cast %338 : vector<16x16xf32> to vector<1x1x16x16xf32>
    tpu.vector_store %arg4[%c0_346, %c8_347, %c0_348, %c0_349], %341 {strides = array<i32>} : memref<1x16x16x16xf32, #tpu.memory_space<vmem>>, vector<1x1x16x16xf32>,
    %c0_350 = arith.constant 0 : index
    %c9 = arith.constant 9 : index
    %c0_351 = arith.constant 0 : index
    %c0_352 = arith.constant 0 : index
    %342 = vector.load %arg2[%c0_350, %c9, %c0_351, %c0_352] : memref<1x16x4x16xf32, #tpu.memory_space<vmem>>, vector<1x1x1x16xf32>
    %343 = vector.shape_cast %342 : vector<1x1x1x16xf32> to vector<1x16xf32>
    %cst_353 = arith.constant 2.500000e-01 : f32
    %344 = vector.broadcast %cst_353 : f32 to vector<1x16xf32>
    %345 = arith.mulf %343, %344 : vector<1x16xf32>
    %c0_354 = arith.constant 0 : index
    %c0_355 = arith.constant 0 : index
    %c0_356 = arith.constant 0 : index
    %c0_357 = arith.constant 0 : index
    %346 = vector.load %arg3[%c0_354, %c0_355, %c0_356, %c0_357] : memref<1x4x16x16xf32, #tpu.memory_space<vmem>>, vector<1x1x16x16xf32>
    %347 = vector.shape_cast %346 : vector<1x1x16x16xf32> to vector<16x16xf32>
    %348 = vector.broadcast %345 : vector<1x16xf32> to vector<16x16xf32>
    %349 = arith.mulf %348, %347 : vector<16x16xf32>
    %c0_358 = arith.constant 0 : index
    %c9_359 = arith.constant 9 : index
    %c1_360 = arith.constant 1 : index
    %c0_361 = arith.constant 0 : index
    %350 = vector.load %arg2[%c0_358, %c9_359, %c1_360, %c0_361] : memref<1x16x4x16xf32, #tpu.memory_space<vmem>>, vector<1x1x1x16xf32>
    %351 = vector.shape_cast %350 : vector<1x1x1x16xf32> to vector<1x16xf32>
    %cst_362 = arith.constant 2.500000e-01 : f32
    %352 = vector.broadcast %cst_362 : f32 to vector<1x16xf32>
    %353 = arith.mulf %351, %352 : vector<1x16xf32>
    %c0_363 = arith.constant 0 : index
    %c1_364 = arith.constant 1 : index
    %c0_365 = arith.constant 0 : index
    %c0_366 = arith.constant 0 : index
    %354 = vector.load %arg3[%c0_363, %c1_364, %c0_365, %c0_366] : memref<1x4x16x16xf32, #tpu.memory_space<vmem>>, vector<1x1x16x16xf32>
    %355 = vector.shape_cast %354 : vector<1x1x16x16xf32> to vector<16x16xf32>
    %356 = vector.broadcast %353 : vector<1x16xf32> to vector<16x16xf32>
    %357 = arith.mulf %356, %355 : vector<16x16xf32>
    %358 = arith.addf %349, %357 : vector<16x16xf32>
    %c0_367 = arith.constant 0 : index
    %c9_368 = arith.constant 9 : index
    %c2_369 = arith.constant 2 : index
    %c0_370 = arith.constant 0 : index
    %359 = vector.load %arg2[%c0_367, %c9_368, %c2_369, %c0_370] : memref<1x16x4x16xf32, #tpu.memory_space<vmem>>, vector<1x1x1x16xf32>
    %360 = vector.shape_cast %359 : vector<1x1x1x16xf32> to vector<1x16xf32>
    %cst_371 = arith.constant 2.500000e-01 : f32
    %361 = vector.broadcast %cst_371 : f32 to vector<1x16xf32>
    %362 = arith.mulf %360, %361 : vector<1x16xf32>
    %c0_372 = arith.constant 0 : index
    %c2_373 = arith.constant 2 : index
    %c0_374 = arith.constant 0 : index
    %c0_375 = arith.constant 0 : index
    %363 = vector.load %arg3[%c0_372, %c2_373, %c0_374, %c0_375] : memref<1x4x16x16xf32, #tpu.memory_space<vmem>>, vector<1x1x16x16xf32>
    %364 = vector.shape_cast %363 : vector<1x1x16x16xf32> to vector<16x16xf32>
    %365 = vector.broadcast %362 : vector<1x16xf32> to vector<16x16xf32>
    %366 = arith.mulf %365, %364 : vector<16x16xf32>
    %367 = arith.addf %358, %366 : vector<16x16xf32>
    %c0_376 = arith.constant 0 : index
    %c9_377 = arith.constant 9 : index
    %c3_378 = arith.constant 3 : index
    %c0_379 = arith.constant 0 : index
    %368 = vector.load %arg2[%c0_376, %c9_377, %c3_378, %c0_379] : memref<1x16x4x16xf32, #tpu.memory_space<vmem>>, vector<1x1x1x16xf32>
    %369 = vector.shape_cast %368 : vector<1x1x1x16xf32> to vector<1x16xf32>
    %cst_380 = arith.constant 2.500000e-01 : f32
    %370 = vector.broadcast %cst_380 : f32 to vector<1x16xf32>
    %371 = arith.mulf %369, %370 : vector<1x16xf32>
    %c0_381 = arith.constant 0 : index
    %c3_382 = arith.constant 3 : index
    %c0_383 = arith.constant 0 : index
    %c0_384 = arith.constant 0 : index
    %372 = vector.load %arg3[%c0_381, %c3_382, %c0_383, %c0_384] : memref<1x4x16x16xf32, #tpu.memory_space<vmem>>, vector<1x1x16x16xf32>
    %373 = vector.shape_cast %372 : vector<1x1x16x16xf32> to vector<16x16xf32>
    %374 = vector.broadcast %371 : vector<1x16xf32> to vector<16x16xf32>
    %375 = arith.mulf %374, %373 : vector<16x16xf32>
    %376 = arith.addf %367, %375 : vector<16x16xf32>
    %c0_385 = arith.constant 0 : index
    %c9_386 = arith.constant 9 : index
    %c0_387 = arith.constant 0 : index
    %c0_388 = arith.constant 0 : index
    %377 = vector.load %arg4[%c0_385, %c9_386, %c0_387, %c0_388] : memref<1x16x16x16xf32, #tpu.memory_space<vmem>>, vector<1x1x16x16xf32>
    %378 = vector.shape_cast %377 : vector<1x1x16x16xf32> to vector<16x16xf32>
    %379 = vector.shape_cast %376 : vector<16x16xf32> to vector<1x1x16x16xf32>
    tpu.vector_store %arg4[%c0_385, %c9_386, %c0_387, %c0_388], %379 {strides = array<i32>} : memref<1x16x16x16xf32, #tpu.memory_space<vmem>>, vector<1x1x16x16xf32>,
    %c0_389 = arith.constant 0 : index
    %c10 = arith.constant 10 : index
    %c0_390 = arith.constant 0 : index
    %c0_391 = arith.constant 0 : index
    %380 = vector.load %arg2[%c0_389, %c10, %c0_390, %c0_391] : memref<1x16x4x16xf32, #tpu.memory_space<vmem>>, vector<1x1x1x16xf32>
    %381 = vector.shape_cast %380 : vector<1x1x1x16xf32> to vector<1x16xf32>
    %cst_392 = arith.constant 2.500000e-01 : f32
    %382 = vector.broadcast %cst_392 : f32 to vector<1x16xf32>
    %383 = arith.mulf %381, %382 : vector<1x16xf32>
    %c0_393 = arith.constant 0 : index
    %c0_394 = arith.constant 0 : index
    %c0_395 = arith.constant 0 : index
    %c0_396 = arith.constant 0 : index
    %384 = vector.load %arg3[%c0_393, %c0_394, %c0_395, %c0_396] : memref<1x4x16x16xf32, #tpu.memory_space<vmem>>, vector<1x1x16x16xf32>
    %385 = vector.shape_cast %384 : vector<1x1x16x16xf32> to vector<16x16xf32>
    %386 = vector.broadcast %383 : vector<1x16xf32> to vector<16x16xf32>
    %387 = arith.mulf %386, %385 : vector<16x16xf32>
    %c0_397 = arith.constant 0 : index
    %c10_398 = arith.constant 10 : index
    %c1_399 = arith.constant 1 : index
    %c0_400 = arith.constant 0 : index
    %388 = vector.load %arg2[%c0_397, %c10_398, %c1_399, %c0_400] : memref<1x16x4x16xf32, #tpu.memory_space<vmem>>, vector<1x1x1x16xf32>
    %389 = vector.shape_cast %388 : vector<1x1x1x16xf32> to vector<1x16xf32>
    %cst_401 = arith.constant 2.500000e-01 : f32
    %390 = vector.broadcast %cst_401 : f32 to vector<1x16xf32>
    %391 = arith.mulf %389, %390 : vector<1x16xf32>
    %c0_402 = arith.constant 0 : index
    %c1_403 = arith.constant 1 : index
    %c0_404 = arith.constant 0 : index
    %c0_405 = arith.constant 0 : index
    %392 = vector.load %arg3[%c0_402, %c1_403, %c0_404, %c0_405] : memref<1x4x16x16xf32, #tpu.memory_space<vmem>>, vector<1x1x16x16xf32>
    %393 = vector.shape_cast %392 : vector<1x1x16x16xf32> to vector<16x16xf32>
    %394 = vector.broadcast %391 : vector<1x16xf32> to vector<16x16xf32>
    %395 = arith.mulf %394, %393 : vector<16x16xf32>
    %396 = arith.addf %387, %395 : vector<16x16xf32>
    %c0_406 = arith.constant 0 : index
    %c10_407 = arith.constant 10 : index
    %c2_408 = arith.constant 2 : index
    %c0_409 = arith.constant 0 : index
    %397 = vector.load %arg2[%c0_406, %c10_407, %c2_408, %c0_409] : memref<1x16x4x16xf32, #tpu.memory_space<vmem>>, vector<1x1x1x16xf32>
    %398 = vector.shape_cast %397 : vector<1x1x1x16xf32> to vector<1x16xf32>
    %cst_410 = arith.constant 2.500000e-01 : f32
    %399 = vector.broadcast %cst_410 : f32 to vector<1x16xf32>
    %400 = arith.mulf %398, %399 : vector<1x16xf32>
    %c0_411 = arith.constant 0 : index
    %c2_412 = arith.constant 2 : index
    %c0_413 = arith.constant 0 : index
    %c0_414 = arith.constant 0 : index
    %401 = vector.load %arg3[%c0_411, %c2_412, %c0_413, %c0_414] : memref<1x4x16x16xf32, #tpu.memory_space<vmem>>, vector<1x1x16x16xf32>
    %402 = vector.shape_cast %401 : vector<1x1x16x16xf32> to vector<16x16xf32>
    %403 = vector.broadcast %400 : vector<1x16xf32> to vector<16x16xf32>
    %404 = arith.mulf %403, %402 : vector<16x16xf32>
    %405 = arith.addf %396, %404 : vector<16x16xf32>
    %c0_415 = arith.constant 0 : index
    %c10_416 = arith.constant 10 : index
    %c3_417 = arith.constant 3 : index
    %c0_418 = arith.constant 0 : index
    %406 = vector.load %arg2[%c0_415, %c10_416, %c3_417, %c0_418] : memref<1x16x4x16xf32, #tpu.memory_space<vmem>>, vector<1x1x1x16xf32>
    %407 = vector.shape_cast %406 : vector<1x1x1x16xf32> to vector<1x16xf32>
    %cst_419 = arith.constant 2.500000e-01 : f32
    %408 = vector.broadcast %cst_419 : f32 to vector<1x16xf32>
    %409 = arith.mulf %407, %408 : vector<1x16xf32>
    %c0_420 = arith.constant 0 : index
    %c3_421 = arith.constant 3 : index
    %c0_422 = arith.constant 0 : index
    %c0_423 = arith.constant 0 : index
    %410 = vector.load %arg3[%c0_420, %c3_421, %c0_422, %c0_423] : memref<1x4x16x16xf32, #tpu.memory_space<vmem>>, vector<1x1x16x16xf32>
    %411 = vector.shape_cast %410 : vector<1x1x16x16xf32> to vector<16x16xf32>
    %412 = vector.broadcast %409 : vector<1x16xf32> to vector<16x16xf32>
    %413 = arith.mulf %412, %411 : vector<16x16xf32>
    %414 = arith.addf %405, %413 : vector<16x16xf32>
    %c0_424 = arith.constant 0 : index
    %c10_425 = arith.constant 10 : index
    %c0_426 = arith.constant 0 : index
    %c0_427 = arith.constant 0 : index
    %415 = vector.load %arg4[%c0_424, %c10_425, %c0_426, %c0_427] : memref<1x16x16x16xf32, #tpu.memory_space<vmem>>, vector<1x1x16x16xf32>
    %416 = vector.shape_cast %415 : vector<1x1x16x16xf32> to vector<16x16xf32>
    %417 = vector.shape_cast %414 : vector<16x16xf32> to vector<1x1x16x16xf32>
    tpu.vector_store %arg4[%c0_424, %c10_425, %c0_426, %c0_427], %417 {strides = array<i32>} : memref<1x16x16x16xf32, #tpu.memory_space<vmem>>, vector<1x1x16x16xf32>,
    %c0_428 = arith.constant 0 : index
    %c11 = arith.constant 11 : index
    %c0_429 = arith.constant 0 : index
    %c0_430 = arith.constant 0 : index
    %418 = vector.load %arg2[%c0_428, %c11, %c0_429, %c0_430] : memref<1x16x4x16xf32, #tpu.memory_space<vmem>>, vector<1x1x1x16xf32>
    %419 = vector.shape_cast %418 : vector<1x1x1x16xf32> to vector<1x16xf32>
    %cst_431 = arith.constant 2.500000e-01 : f32
    %420 = vector.broadcast %cst_431 : f32 to vector<1x16xf32>
    %421 = arith.mulf %419, %420 : vector<1x16xf32>
    %c0_432 = arith.constant 0 : index
    %c0_433 = arith.constant 0 : index
    %c0_434 = arith.constant 0 : index
    %c0_435 = arith.constant 0 : index
    %422 = vector.load %arg3[%c0_432, %c0_433, %c0_434, %c0_435] : memref<1x4x16x16xf32, #tpu.memory_space<vmem>>, vector<1x1x16x16xf32>
    %423 = vector.shape_cast %422 : vector<1x1x16x16xf32> to vector<16x16xf32>
    %424 = vector.broadcast %421 : vector<1x16xf32> to vector<16x16xf32>
    %425 = arith.mulf %424, %423 : vector<16x16xf32>
    %c0_436 = arith.constant 0 : index
    %c11_437 = arith.constant 11 : index
    %c1_438 = arith.constant 1 : index
    %c0_439 = arith.constant 0 : index
    %426 = vector.load %arg2[%c0_436, %c11_437, %c1_438, %c0_439] : memref<1x16x4x16xf32, #tpu.memory_space<vmem>>, vector<1x1x1x16xf32>
    %427 = vector.shape_cast %426 : vector<1x1x1x16xf32> to vector<1x16xf32>
    %cst_440 = arith.constant 2.500000e-01 : f32
    %428 = vector.broadcast %cst_440 : f32 to vector<1x16xf32>
    %429 = arith.mulf %427, %428 : vector<1x16xf32>
    %c0_441 = arith.constant 0 : index
    %c1_442 = arith.constant 1 : index
    %c0_443 = arith.constant 0 : index
    %c0_444 = arith.constant 0 : index
    %430 = vector.load %arg3[%c0_441, %c1_442, %c0_443, %c0_444] : memref<1x4x16x16xf32, #tpu.memory_space<vmem>>, vector<1x1x16x16xf32>
    %431 = vector.shape_cast %430 : vector<1x1x16x16xf32> to vector<16x16xf32>
    %432 = vector.broadcast %429 : vector<1x16xf32> to vector<16x16xf32>
    %433 = arith.mulf %432, %431 : vector<16x16xf32>
    %434 = arith.addf %425, %433 : vector<16x16xf32>
    %c0_445 = arith.constant 0 : index
    %c11_446 = arith.constant 11 : index
    %c2_447 = arith.constant 2 : index
    %c0_448 = arith.constant 0 : index
    %435 = vector.load %arg2[%c0_445, %c11_446, %c2_447, %c0_448] : memref<1x16x4x16xf32, #tpu.memory_space<vmem>>, vector<1x1x1x16xf32>
    %436 = vector.shape_cast %435 : vector<1x1x1x16xf32> to vector<1x16xf32>
    %cst_449 = arith.constant 2.500000e-01 : f32
    %437 = vector.broadcast %cst_449 : f32 to vector<1x16xf32>
    %438 = arith.mulf %436, %437 : vector<1x16xf32>
    %c0_450 = arith.constant 0 : index
    %c2_451 = arith.constant 2 : index
    %c0_452 = arith.constant 0 : index
    %c0_453 = arith.constant 0 : index
    %439 = vector.load %arg3[%c0_450, %c2_451, %c0_452, %c0_453] : memref<1x4x16x16xf32, #tpu.memory_space<vmem>>, vector<1x1x16x16xf32>
    %440 = vector.shape_cast %439 : vector<1x1x16x16xf32> to vector<16x16xf32>
    %441 = vector.broadcast %438 : vector<1x16xf32> to vector<16x16xf32>
    %442 = arith.mulf %441, %440 : vector<16x16xf32>
    %443 = arith.addf %434, %442 : vector<16x16xf32>
    %c0_454 = arith.constant 0 : index
    %c11_455 = arith.constant 11 : index
    %c3_456 = arith.constant 3 : index
    %c0_457 = arith.constant 0 : index
    %444 = vector.load %arg2[%c0_454, %c11_455, %c3_456, %c0_457] : memref<1x16x4x16xf32, #tpu.memory_space<vmem>>, vector<1x1x1x16xf32>
    %445 = vector.shape_cast %444 : vector<1x1x1x16xf32> to vector<1x16xf32>
    %cst_458 = arith.constant 2.500000e-01 : f32
    %446 = vector.broadcast %cst_458 : f32 to vector<1x16xf32>
    %447 = arith.mulf %445, %446 : vector<1x16xf32>
    %c0_459 = arith.constant 0 : index
    %c3_460 = arith.constant 3 : index
    %c0_461 = arith.constant 0 : index
    %c0_462 = arith.constant 0 : index
    %448 = vector.load %arg3[%c0_459, %c3_460, %c0_461, %c0_462] : memref<1x4x16x16xf32, #tpu.memory_space<vmem>>, vector<1x1x16x16xf32>
    %449 = vector.shape_cast %448 : vector<1x1x16x16xf32> to vector<16x16xf32>
    %450 = vector.broadcast %447 : vector<1x16xf32> to vector<16x16xf32>
    %451 = arith.mulf %450, %449 : vector<16x16xf32>
    %452 = arith.addf %443, %451 : vector<16x16xf32>
    %c0_463 = arith.constant 0 : index
    %c11_464 = arith.constant 11 : index
    %c0_465 = arith.constant 0 : index
    %c0_466 = arith.constant 0 : index
    %453 = vector.load %arg4[%c0_463, %c11_464, %c0_465, %c0_466] : memref<1x16x16x16xf32, #tpu.memory_space<vmem>>, vector<1x1x16x16xf32>
    %454 = vector.shape_cast %453 : vector<1x1x16x16xf32> to vector<16x16xf32>
    %455 = vector.shape_cast %452 : vector<16x16xf32> to vector<1x1x16x16xf32>
    tpu.vector_store %arg4[%c0_463, %c11_464, %c0_465, %c0_466], %455 {strides = array<i32>} : memref<1x16x16x16xf32, #tpu.memory_space<vmem>>, vector<1x1x16x16xf32>,
    %c0_467 = arith.constant 0 : index
    %c12 = arith.constant 12 : index
    %c0_468 = arith.constant 0 : index
    %c0_469 = arith.constant 0 : index
    %456 = vector.load %arg2[%c0_467, %c12, %c0_468, %c0_469] : memref<1x16x4x16xf32, #tpu.memory_space<vmem>>, vector<1x1x1x16xf32>
    %457 = vector.shape_cast %456 : vector<1x1x1x16xf32> to vector<1x16xf32>
    %cst_470 = arith.constant 2.500000e-01 : f32
    %458 = vector.broadcast %cst_470 : f32 to vector<1x16xf32>
    %459 = arith.mulf %457, %458 : vector<1x16xf32>
    %c0_471 = arith.constant 0 : index
    %c0_472 = arith.constant 0 : index
    %c0_473 = arith.constant 0 : index
    %c0_474 = arith.constant 0 : index
    %460 = vector.load %arg3[%c0_471, %c0_472, %c0_473, %c0_474] : memref<1x4x16x16xf32, #tpu.memory_space<vmem>>, vector<1x1x16x16xf32>
    %461 = vector.shape_cast %460 : vector<1x1x16x16xf32> to vector<16x16xf32>
    %462 = vector.broadcast %459 : vector<1x16xf32> to vector<16x16xf32>
    %463 = arith.mulf %462, %461 : vector<16x16xf32>
    %c0_475 = arith.constant 0 : index
    %c12_476 = arith.constant 12 : index
    %c1_477 = arith.constant 1 : index
    %c0_478 = arith.constant 0 : index
    %464 = vector.load %arg2[%c0_475, %c12_476, %c1_477, %c0_478] : memref<1x16x4x16xf32, #tpu.memory_space<vmem>>, vector<1x1x1x16xf32>
    %465 = vector.shape_cast %464 : vector<1x1x1x16xf32> to vector<1x16xf32>
    %cst_479 = arith.constant 2.500000e-01 : f32
    %466 = vector.broadcast %cst_479 : f32 to vector<1x16xf32>
    %467 = arith.mulf %465, %466 : vector<1x16xf32>
    %c0_480 = arith.constant 0 : index
    %c1_481 = arith.constant 1 : index
    %c0_482 = arith.constant 0 : index
    %c0_483 = arith.constant 0 : index
    %468 = vector.load %arg3[%c0_480, %c1_481, %c0_482, %c0_483] : memref<1x4x16x16xf32, #tpu.memory_space<vmem>>, vector<1x1x16x16xf32>
    %469 = vector.shape_cast %468 : vector<1x1x16x16xf32> to vector<16x16xf32>
    %470 = vector.broadcast %467 : vector<1x16xf32> to vector<16x16xf32>
    %471 = arith.mulf %470, %469 : vector<16x16xf32>
    %472 = arith.addf %463, %471 : vector<16x16xf32>
    %c0_484 = arith.constant 0 : index
    %c12_485 = arith.constant 12 : index
    %c2_486 = arith.constant 2 : index
    %c0_487 = arith.constant 0 : index
    %473 = vector.load %arg2[%c0_484, %c12_485, %c2_486, %c0_487] : memref<1x16x4x16xf32, #tpu.memory_space<vmem>>, vector<1x1x1x16xf32>
    %474 = vector.shape_cast %473 : vector<1x1x1x16xf32> to vector<1x16xf32>
    %cst_488 = arith.constant 2.500000e-01 : f32
    %475 = vector.broadcast %cst_488 : f32 to vector<1x16xf32>
    %476 = arith.mulf %474, %475 : vector<1x16xf32>
    %c0_489 = arith.constant 0 : index
    %c2_490 = arith.constant 2 : index
    %c0_491 = arith.constant 0 : index
    %c0_492 = arith.constant 0 : index
    %477 = vector.load %arg3[%c0_489, %c2_490, %c0_491, %c0_492] : memref<1x4x16x16xf32, #tpu.memory_space<vmem>>, vector<1x1x16x16xf32>
    %478 = vector.shape_cast %477 : vector<1x1x16x16xf32> to vector<16x16xf32>
    %479 = vector.broadcast %476 : vector<1x16xf32> to vector<16x16xf32>
    %480 = arith.mulf %479, %478 : vector<16x16xf32>
    %481 = arith.addf %472, %480 : vector<16x16xf32>
    %c0_493 = arith.constant 0 : index
    %c12_494 = arith.constant 12 : index
    %c3_495 = arith.constant 3 : index
    %c0_496 = arith.constant 0 : index
    %482 = vector.load %arg2[%c0_493, %c12_494, %c3_495, %c0_496] : memref<1x16x4x16xf32, #tpu.memory_space<vmem>>, vector<1x1x1x16xf32>
    %483 = vector.shape_cast %482 : vector<1x1x1x16xf32> to vector<1x16xf32>
    %cst_497 = arith.constant 2.500000e-01 : f32
    %484 = vector.broadcast %cst_497 : f32 to vector<1x16xf32>
    %485 = arith.mulf %483, %484 : vector<1x16xf32>
    %c0_498 = arith.constant 0 : index
    %c3_499 = arith.constant 3 : index
    %c0_500 = arith.constant 0 : index
    %c0_501 = arith.constant 0 : index
    %486 = vector.load %arg3[%c0_498, %c3_499, %c0_500, %c0_501] : memref<1x4x16x16xf32, #tpu.memory_space<vmem>>, vector<1x1x16x16xf32>
    %487 = vector.shape_cast %486 : vector<1x1x16x16xf32> to vector<16x16xf32>
    %488 = vector.broadcast %485 : vector<1x16xf32> to vector<16x16xf32>
    %489 = arith.mulf %488, %487 : vector<16x16xf32>
    %490 = arith.addf %481, %489 : vector<16x16xf32>
    %c0_502 = arith.constant 0 : index
    %c12_503 = arith.constant 12 : index
    %c0_504 = arith.constant 0 : index
    %c0_505 = arith.constant 0 : index
    %491 = vector.load %arg4[%c0_502, %c12_503, %c0_504, %c0_505] : memref<1x16x16x16xf32, #tpu.memory_space<vmem>>, vector<1x1x16x16xf32>
    %492 = vector.shape_cast %491 : vector<1x1x16x16xf32> to vector<16x16xf32>
    %493 = vector.shape_cast %490 : vector<16x16xf32> to vector<1x1x16x16xf32>
    tpu.vector_store %arg4[%c0_502, %c12_503, %c0_504, %c0_505], %493 {strides = array<i32>} : memref<1x16x16x16xf32, #tpu.memory_space<vmem>>, vector<1x1x16x16xf32>,
    %c0_506 = arith.constant 0 : index
    %c13 = arith.constant 13 : index
    %c0_507 = arith.constant 0 : index
    %c0_508 = arith.constant 0 : index
    %494 = vector.load %arg2[%c0_506, %c13, %c0_507, %c0_508] : memref<1x16x4x16xf32, #tpu.memory_space<vmem>>, vector<1x1x1x16xf32>
    %495 = vector.shape_cast %494 : vector<1x1x1x16xf32> to vector<1x16xf32>
    %cst_509 = arith.constant 2.500000e-01 : f32
    %496 = vector.broadcast %cst_509 : f32 to vector<1x16xf32>
    %497 = arith.mulf %495, %496 : vector<1x16xf32>
    %c0_510 = arith.constant 0 : index
    %c0_511 = arith.constant 0 : index
    %c0_512 = arith.constant 0 : index
    %c0_513 = arith.constant 0 : index
    %498 = vector.load %arg3[%c0_510, %c0_511, %c0_512, %c0_513] : memref<1x4x16x16xf32, #tpu.memory_space<vmem>>, vector<1x1x16x16xf32>
    %499 = vector.shape_cast %498 : vector<1x1x16x16xf32> to vector<16x16xf32>
    %500 = vector.broadcast %497 : vector<1x16xf32> to vector<16x16xf32>
    %501 = arith.mulf %500, %499 : vector<16x16xf32>
    %c0_514 = arith.constant 0 : index
    %c13_515 = arith.constant 13 : index
    %c1_516 = arith.constant 1 : index
    %c0_517 = arith.constant 0 : index
    %502 = vector.load %arg2[%c0_514, %c13_515, %c1_516, %c0_517] : memref<1x16x4x16xf32, #tpu.memory_space<vmem>>, vector<1x1x1x16xf32>
    %503 = vector.shape_cast %502 : vector<1x1x1x16xf32> to vector<1x16xf32>
    %cst_518 = arith.constant 2.500000e-01 : f32
    %504 = vector.broadcast %cst_518 : f32 to vector<1x16xf32>
    %505 = arith.mulf %503, %504 : vector<1x16xf32>
    %c0_519 = arith.constant 0 : index
    %c1_520 = arith.constant 1 : index
    %c0_521 = arith.constant 0 : index
    %c0_522 = arith.constant 0 : index
    %506 = vector.load %arg3[%c0_519, %c1_520, %c0_521, %c0_522] : memref<1x4x16x16xf32, #tpu.memory_space<vmem>>, vector<1x1x16x16xf32>
    %507 = vector.shape_cast %506 : vector<1x1x16x16xf32> to vector<16x16xf32>
    %508 = vector.broadcast %505 : vector<1x16xf32> to vector<16x16xf32>
    %509 = arith.mulf %508, %507 : vector<16x16xf32>
    %510 = arith.addf %501, %509 : vector<16x16xf32>
    %c0_523 = arith.constant 0 : index
    %c13_524 = arith.constant 13 : index
    %c2_525 = arith.constant 2 : index
    %c0_526 = arith.constant 0 : index
    %511 = vector.load %arg2[%c0_523, %c13_524, %c2_525, %c0_526] : memref<1x16x4x16xf32, #tpu.memory_space<vmem>>, vector<1x1x1x16xf32>
    %512 = vector.shape_cast %511 : vector<1x1x1x16xf32> to vector<1x16xf32>
    %cst_527 = arith.constant 2.500000e-01 : f32
    %513 = vector.broadcast %cst_527 : f32 to vector<1x16xf32>
    %514 = arith.mulf %512, %513 : vector<1x16xf32>
    %c0_528 = arith.constant 0 : index
    %c2_529 = arith.constant 2 : index
    %c0_530 = arith.constant 0 : index
    %c0_531 = arith.constant 0 : index
    %515 = vector.load %arg3[%c0_528, %c2_529, %c0_530, %c0_531] : memref<1x4x16x16xf32, #tpu.memory_space<vmem>>, vector<1x1x16x16xf32>
    %516 = vector.shape_cast %515 : vector<1x1x16x16xf32> to vector<16x16xf32>
    %517 = vector.broadcast %514 : vector<1x16xf32> to vector<16x16xf32>
    %518 = arith.mulf %517, %516 : vector<16x16xf32>
    %519 = arith.addf %510, %518 : vector<16x16xf32>
    %c0_532 = arith.constant 0 : index
    %c13_533 = arith.constant 13 : index
    %c3_534 = arith.constant 3 : index
    %c0_535 = arith.constant 0 : index
    %520 = vector.load %arg2[%c0_532, %c13_533, %c3_534, %c0_535] : memref<1x16x4x16xf32, #tpu.memory_space<vmem>>, vector<1x1x1x16xf32>
    %521 = vector.shape_cast %520 : vector<1x1x1x16xf32> to vector<1x16xf32>
    %cst_536 = arith.constant 2.500000e-01 : f32
    %522 = vector.broadcast %cst_536 : f32 to vector<1x16xf32>
    %523 = arith.mulf %521, %522 : vector<1x16xf32>
    %c0_537 = arith.constant 0 : index
    %c3_538 = arith.constant 3 : index
    %c0_539 = arith.constant 0 : index
    %c0_540 = arith.constant 0 : index
    %524 = vector.load %arg3[%c0_537, %c3_538, %c0_539, %c0_540] : memref<1x4x16x16xf32, #tpu.memory_space<vmem>>, vector<1x1x16x16xf32>
    %525 = vector.shape_cast %524 : vector<1x1x16x16xf32> to vector<16x16xf32>
    %526 = vector.broadcast %523 : vector<1x16xf32> to vector<16x16xf32>
    %527 = arith.mulf %526, %525 : vector<16x16xf32>
    %528 = arith.addf %519, %527 : vector<16x16xf32>
    %c0_541 = arith.constant 0 : index
    %c13_542 = arith.constant 13 : index
    %c0_543 = arith.constant 0 : index
    %c0_544 = arith.constant 0 : index
    %529 = vector.load %arg4[%c0_541, %c13_542, %c0_543, %c0_544] : memref<1x16x16x16xf32, #tpu.memory_space<vmem>>, vector<1x1x16x16xf32>
    %530 = vector.shape_cast %529 : vector<1x1x16x16xf32> to vector<16x16xf32>
    %531 = vector.shape_cast %528 : vector<16x16xf32> to vector<1x1x16x16xf32>
    tpu.vector_store %arg4[%c0_541, %c13_542, %c0_543, %c0_544], %531 {strides = array<i32>} : memref<1x16x16x16xf32, #tpu.memory_space<vmem>>, vector<1x1x16x16xf32>,
    %c0_545 = arith.constant 0 : index
    %c14 = arith.constant 14 : index
    %c0_546 = arith.constant 0 : index
    %c0_547 = arith.constant 0 : index
    %532 = vector.load %arg2[%c0_545, %c14, %c0_546, %c0_547] : memref<1x16x4x16xf32, #tpu.memory_space<vmem>>, vector<1x1x1x16xf32>
    %533 = vector.shape_cast %532 : vector<1x1x1x16xf32> to vector<1x16xf32>
    %cst_548 = arith.constant 2.500000e-01 : f32
    %534 = vector.broadcast %cst_548 : f32 to vector<1x16xf32>
    %535 = arith.mulf %533, %534 : vector<1x16xf32>
    %c0_549 = arith.constant 0 : index
    %c0_550 = arith.constant 0 : index
    %c0_551 = arith.constant 0 : index
    %c0_552 = arith.constant 0 : index
    %536 = vector.load %arg3[%c0_549, %c0_550, %c0_551, %c0_552] : memref<1x4x16x16xf32, #tpu.memory_space<vmem>>, vector<1x1x16x16xf32>
    %537 = vector.shape_cast %536 : vector<1x1x16x16xf32> to vector<16x16xf32>
    %538 = vector.broadcast %535 : vector<1x16xf32> to vector<16x16xf32>
    %539 = arith.mulf %538, %537 : vector<16x16xf32>
    %c0_553 = arith.constant 0 : index
    %c14_554 = arith.constant 14 : index
    %c1_555 = arith.constant 1 : index
    %c0_556 = arith.constant 0 : index
    %540 = vector.load %arg2[%c0_553, %c14_554, %c1_555, %c0_556] : memref<1x16x4x16xf32, #tpu.memory_space<vmem>>, vector<1x1x1x16xf32>
    %541 = vector.shape_cast %540 : vector<1x1x1x16xf32> to vector<1x16xf32>
    %cst_557 = arith.constant 2.500000e-01 : f32
    %542 = vector.broadcast %cst_557 : f32 to vector<1x16xf32>
    %543 = arith.mulf %541, %542 : vector<1x16xf32>
    %c0_558 = arith.constant 0 : index
    %c1_559 = arith.constant 1 : index
    %c0_560 = arith.constant 0 : index
    %c0_561 = arith.constant 0 : index
    %544 = vector.load %arg3[%c0_558, %c1_559, %c0_560, %c0_561] : memref<1x4x16x16xf32, #tpu.memory_space<vmem>>, vector<1x1x16x16xf32>
    %545 = vector.shape_cast %544 : vector<1x1x16x16xf32> to vector<16x16xf32>
    %546 = vector.broadcast %543 : vector<1x16xf32> to vector<16x16xf32>
    %547 = arith.mulf %546, %545 : vector<16x16xf32>
    %548 = arith.addf %539, %547 : vector<16x16xf32>
    %c0_562 = arith.constant 0 : index
    %c14_563 = arith.constant 14 : index
    %c2_564 = arith.constant 2 : index
    %c0_565 = arith.constant 0 : index
    %549 = vector.load %arg2[%c0_562, %c14_563, %c2_564, %c0_565] : memref<1x16x4x16xf32, #tpu.memory_space<vmem>>, vector<1x1x1x16xf32>
    %550 = vector.shape_cast %549 : vector<1x1x1x16xf32> to vector<1x16xf32>
    %cst_566 = arith.constant 2.500000e-01 : f32
    %551 = vector.broadcast %cst_566 : f32 to vector<1x16xf32>
    %552 = arith.mulf %550, %551 : vector<1x16xf32>
    %c0_567 = arith.constant 0 : index
    %c2_568 = arith.constant 2 : index
    %c0_569 = arith.constant 0 : index
    %c0_570 = arith.constant 0 : index
    %553 = vector.load %arg3[%c0_567, %c2_568, %c0_569, %c0_570] : memref<1x4x16x16xf32, #tpu.memory_space<vmem>>, vector<1x1x16x16xf32>
    %554 = vector.shape_cast %553 : vector<1x1x16x16xf32> to vector<16x16xf32>
    %555 = vector.broadcast %552 : vector<1x16xf32> to vector<16x16xf32>
    %556 = arith.mulf %555, %554 : vector<16x16xf32>
    %557 = arith.addf %548, %556 : vector<16x16xf32>
    %c0_571 = arith.constant 0 : index
    %c14_572 = arith.constant 14 : index
    %c3_573 = arith.constant 3 : index
    %c0_574 = arith.constant 0 : index
    %558 = vector.load %arg2[%c0_571, %c14_572, %c3_573, %c0_574] : memref<1x16x4x16xf32, #tpu.memory_space<vmem>>, vector<1x1x1x16xf32>
    %559 = vector.shape_cast %558 : vector<1x1x1x16xf32> to vector<1x16xf32>
    %cst_575 = arith.constant 2.500000e-01 : f32
    %560 = vector.broadcast %cst_575 : f32 to vector<1x16xf32>
    %561 = arith.mulf %559, %560 : vector<1x16xf32>
    %c0_576 = arith.constant 0 : index
    %c3_577 = arith.constant 3 : index
    %c0_578 = arith.constant 0 : index
    %c0_579 = arith.constant 0 : index
    %562 = vector.load %arg3[%c0_576, %c3_577, %c0_578, %c0_579] : memref<1x4x16x16xf32, #tpu.memory_space<vmem>>, vector<1x1x16x16xf32>
    %563 = vector.shape_cast %562 : vector<1x1x16x16xf32> to vector<16x16xf32>
    %564 = vector.broadcast %561 : vector<1x16xf32> to vector<16x16xf32>
    %565 = arith.mulf %564, %563 : vector<16x16xf32>
    %566 = arith.addf %557, %565 : vector<16x16xf32>
    %c0_580 = arith.constant 0 : index
    %c14_581 = arith.constant 14 : index
    %c0_582 = arith.constant 0 : index
    %c0_583 = arith.constant 0 : index
    %567 = vector.load %arg4[%c0_580, %c14_581, %c0_582, %c0_583] : memref<1x16x16x16xf32, #tpu.memory_space<vmem>>, vector<1x1x16x16xf32>
    %568 = vector.shape_cast %567 : vector<1x1x16x16xf32> to vector<16x16xf32>
    %569 = vector.shape_cast %566 : vector<16x16xf32> to vector<1x1x16x16xf32>
    tpu.vector_store %arg4[%c0_580, %c14_581, %c0_582, %c0_583], %569 {strides = array<i32>} : memref<1x16x16x16xf32, #tpu.memory_space<vmem>>, vector<1x1x16x16xf32>,
    %c0_584 = arith.constant 0 : index
    %c15 = arith.constant 15 : index
    %c0_585 = arith.constant 0 : index
    %c0_586 = arith.constant 0 : index
    %570 = vector.load %arg2[%c0_584, %c15, %c0_585, %c0_586] : memref<1x16x4x16xf32, #tpu.memory_space<vmem>>, vector<1x1x1x16xf32>
    %571 = vector.shape_cast %570 : vector<1x1x1x16xf32> to vector<1x16xf32>
    %cst_587 = arith.constant 2.500000e-01 : f32
    %572 = vector.broadcast %cst_587 : f32 to vector<1x16xf32>
    %573 = arith.mulf %571, %572 : vector<1x16xf32>
    %c0_588 = arith.constant 0 : index
    %c0_589 = arith.constant 0 : index
    %c0_590 = arith.constant 0 : index
    %c0_591 = arith.constant 0 : index
    %574 = vector.load %arg3[%c0_588, %c0_589, %c0_590, %c0_591] : memref<1x4x16x16xf32, #tpu.memory_space<vmem>>, vector<1x1x16x16xf32>
    %575 = vector.shape_cast %574 : vector<1x1x16x16xf32> to vector<16x16xf32>
    %576 = vector.broadcast %573 : vector<1x16xf32> to vector<16x16xf32>
    %577 = arith.mulf %576, %575 : vector<16x16xf32>
    %c0_592 = arith.constant 0 : index
    %c15_593 = arith.constant 15 : index
    %c1_594 = arith.constant 1 : index
    %c0_595 = arith.constant 0 : index
    %578 = vector.load %arg2[%c0_592, %c15_593, %c1_594, %c0_595] : memref<1x16x4x16xf32, #tpu.memory_space<vmem>>, vector<1x1x1x16xf32>
    %579 = vector.shape_cast %578 : vector<1x1x1x16xf32> to vector<1x16xf32>
    %cst_596 = arith.constant 2.500000e-01 : f32
    %580 = vector.broadcast %cst_596 : f32 to vector<1x16xf32>
    %581 = arith.mulf %579, %580 : vector<1x16xf32>
    %c0_597 = arith.constant 0 : index
    %c1_598 = arith.constant 1 : index
    %c0_599 = arith.constant 0 : index
    %c0_600 = arith.constant 0 : index
    %582 = vector.load %arg3[%c0_597, %c1_598, %c0_599, %c0_600] : memref<1x4x16x16xf32, #tpu.memory_space<vmem>>, vector<1x1x16x16xf32>
    %583 = vector.shape_cast %582 : vector<1x1x16x16xf32> to vector<16x16xf32>
    %584 = vector.broadcast %581 : vector<1x16xf32> to vector<16x16xf32>
    %585 = arith.mulf %584, %583 : vector<16x16xf32>
    %586 = arith.addf %577, %585 : vector<16x16xf32>
    %c0_601 = arith.constant 0 : index
    %c15_602 = arith.constant 15 : index
    %c2_603 = arith.constant 2 : index
    %c0_604 = arith.constant 0 : index
    %587 = vector.load %arg2[%c0_601, %c15_602, %c2_603, %c0_604] : memref<1x16x4x16xf32, #tpu.memory_space<vmem>>, vector<1x1x1x16xf32>
    %588 = vector.shape_cast %587 : vector<1x1x1x16xf32> to vector<1x16xf32>
    %cst_605 = arith.constant 2.500000e-01 : f32
    %589 = vector.broadcast %cst_605 : f32 to vector<1x16xf32>
    %590 = arith.mulf %588, %589 : vector<1x16xf32>
    %c0_606 = arith.constant 0 : index
    %c2_607 = arith.constant 2 : index
    %c0_608 = arith.constant 0 : index
    %c0_609 = arith.constant 0 : index
    %591 = vector.load %arg3[%c0_606, %c2_607, %c0_608, %c0_609] : memref<1x4x16x16xf32, #tpu.memory_space<vmem>>, vector<1x1x16x16xf32>
    %592 = vector.shape_cast %591 : vector<1x1x16x16xf32> to vector<16x16xf32>
    %593 = vector.broadcast %590 : vector<1x16xf32> to vector<16x16xf32>
    %594 = arith.mulf %593, %592 : vector<16x16xf32>
    %595 = arith.addf %586, %594 : vector<16x16xf32>
    %c0_610 = arith.constant 0 : index
    %c15_611 = arith.constant 15 : index
    %c3_612 = arith.constant 3 : index
    %c0_613 = arith.constant 0 : index
    %596 = vector.load %arg2[%c0_610, %c15_611, %c3_612, %c0_613] : memref<1x16x4x16xf32, #tpu.memory_space<vmem>>, vector<1x1x1x16xf32>
    %597 = vector.shape_cast %596 : vector<1x1x1x16xf32> to vector<1x16xf32>
    %cst_614 = arith.constant 2.500000e-01 : f32
    %598 = vector.broadcast %cst_614 : f32 to vector<1x16xf32>
    %599 = arith.mulf %597, %598 : vector<1x16xf32>
    %c0_615 = arith.constant 0 : index
    %c3_616 = arith.constant 3 : index
    %c0_617 = arith.constant 0 : index
    %c0_618 = arith.constant 0 : index
    %600 = vector.load %arg3[%c0_615, %c3_616, %c0_617, %c0_618] : memref<1x4x16x16xf32, #tpu.memory_space<vmem>>, vector<1x1x16x16xf32>
    %601 = vector.shape_cast %600 : vector<1x1x16x16xf32> to vector<16x16xf32>
    %602 = vector.broadcast %599 : vector<1x16xf32> to vector<16x16xf32>
    %603 = arith.mulf %602, %601 : vector<16x16xf32>
    %604 = arith.addf %595, %603 : vector<16x16xf32>
    %c0_619 = arith.constant 0 : index
    %c15_620 = arith.constant 15 : index
    %c0_621 = arith.constant 0 : index
    %c0_622 = arith.constant 0 : index
    %605 = vector.load %arg4[%c0_619, %c15_620, %c0_621, %c0_622] : memref<1x16x16x16xf32, #tpu.memory_space<vmem>>, vector<1x1x16x16xf32>
    %606 = vector.shape_cast %605 : vector<1x1x16x16xf32> to vector<16x16xf32>
    %607 = vector.shape_cast %604 : vector<16x16xf32> to vector<1x1x16x16xf32>
    tpu.vector_store %arg4[%c0_619, %c15_620, %c0_621, %c0_622], %607 {strides = array<i32>} : memref<1x16x16x16xf32, #tpu.memory_space<vmem>>, vector<1x1x16x16xf32>,
    return
  }
  func.func @transform_0(%arg0: i32, %arg1: i32) -> (i32, i32, i32, i32) {
    %c0_i32 = arith.constant 0 : i32
    %c0_i32_0 = arith.constant 0 : i32
    %c0_i32_1 = arith.constant 0 : i32
    return %arg0, %c0_i32, %c0_i32_0, %arg1 : i32, i32, i32, i32
  }
  func.func @transform_1(%arg0: i32, %arg1: i32) -> (i32, i32, i32, i32) {
    %c0_i32 = arith.constant 0 : i32
    %c0_i32_0 = arith.constant 0 : i32
    %c0_i32_1 = arith.constant 0 : i32
    return %arg0, %c0_i32, %c0_i32_0, %arg1 : i32, i32, i32, i32
  }
  func.func @transform_2(%arg0: i32, %arg1: i32) -> (i32, i32, i32, i32) {
    %c0_i32 = arith.constant 0 : i32
    %c0_i32_0 = arith.constant 0 : i32
    %c0_i32_1 = arith.constant 0 : i32
    return %arg0, %c0_i32, %c0_i32_0, %arg1 : i32, i32, i32, i32
  }
}

</mosaic_0001>

<bundles_post_ra>
// kernel: squeeze.3
= control target key start
LH: loop header
LB: loop body
LE: loop exit
PB: predicated region body
PF: predicated region fallthrough
CT: control target
= control target key end

     0   :  { %s1498_s12 = smov 124   ;;  %vm3_vm0 = vcmask 31744   ;;  %s1500_s10 = smov 116   ;;  %s2235_s0 = inlined_call_operand.vmem [shape: f32[2,1,4,16,16], index: 0, kind: input, shape index: {}]   ;;  %s2236_s1 = inlined_call_operand.vmem [shape: f32[2,4,4,4,4,4], index: 1, kind: output, shape index: {}]  }
   0x1   :  { %v1514_v0 = vld [vmem:[%s2235_s0 + $0x20] sm:$0xff]   ;;  %v1519_v1 = vld [vmem:[%s2235_s0 + $0x10] sm:$0xff]   ;;  %v1535_v3 = vld [vmem:[%s2235_s0 + $0x28] sm:$0xff]  }
   0x2   :  { %v1524_v2 = vld [vmem:[%s2235_s0] sm:$0xff]   ;;  %148 = vrot.lane.b32.xlu2 %v1514_v0, %s1498_s12  ;;  %130 = vrot.lane.b32.xlu1 %v1519_v1, %s1498_s12  ;;  %v1540_v4 = vld [vmem:[%s2235_s0 + $0x18] sm:$0xff]   ;;  %33 = vst.msk [vmem:[#allocation0 + $0x100] ss:$8 sm:$0xf0] %vm3_vm0, %v1514_v0  }
   0x3   :  { %112 = vrot.lane.b32.xlu0 %v1524_v2, %s1498_s12  ;;  %v1545_v5 = vld [vmem:[%s2235_s0 + $0x8] sm:$0xff]   ;;  %v1556_v6 = vld [vmem:[%s2235_s0 + $0x40] sm:$0xff]   ;;  %v1561_v7 = vld [vmem:[%s2235_s0 + $0x38] sm:$0xff]   ;;  %31 = vst.msk [vmem:[#allocation0 + $0x100] ss:$8 sm:$0xf] %vm3_vm0, %v1514_v0  }
   0x4   :  { %v1566_v8 = vld [vmem:[%s2235_s0 + $0x30] sm:$0xff]   ;;  %v1577_v9 = vld [vmem:[%s2235_s0 + $0x58] sm:$0xff]   ;;  %v1587_v11 = vld [vmem:[%s2235_s0 + $0x48] sm:$0xff]   ;;  %59 = vst.msk [vmem:[#allocation0 + $0x200] ss:$8 sm:$0xf] %vm3_vm0, %v1556_v6  }
   0x5   :  { %v1582_v10 = vld [vmem:[%s2235_s0 + $0x50] sm:$0xff]   ;;  %v1603_v13 = vld [vmem:[%s2235_s0 + $0x68] sm:$0xff]   ;;  %v1608_v14 = vld [vmem:[%s2235_s0 + $0x60] sm:$0xff]   ;;  %61 = vst.msk [vmem:[#allocation0 + $0x200] ss:$8 sm:$0xf0] %vm3_vm0, %v1556_v6  }
   0x6   :  { %v1598_v12 = vld [vmem:[%s2235_s0 + $0x70] sm:$0xff]   ;;  %v1619_v15 = vld [vmem:[%s2235_s0 + $0x78] sm:$0xff]   ;;  %s1499_s0 = smov 120   ;;  %17 = vst.msk [vmem:[#allocation0 + $0x80] ss:$8 sm:$0xf] %vm3_vm0, %v1519_v1  }
   0x7   :  { %19 = vst.msk [vmem:[#allocation0 + $0x80] ss:$8 sm:$0xf0] %vm3_vm0, %v1519_v1  }
   0x8   :  { %4 = vst.msk [vmem:[#allocation0] ss:$8 sm:$0xf] %vm3_vm0, %v1524_v2  }
   0x9   :  { %5 = vst.msk [vmem:[#allocation0] ss:$8 sm:$0xf0] %vm3_vm0, %v1524_v2  }
   0xa   :  { %157 = vrot.lane.b32.xlu2 %v1535_v3, %s1498_s12  ;;  %139 = vrot.lane.b32.xlu1 %v1540_v4, %s1498_s12  ;;  %24 = vst.msk [vmem:[#allocation0 + $0xc0] ss:$8 sm:$0xf] %vm3_vm0, %v1540_v4  }
   0xb   :  { %121 = vrot.lane.b32.xlu0 %v1545_v5, %s1498_s12  ;;  %26 = vst.msk [vmem:[#allocation0 + $0xc0] ss:$8 sm:$0xf0] %vm3_vm0, %v1540_v4  }
   0xc   :  { %10 = vst.msk [vmem:[#allocation0 + $0x40] ss:$8 sm:$0xf] %vm3_vm0, %v1545_v5  }
   0xd   :  { %12 = vst.msk [vmem:[#allocation0 + $0x40] ss:$8 sm:$0xf0] %vm3_vm0, %v1545_v5  }
   0xe   :  { %45 = vst.msk [vmem:[#allocation0 + $0x180] ss:$8 sm:$0xf] %vm3_vm0, %v1566_v8  }
   0xf   :  { %47 = vst.msk [vmem:[#allocation0 + $0x180] ss:$8 sm:$0xf0] %vm3_vm0, %v1566_v8  }
  0x10   :  { %73 = vst.msk [vmem:[#allocation0 + $0x280] ss:$8 sm:$0xf] %vm3_vm0, %v1582_v10  }
  0x11   :  { %75 = vst.msk [vmem:[#allocation0 + $0x280] ss:$8 sm:$0xf0] %vm3_vm0, %v1582_v10  }
  0x12   :  { %184 = vrot.lane.b32.xlu2 %v1556_v6, %s1498_s12  ;;  %175 = vrot.lane.b32.xlu1 %v1561_v7, %s1498_s12  ;;  %66 = vst.msk [vmem:[#allocation0 + $0x240] ss:$8 sm:$0xf] %vm3_vm0, %v1587_v11  }
  0x13   :  { %166 = vrot.lane.b32.xlu0 %v1566_v8, %s1498_s12  ;;  %68 = vst.msk [vmem:[#allocation0 + $0x240] ss:$8 sm:$0xf0] %vm3_vm0, %v1587_v11  }
  0x14   :  { %54 = vst.msk [vmem:[#allocation0 + $0x1c0] ss:$8 sm:$0xf0] %vm3_vm0, %v1561_v7  }
  0x15   :  { %52 = vst.msk [vmem:[#allocation0 + $0x1c0] ss:$8 sm:$0xf] %vm3_vm0, %v1561_v7  }
  0x16   :  { %87 = vst.msk [vmem:[#allocation0 + $0x300] ss:$8 sm:$0xf] %vm3_vm0, %v1608_v14  }
  0x17   :  { %89 = vst.msk [vmem:[#allocation0 + $0x300] ss:$8 sm:$0xf0] %vm3_vm0, %v1608_v14  }
  0x18   :  { %38 = vst.msk [vmem:[#allocation0 + $0x140] ss:$8 sm:$0xf] %vm3_vm0, %v1535_v3  }
  0x19   :  { %40 = vst.msk [vmem:[#allocation0 + $0x140] ss:$8 sm:$0xf0] %vm3_vm0, %v1535_v3  }
  0x1a   :  { %211 = vrot.lane.b32.xlu2 %v1577_v9, %s1498_s12  ;;  %202 = vrot.lane.b32.xlu1 %v1582_v10, %s1498_s12  ;;  %108 = vst.msk [vmem:[#allocation0 + $0x3c0] ss:$8 sm:$0xf] %vm3_vm0, %v1619_v15  }
  0x1b   :  { %193 = vrot.lane.b32.xlu0 %v1587_v11, %s1498_s12  ;;  %110 = vst.msk [vmem:[#allocation0 + $0x3c0] ss:$8 sm:$0xf0] %vm3_vm0, %v1619_v15  }
  0x1c   :  { %80 = vst.msk [vmem:[#allocation0 + $0x2c0] ss:$8 sm:$0xf] %vm3_vm0, %v1577_v9  }
  0x1d   :  { %82 = vst.msk [vmem:[#allocation0 + $0x2c0] ss:$8 sm:$0xf0] %vm3_vm0, %v1577_v9  }
  0x1e   :  { %101 = vst.msk [vmem:[#allocation0 + $0x380] ss:$8 sm:$0xf] %vm3_vm0, %v1598_v12  }
  0x1f   :  { %103 = vst.msk [vmem:[#allocation0 + $0x380] ss:$8 sm:$0xf0] %vm3_vm0, %v1598_v12  }
  0x20   :  { %94 = vst.msk [vmem:[#allocation0 + $0x340] ss:$8 sm:$0xf] %vm3_vm0, %v1603_v13  }
  0x21   :  { %96 = vst.msk [vmem:[#allocation0 + $0x340] ss:$8 sm:$0xf0] %vm3_vm0, %v1603_v13  }
  0x22   :  { %238 = vrot.lane.b32.xlu2 %v1598_v12, %s1498_s12  ;;  %229 = vrot.lane.b32.xlu1 %v1603_v13, %s1498_s12 }
  0x23   :  { %220 = vrot.lane.b32.xlu0 %v1608_v14, %s1498_s12 }
  0x2a   :  { %264 = vrot.lane.b32.xlu2 %v1545_v5, %s1499_s0  ;;  %255 = vrot.lane.b32.xlu1 %v1524_v2, %s1499_s0 }
  0x2b   :  { %247 = vrot.lane.b32.xlu0 %v1619_v15, %s1498_s12 }
  0x32   :  { %291 = vrot.lane.b32.xlu2 %v1514_v0, %s1499_s0  ;;  %282 = vrot.lane.b32.xlu1 %v1540_v4, %s1499_s0 }
  0x33   :  { %273 = vrot.lane.b32.xlu0 %v1519_v1, %s1499_s0 }
  0x3a   :  { %318 = vrot.lane.b32.xlu2 %v1561_v7, %s1499_s0  ;;  %309 = vrot.lane.b32.xlu1 %v1566_v8, %s1499_s0 }
  0x3b   :  { %300 = vrot.lane.b32.xlu0 %v1535_v3, %s1499_s0 }
  0x42   :  { %345 = vrot.lane.b32.xlu2 %v1582_v10, %s1499_s0  ;;  %336 = vrot.lane.b32.xlu1 %v1587_v11, %s1499_s0 }
  0x43   :  { %327 = vrot.lane.b32.xlu0 %v1556_v6, %s1499_s0 }
  0x4a   :  { %372 = vrot.lane.b32.xlu2 %v1603_v13, %s1499_s0  ;;  %363 = vrot.lane.b32.xlu1 %v1608_v14, %s1499_s0 }
  0x4b   :  { %354 = vrot.lane.b32.xlu0 %v1577_v9, %s1499_s0 }
  0x52   :  { %398 = vrot.lane.b32.xlu2 %v1524_v2, %s1500_s10  ;;  %390 = vrot.lane.b32.xlu1 %v1619_v15, %s1499_s0 }
  0x53   :  { %381 = vrot.lane.b32.xlu0 %v1598_v12, %s1499_s0 }
  0x5a   :  { %425 = vrot.lane.b32.xlu2 %v1540_v4, %s1500_s10  ;;  %416 = vrot.lane.b32.xlu1 %v1519_v1, %s1500_s10 }
  0x5b   :  { %407 = vrot.lane.b32.xlu0 %v1545_v5, %s1500_s10 }
  0x5c   :  { %v149_v16 = vpop.permute.xlu2 %148  }
  0x5d   :  { %152 = vst.msk [vmem:[#allocation0 + $0x101] ss:$8 sm:$0xf] %vm3_vm0, %v149_v16  }
  0x5e   :  { %154 = vst.msk [vmem:[#allocation0 + $0x101] ss:$8 sm:$0xf0] %vm3_vm0, %v149_v16  }
  0x62   :  { %452 = vrot.lane.b32.xlu2 %v1566_v8, %s1500_s10  ;;  %443 = vrot.lane.b32.xlu1 %v1535_v3, %s1500_s10 }
  0x63   :  { %434 = vrot.lane.b32.xlu0 %v1514_v0, %s1500_s10 }
  0x64   :  { %v158_v17 = vpop.permute.xlu2 %157  }
  0x65   :  { %161 = vst.msk [vmem:[#allocation0 + $0x141] ss:$8 sm:$0xf] %vm3_vm0, %v158_v17  }
  0x66   :  { %163 = vst.msk [vmem:[#allocation0 + $0x141] ss:$8 sm:$0xf0] %vm3_vm0, %v158_v17  }
  0x6a   :  { %479 = vrot.lane.b32.xlu2 %v1587_v11, %s1500_s10  ;;  %470 = vrot.lane.b32.xlu1 %v1556_v6, %s1500_s10 }
  0x6b   :  { %461 = vrot.lane.b32.xlu0 %v1561_v7, %s1500_s10 }
  0x6c   :  { %v185_v18 = vpop.permute.xlu2 %184  }
  0x6d   :  { %188 = vst.msk [vmem:[#allocation0 + $0x201] ss:$8 sm:$0xf] %vm3_vm0, %v185_v18  }
  0x6e   :  { %190 = vst.msk [vmem:[#allocation0 + $0x201] ss:$8 sm:$0xf0] %vm3_vm0, %v185_v18  }
  0x72   :  { %506 = vrot.lane.b32.xlu2 %v1608_v14, %s1500_s10  ;;  %497 = vrot.lane.b32.xlu1 %v1577_v9, %s1500_s10 }
  0x73   :  { %488 = vrot.lane.b32.xlu0 %v1582_v10, %s1500_s10 }
  0x74   :  { %v212_v19 = vpop.permute.xlu2 %211   ;;  %v131_v20 = vpop.permute.xlu1 %130  }
  0x75   :  { %215 = vst.msk [vmem:[#allocation0 + $0x2c1] ss:$8 sm:$0xf] %vm3_vm0, %v212_v19   ;;  %v113_v21 = vpop.permute.xlu0 %112  }
  0x76   :  { %217 = vst.msk [vmem:[#allocation0 + $0x2c1] ss:$8 sm:$0xf0] %vm3_vm0, %v212_v19  }
  0x77   :  { %134 = vst.msk [vmem:[#allocation0 + $0x81] ss:$8 sm:$0xf] %vm3_vm0, %v131_v20  }
  0x78   :  { %136 = vst.msk [vmem:[#allocation0 + $0x81] ss:$8 sm:$0xf0] %vm3_vm0, %v131_v20  }
  0x79   :  { %116 = vst.msk [vmem:[#allocation0 + $0x1] ss:$8 sm:$0xf] %vm3_vm0, %v113_v21  }
  0x7a   :  { %118 = vst.msk [vmem:[#allocation0 + $0x1] ss:$8 sm:$0xf0] %vm3_vm0, %v113_v21   ;;  %533 = vrot.lane.b32.xlu2 %v1619_v15, %s1500_s10  ;;  %524 = vrot.lane.b32.xlu1 %v1598_v12, %s1500_s10 }
  0x7b   :  { %515 = vrot.lane.b32.xlu0 %v1603_v13, %s1500_s10 }
  0x7c   :  { %v239_v22 = vpop.permute.xlu2 %238   ;;  %v140_v23 = vpop.permute.xlu1 %139  }
  0x7d   :  { %242 = vst.msk [vmem:[#allocation0 + $0x381] ss:$8 sm:$0xf] %vm3_vm0, %v239_v22   ;;  %v122_v24 = vpop.permute.xlu0 %121  }
  0x7e   :  { %244 = vst.msk [vmem:[#allocation0 + $0x381] ss:$8 sm:$0xf0] %vm3_vm0, %v239_v22  }
  0x7f   :  { %143 = vst.msk [vmem:[#allocation0 + $0xc1] ss:$8 sm:$0xf] %vm3_vm0, %v140_v23  }
  0x80   :  { %145 = vst.msk [vmem:[#allocation0 + $0xc1] ss:$8 sm:$0xf0] %vm3_vm0, %v140_v23  }
  0x81   :  { %125 = vst.msk [vmem:[#allocation0 + $0x41] ss:$8 sm:$0xf] %vm3_vm0, %v122_v24  }
  0x82   :  { %127 = vst.msk [vmem:[#allocation0 + $0x41] ss:$8 sm:$0xf0] %vm3_vm0, %v122_v24  }
  0x84   :  { %v265_v25 = vpop.permute.xlu2 %264   ;;  %v176_v26 = vpop.permute.xlu1 %175  }
  0x85   :  { %268 = vst.msk [vmem:[#allocation0 + $0x42] ss:$8 sm:$0xf] %vm3_vm0, %v265_v25   ;;  %v167_v27 = vpop.permute.xlu0 %166  }
  0x86   :  { %270 = vst.msk [vmem:[#allocation0 + $0x42] ss:$8 sm:$0xf0] %vm3_vm0, %v265_v25  }
  0x87   :  { %179 = vst.msk [vmem:[#allocation0 + $0x1c1] ss:$8 sm:$0xf] %vm3_vm0, %v176_v26  }
  0x88   :  { %181 = vst.msk [vmem:[#allocation0 + $0x1c1] ss:$8 sm:$0xf0] %vm3_vm0, %v176_v26  }
  0x89   :  { %170 = vst.msk [vmem:[#allocation0 + $0x181] ss:$8 sm:$0xf] %vm3_vm0, %v167_v27  }
  0x8a   :  { %172 = vst.msk [vmem:[#allocation0 + $0x181] ss:$8 sm:$0xf0] %vm3_vm0, %v167_v27  }
  0x8c   :  { %v292_v28 = vpop.permute.xlu2 %291   ;;  %v203_v29 = vpop.permute.xlu1 %202  }
  0x8d   :  { %295 = vst.msk [vmem:[#allocation0 + $0x102] ss:$8 sm:$0xf] %vm3_vm0, %v292_v28   ;;  %v194_v30 = vpop.permute.xlu0 %193  }
  0x8e   :  { %297 = vst.msk [vmem:[#allocation0 + $0x102] ss:$8 sm:$0xf0] %vm3_vm0, %v292_v28  }
  0x8f   :  { %206 = vst.msk [vmem:[#allocation0 + $0x281] ss:$8 sm:$0xf] %vm3_vm0, %v203_v29  }
  0x90   :  { %208 = vst.msk [vmem:[#allocation0 + $0x281] ss:$8 sm:$0xf0] %vm3_vm0, %v203_v29  }
  0x91   :  { %197 = vst.msk [vmem:[#allocation0 + $0x241] ss:$8 sm:$0xf] %vm3_vm0, %v194_v30  }
  0x92   :  { %199 = vst.msk [vmem:[#allocation0 + $0x241] ss:$8 sm:$0xf0] %vm3_vm0, %v194_v30  }
  0x94   :  { %v319_v31 = vpop.permute.xlu2 %318   ;;  %v230_v32 = vpop.permute.xlu1 %229  }
  0x95   :  { %322 = vst.msk [vmem:[#allocation0 + $0x1c2] ss:$8 sm:$0xf] %vm3_vm0, %v319_v31   ;;  %v221_v33 = vpop.permute.xlu0 %220  }
  0x96   :  { %324 = vst.msk [vmem:[#allocation0 + $0x1c2] ss:$8 sm:$0xf0] %vm3_vm0, %v319_v31  }
  0x97   :  { %233 = vst.msk [vmem:[#allocation0 + $0x341] ss:$8 sm:$0xf] %vm3_vm0, %v230_v32  }
  0x98   :  { %235 = vst.msk [vmem:[#allocation0 + $0x341] ss:$8 sm:$0xf0] %vm3_vm0, %v230_v32  }
  0x99   :  { %224 = vst.msk [vmem:[#allocation0 + $0x301] ss:$8 sm:$0xf] %vm3_vm0, %v221_v33  }
  0x9a   :  { %226 = vst.msk [vmem:[#allocation0 + $0x301] ss:$8 sm:$0xf0] %vm3_vm0, %v221_v33  }
  0x9c   :  { %v346_v34 = vpop.permute.xlu2 %345   ;;  %v256_v35 = vpop.permute.xlu1 %255  }
  0x9d   :  { %349 = vst.msk [vmem:[#allocation0 + $0x282] ss:$8 sm:$0xf] %vm3_vm0, %v346_v34   ;;  %v248_v36 = vpop.permute.xlu0 %247  }
  0x9e   :  { %351 = vst.msk [vmem:[#allocation0 + $0x282] ss:$8 sm:$0xf0] %vm3_vm0, %v346_v34  }
  0x9f   :  { %259 = vst.msk [vmem:[#allocation0 + $0x2] ss:$8 sm:$0xf] %vm3_vm0, %v256_v35  }
  0xa0   :  { %261 = vst.msk [vmem:[#allocation0 + $0x2] ss:$8 sm:$0xf0] %vm3_vm0, %v256_v35  }
  0xa1   :  { %251 = vst.msk [vmem:[#allocation0 + $0x3c1] ss:$8 sm:$0xf] %vm3_vm0, %v248_v36  }
  0xa2   :  { %253 = vst.msk [vmem:[#allocation0 + $0x3c1] ss:$8 sm:$0xf0] %vm3_vm0, %v248_v36  }
  0xa4   :  { %v373_v37 = vpop.permute.xlu2 %372   ;;  %v283_v38 = vpop.permute.xlu1 %282  }
  0xa5   :  { %376 = vst.msk [vmem:[#allocation0 + $0x342] ss:$8 sm:$0xf] %vm3_vm0, %v373_v37   ;;  %v274_v39 = vpop.permute.xlu0 %273  }
  0xa6   :  { %378 = vst.msk [vmem:[#allocation0 + $0x342] ss:$8 sm:$0xf0] %vm3_vm0, %v373_v37  }
  0xa7   :  { %286 = vst.msk [vmem:[#allocation0 + $0xc2] ss:$8 sm:$0xf] %vm3_vm0, %v283_v38  }
  0xa8   :  { %288 = vst.msk [vmem:[#allocation0 + $0xc2] ss:$8 sm:$0xf0] %vm3_vm0, %v283_v38  }
  0xa9   :  { %277 = vst.msk [vmem:[#allocation0 + $0x82] ss:$8 sm:$0xf] %vm3_vm0, %v274_v39  }
  0xaa   :  { %279 = vst.msk [vmem:[#allocation0 + $0x82] ss:$8 sm:$0xf0] %vm3_vm0, %v274_v39  }
  0xac   :  { %v399_v40 = vpop.permute.xlu2 %398   ;;  %v310_v41 = vpop.permute.xlu1 %309  }
  0xad   :  { %402 = vst.msk [vmem:[#allocation0 + $0x3] ss:$8 sm:$0xf] %vm3_vm0, %v399_v40   ;;  %v301_v42 = vpop.permute.xlu0 %300  }
  0xae   :  { %404 = vst.msk [vmem:[#allocation0 + $0x3] ss:$8 sm:$0xf0] %vm3_vm0, %v399_v40  }
  0xaf   :  { %313 = vst.msk [vmem:[#allocation0 + $0x182] ss:$8 sm:$0xf] %vm3_vm0, %v310_v41  }
  0xb0   :  { %315 = vst.msk [vmem:[#allocation0 + $0x182] ss:$8 sm:$0xf0] %vm3_vm0, %v310_v41  }
  0xb1   :  { %304 = vst.msk [vmem:[#allocation0 + $0x142] ss:$8 sm:$0xf] %vm3_vm0, %v301_v42  }
  0xb2   :  { %306 = vst.msk [vmem:[#allocation0 + $0x142] ss:$8 sm:$0xf0] %vm3_vm0, %v301_v42  }
  0xb4   :  { %v542_v43 = vld [vmem:[#allocation0] sm:$0xf]  ;;  %v547_v44 = vld [vmem:[#allocation0 + $0x8] sm:$0xf]  ;;  %v426_v45 = vpop.permute.xlu2 %425   ;;  %v337_v46 = vpop.permute.xlu1 %336   ;;  %v553_v47 = vld [vmem:[#allocation0 + $0x10] sm:$0xf] }
  0xb5   :  { %v328_v48 = vpop.permute.xlu0 %327   ;;  %v559_v49 = vld [vmem:[#allocation0 + $0x18] sm:$0xf]  ;;  %545 = vst [vmem:[%s2236_s1] sm:$0xf] %v542_v43  ;;  %v565_v50 = vld [vmem:[#allocation0 + $0x20] sm:$0xf] }
  0xb6   :  { %1368 = vst [vmem:[%s2236_s1 + $0x4] sm:$0xf] %v547_v44  ;;  %v571_v51 = vld [vmem:[#allocation0 + $0x28] sm:$0xf]  ;;  %v577_v52 = vld [vmem:[#allocation0 + $0x30] sm:$0xf] }
  0xb7   :  { %1369 = vst [vmem:[%s2236_s1 + $0x8] sm:$0xf] %v553_v47  ;;  %v583_v53 = vld [vmem:[#allocation0 + $0x38] sm:$0xf] }
  0xb8   :  { %1370 = vst [vmem:[%s2236_s1 + $0xc] sm:$0xf] %v559_v49 }
  0xb9   :  { %1371 = vst [vmem:[%s2236_s1 + $0x10] sm:$0xf] %v565_v50 }
  0xba   :  { %1372 = vst [vmem:[%s2236_s1 + $0x14] sm:$0xf] %v571_v51 }
  0xbb   :  { %1373 = vst [vmem:[%s2236_s1 + $0x18] sm:$0xf] %v577_v52 }
  0xbc   :  { %v453_v54 = vpop.permute.xlu2 %452   ;;  %v364_v55 = vpop.permute.xlu1 %363   ;;  %1374 = vst [vmem:[%s2236_s1 + $0x1c] sm:$0xf] %v583_v53 }
  0xbd   :  { %v355_v56 = vpop.permute.xlu0 %354   ;;  %429 = vst.msk [vmem:[#allocation0 + $0xc3] ss:$8 sm:$0xf] %vm3_vm0, %v426_v45  }
  0xbe   :  { %431 = vst.msk [vmem:[#allocation0 + $0xc3] ss:$8 sm:$0xf0] %vm3_vm0, %v426_v45  }
  0xbf   :  { %340 = vst.msk [vmem:[#allocation0 + $0x242] ss:$8 sm:$0xf] %vm3_vm0, %v337_v46  }
  0xc0   :  { %342 = vst.msk [vmem:[#allocation0 + $0x242] ss:$8 sm:$0xf0] %vm3_vm0, %v337_v46  }
  0xc1   :  { %331 = vst.msk [vmem:[#allocation0 + $0x202] ss:$8 sm:$0xf] %vm3_vm0, %v328_v48  }
  0xc2   :  { %333 = vst.msk [vmem:[#allocation0 + $0x202] ss:$8 sm:$0xf0] %vm3_vm0, %v328_v48  }
  0xc3   :  { %456 = vst.msk [vmem:[#allocation0 + $0x183] ss:$8 sm:$0xf] %vm3_vm0, %v453_v54  }
  0xc4   :  { %v480_v57 = vpop.permute.xlu2 %479   ;;  %v391_v58 = vpop.permute.xlu1 %390   ;;  %v685_v59 = vld [vmem:[#allocation0 + $0xc0] sm:$0xf]  ;;  %v691_v60 = vld [vmem:[#allocation0 + $0xc8] sm:$0xf]  ;;  %v697_v62 = vld [vmem:[#allocation0 + $0xd0] sm:$0xf] }
  0xc5   :  { %v382_v61 = vpop.permute.xlu0 %381   ;;  %v703_v63 = vld [vmem:[#allocation0 + $0xd8] sm:$0xf]  ;;  %1391 = vst [vmem:[%s2236_s1 + $0x60] sm:$0xf] %v685_v59  ;;  %v709_v0 = vld [vmem:[#allocation0 + $0xe0] sm:$0xf] }
  0xc6   :  { %1392 = vst [vmem:[%s2236_s1 + $0x64] sm:$0xf] %v691_v60  ;;  %v715_v1 = vld [vmem:[#allocation0 + $0xe8] sm:$0xf]  ;;  %v721_v2 = vld [vmem:[#allocation0 + $0xf0] sm:$0xf] }
  0xc7   :  { %1393 = vst [vmem:[%s2236_s1 + $0x68] sm:$0xf] %v697_v62  ;;  %v727_v3 = vld [vmem:[#allocation0 + $0xf8] sm:$0xf] }
  0xc8   :  { %1394 = vst [vmem:[%s2236_s1 + $0x6c] sm:$0xf] %v703_v63 }
  0xc9   :  { %1395 = vst [vmem:[%s2236_s1 + $0x70] sm:$0xf] %v709_v0 }
  0xca   :  { %1396 = vst [vmem:[%s2236_s1 + $0x74] sm:$0xf] %v715_v1  ;;  %v829_v6 = vld [vmem:[#allocation0 + $0x180] sm:$0xf]  ;;  %v835_v7 = vld [vmem:[#allocation0 + $0x188] sm:$0xf] }
  0xcb   :  { %1397 = vst [vmem:[%s2236_s1 + $0x78] sm:$0xf] %v721_v2  ;;  %v841_v8 = vld [vmem:[#allocation0 + $0x190] sm:$0xf]  ;;  %v847_v9 = vld [vmem:[#allocation0 + $0x198] sm:$0xf] }
  0xcc   :  { %v507_v4 = vpop.permute.xlu2 %506   ;;  %1398 = vst [vmem:[%s2236_s1 + $0x7c] sm:$0xf] %v727_v3  ;;  %v417_v5 = vpop.permute.xlu1 %416  }
  0xcd   :  { %458 = vst.msk [vmem:[#allocation0 + $0x183] ss:$8 sm:$0xf0] %vm3_vm0, %v453_v54   ;;  %v408_v10 = vpop.permute.xlu0 %407  }
  0xce   :  { %367 = vst.msk [vmem:[#allocation0 + $0x302] ss:$8 sm:$0xf] %vm3_vm0, %v364_v55  }
  0xcf   :  { %369 = vst.msk [vmem:[#allocation0 + $0x302] ss:$8 sm:$0xf0] %vm3_vm0, %v364_v55  }
  0xd0   :  { %1415 = vst [vmem:[%s2236_s1 + $0xc0] sm:$0xf] %v829_v6 }
  0xd1   :  { %1416 = vst [vmem:[%s2236_s1 + $0xc4] sm:$0xf] %v835_v7 }
  0xd2   :  { %1417 = vst [vmem:[%s2236_s1 + $0xc8] sm:$0xf] %v841_v8 }
  0xd3   :  { %1418 = vst [vmem:[%s2236_s1 + $0xcc] sm:$0xf] %v847_v9 }
  0xd4   :  { %v853_v11 = vld [vmem:[#allocation0 + $0x1a0] sm:$0xf]  ;;  %v859_v12 = vld [vmem:[#allocation0 + $0x1a8] sm:$0xf]  ;;  %v865_v13 = vld [vmem:[#allocation0 + $0x1b0] sm:$0xf]  ;;  %v534_v23 = vpop.permute.xlu2 %533   ;;  %v1932_v28 = vpop.permute.xlu1 %443  }
  0xd5   :  { %v871_v14 = vld [vmem:[#allocation0 + $0x1b8] sm:$0xf]  ;;  %1419 = vst [vmem:[%s2236_s1 + $0xd0] sm:$0xf] %v853_v11  ;;  %v435_v35 = vpop.permute.xlu0 %434  }
  0xd6   :  { %1420 = vst [vmem:[%s2236_s1 + $0xd4] sm:$0xf] %v859_v12 }
  0xd7   :  { %1421 = vst [vmem:[%s2236_s1 + $0xd8] sm:$0xf] %v865_v13 }
  0xd8   :  { %1422 = vst [vmem:[%s2236_s1 + $0xdc] sm:$0xf] %v871_v14 }
  0xd9   :  { %358 = vst.msk [vmem:[#allocation0 + $0x2c2] ss:$8 sm:$0xf] %vm3_vm0, %v355_v56  }
  0xda   :  { %360 = vst.msk [vmem:[#allocation0 + $0x2c2] ss:$8 sm:$0xf0] %vm3_vm0, %v355_v56  }
  0xdb   :  { %483 = vst.msk [vmem:[#allocation0 + $0x243] ss:$8 sm:$0xf] %vm3_vm0, %v480_v57  }
  0xdc   :  { %485 = vst.msk [vmem:[#allocation0 + $0x243] ss:$8 sm:$0xf0] %vm3_vm0, %v480_v57   ;;  %v471_v46 = vpop.permute.xlu1 %470  }
  0xdd   :  { %394 = vst.msk [vmem:[#allocation0 + $0x3c2] ss:$8 sm:$0xf] %vm3_vm0, %v391_v58   ;;  %v462_v59 = vpop.permute.xlu0 %461  }
  0xde   :  { %396 = vst.msk [vmem:[#allocation0 + $0x3c2] ss:$8 sm:$0xf0] %vm3_vm0, %v391_v58  }
  0xdf   :  { %385 = vst.msk [vmem:[#allocation0 + $0x382] ss:$8 sm:$0xf] %vm3_vm0, %v382_v61  }
  0xe0   :  { %387 = vst.msk [vmem:[#allocation0 + $0x382] ss:$8 sm:$0xf0] %vm3_vm0, %v382_v61  }
  0xe1   :  { %510 = vst.msk [vmem:[#allocation0 + $0x303] ss:$8 sm:$0xf] %vm3_vm0, %v507_v4  }
  0xe2   :  { %v973_v15 = vld [vmem:[#allocation0 + $0x240] sm:$0xf]  ;;  %v979_v16 = vld [vmem:[#allocation0 + $0x248] sm:$0xf]  ;;  %v985_v17 = vld [vmem:[#allocation0 + $0x250] sm:$0xf] }
  0xe3   :  { %v991_v18 = vld [vmem:[#allocation0 + $0x258] sm:$0xf]  ;;  %1439 = vst [vmem:[%s2236_s1 + $0x120] sm:$0xf] %v973_v15  ;;  %v997_v19 = vld [vmem:[#allocation0 + $0x260] sm:$0xf] }
  0xe4   :  { %1440 = vst [vmem:[%s2236_s1 + $0x124] sm:$0xf] %v979_v16  ;;  %v1003_v20 = vld [vmem:[#allocation0 + $0x268] sm:$0xf]  ;;  %v1009_v21 = vld [vmem:[#allocation0 + $0x270] sm:$0xf]  ;;  %v498_v1 = vpop.permute.xlu1 %497  }
  0xe5   :  { %1441 = vst [vmem:[%s2236_s1 + $0x128] sm:$0xf] %v985_v17  ;;  %v1015_v22 = vld [vmem:[#allocation0 + $0x278] sm:$0xf]  ;;  %v489_v14 = vpop.permute.xlu0 %488  }
  0xe6   :  { %1442 = vst [vmem:[%s2236_s1 + $0x12c] sm:$0xf] %v991_v18 }
  0xe7   :  { %1443 = vst [vmem:[%s2236_s1 + $0x130] sm:$0xf] %v997_v19 }
  0xe8   :  { %1444 = vst [vmem:[%s2236_s1 + $0x134] sm:$0xf] %v1003_v20  ;;  %v1117_v24 = vld [vmem:[#allocation0 + $0x300] sm:$0xf]  ;;  %v1123_v25 = vld [vmem:[#allocation0 + $0x308] sm:$0xf] }
  0xe9   :  { %1445 = vst [vmem:[%s2236_s1 + $0x138] sm:$0xf] %v1009_v21  ;;  %v1129_v26 = vld [vmem:[#allocation0 + $0x310] sm:$0xf]  ;;  %v1135_v27 = vld [vmem:[#allocation0 + $0x318] sm:$0xf] }
  0xea   :  { %1446 = vst [vmem:[%s2236_s1 + $0x13c] sm:$0xf] %v1015_v22 }
  0xeb   :  { %512 = vst.msk [vmem:[#allocation0 + $0x303] ss:$8 sm:$0xf0] %vm3_vm0, %v507_v4  }
  0xec   :  { %420 = vst.msk [vmem:[#allocation0 + $0x83] ss:$8 sm:$0xf] %vm3_vm0, %v417_v5   ;;  %v525_v22 = vpop.permute.xlu1 %524  }
  0xed   :  { %422 = vst.msk [vmem:[#allocation0 + $0x83] ss:$8 sm:$0xf0] %vm3_vm0, %v417_v5  }
  0xee   :  { %1463 = vst [vmem:[%s2236_s1 + $0x180] sm:$0xf] %v1117_v24 }
  0xef   :  { %1464 = vst [vmem:[%s2236_s1 + $0x184] sm:$0xf] %v1123_v25 }
  0xf0   :  { %1465 = vst [vmem:[%s2236_s1 + $0x188] sm:$0xf] %v1129_v26 }
  0xf1   :  { %1466 = vst [vmem:[%s2236_s1 + $0x18c] sm:$0xf] %v1135_v27 }
  0xf2   :  { %v1141_v29 = vld [vmem:[#allocation0 + $0x320] sm:$0xf]  ;;  %v1147_v30 = vld [vmem:[#allocation0 + $0x328] sm:$0xf]  ;;  %v1153_v31 = vld [vmem:[#allocation0 + $0x330] sm:$0xf] }
  0xf3   :  { %v1159_v32 = vld [vmem:[#allocation0 + $0x338] sm:$0xf]  ;;  %1467 = vst [vmem:[%s2236_s1 + $0x190] sm:$0xf] %v1141_v29  ;;  %v637_v33 = vld [vmem:[#allocation0 + $0x80] sm:$0xf] }
  0xf4   :  { %1468 = vst [vmem:[%s2236_s1 + $0x194] sm:$0xf] %v1147_v30  ;;  %v643_v34 = vld [vmem:[#allocation0 + $0x88] sm:$0xf]  ;;  %v649_v36 = vld [vmem:[#allocation0 + $0x90] sm:$0xf] }
  0xf5   :  { %1469 = vst [vmem:[%s2236_s1 + $0x198] sm:$0xf] %v1153_v31  ;;  %v655_v37 = vld [vmem:[#allocation0 + $0x98] sm:$0xf]  ;;  %v661_v38 = vld [vmem:[#allocation0 + $0xa0] sm:$0xf] }
  0xf6   :  { %1470 = vst [vmem:[%s2236_s1 + $0x19c] sm:$0xf] %v1159_v32  ;;  %v667_v43 = vld [vmem:[#allocation0 + $0xa8] sm:$0xf]  ;;  %v673_v44 = vld [vmem:[#allocation0 + $0xb0] sm:$0xf]  ;;  %v516_v32 = vpop.permute.xlu0 %515  }
  0xf7   :  { %411 = vst.msk [vmem:[#allocation0 + $0x43] ss:$8 sm:$0xf] %vm3_vm0, %v408_v10   ;;  %v679_v45 = vld [vmem:[#allocation0 + $0xb8] sm:$0xf] }
  0xf8   :  { %413 = vst.msk [vmem:[#allocation0 + $0x43] ss:$8 sm:$0xf0] %vm3_vm0, %v408_v10  }
  0xf9   :  { %1383 = vst [vmem:[%s2236_s1 + $0x40] sm:$0xf] %v637_v33 }
  0xfa   :  { %1384 = vst [vmem:[%s2236_s1 + $0x44] sm:$0xf] %v643_v34 }
  0xfb   :  { %1385 = vst [vmem:[%s2236_s1 + $0x48] sm:$0xf] %v649_v36 }
  0xfc   :  { %1386 = vst [vmem:[%s2236_s1 + $0x4c] sm:$0xf] %v655_v37 }
  0xfd   :  { %1387 = vst [vmem:[%s2236_s1 + $0x50] sm:$0xf] %v661_v38 }
  0xfe   :  { %1388 = vst [vmem:[%s2236_s1 + $0x54] sm:$0xf] %v667_v43  ;;  %v589_v47 = vld [vmem:[#allocation0 + $0x40] sm:$0xf]  ;;  %v595_v48 = vld [vmem:[#allocation0 + $0x48] sm:$0xf] }
  0xff   :  { %v613_v39 = vld [vmem:[#allocation0 + $0x60] sm:$0xf]  ;;  %v619_v40 = vld [vmem:[#allocation0 + $0x68] sm:$0xf]  ;;  %v625_v41 = vld [vmem:[#allocation0 + $0x70] sm:$0xf] }
 0x100   :  { %1379 = vst [vmem:[%s2236_s1 + $0x30] sm:$0xf] %v613_v39  ;;  %v631_v42 = vld [vmem:[#allocation0 + $0x78] sm:$0xf]  ;;  %v601_v49 = vld [vmem:[#allocation0 + $0x50] sm:$0xf] }
 0x101   :  { %1380 = vst [vmem:[%s2236_s1 + $0x34] sm:$0xf] %v619_v40  ;;  %v607_v50 = vld [vmem:[#allocation0 + $0x58] sm:$0xf] }
 0x102   :  { %1381 = vst [vmem:[%s2236_s1 + $0x38] sm:$0xf] %v625_v41 }
 0x103   :  { %1382 = vst [vmem:[%s2236_s1 + $0x3c] sm:$0xf] %v631_v42 }
 0x104   :  { %1389 = vst [vmem:[%s2236_s1 + $0x58] sm:$0xf] %v673_v44 }
 0x105   :  { %1390 = vst [vmem:[%s2236_s1 + $0x5c] sm:$0xf] %v679_v45 }
 0x106   :  { %537 = vst.msk [vmem:[#allocation0 + $0x3c3] ss:$8 sm:$0xf] %vm3_vm0, %v534_v23  }
 0x107   :  { %539 = vst.msk [vmem:[#allocation0 + $0x3c3] ss:$8 sm:$0xf0] %vm3_vm0, %v534_v23  }
 0x108   :  { %1375 = vst [vmem:[%s2236_s1 + $0x20] sm:$0xf] %v589_v47 }
 0x109   :  { %1376 = vst [vmem:[%s2236_s1 + $0x24] sm:$0xf] %v595_v48 }
 0x10a   :  { %1377 = vst [vmem:[%s2236_s1 + $0x28] sm:$0xf] %v601_v49 }
 0x10b   :  { %1378 = vst [vmem:[%s2236_s1 + $0x2c] sm:$0xf] %v607_v50 }
 0x10c   :  { %447 = vst.msk [vmem:[#allocation0 + $0x143] ss:$8 sm:$0xf] %vm3_vm0, %v1932_v28  }
 0x10d   :  { %v1261_v51 = vld [vmem:[#allocation0 + $0x3c0] sm:$0xf]  ;;  %v1267_v52 = vld [vmem:[#allocation0 + $0x3c8] sm:$0xf]  ;;  %v1273_v53 = vld [vmem:[#allocation0 + $0x3d0] sm:$0xf] }
 0x10e   :  { %1487 = vst [vmem:[%s2236_s1 + $0x1e0] sm:$0xf] %v1261_v51  ;;  %v1279_v54 = vld [vmem:[#allocation0 + $0x3d8] sm:$0xf]  ;;  %v1285_v55 = vld [vmem:[#allocation0 + $0x3e0] sm:$0xf] }
 0x10f   :  { %1488 = vst [vmem:[%s2236_s1 + $0x1e4] sm:$0xf] %v1267_v52  ;;  %v1291_v56 = vld [vmem:[#allocation0 + $0x3e8] sm:$0xf]  ;;  %v1297_v57 = vld [vmem:[#allocation0 + $0x3f0] sm:$0xf] }
 0x110   :  { %1489 = vst [vmem:[%s2236_s1 + $0x1e8] sm:$0xf] %v1273_v53  ;;  %v1303_v58 = vld [vmem:[#allocation0 + $0x3f8] sm:$0xf] }
 0x111   :  { %1490 = vst [vmem:[%s2236_s1 + $0x1ec] sm:$0xf] %v1279_v54 }
 0x112   :  { %1491 = vst [vmem:[%s2236_s1 + $0x1f0] sm:$0xf] %v1285_v55 }
 0x113   :  { %1492 = vst [vmem:[%s2236_s1 + $0x1f4] sm:$0xf] %v1291_v56  ;;  %v781_v60 = vld [vmem:[#allocation0 + $0x140] sm:$0xf]  ;;  %v787_v61 = vld [vmem:[#allocation0 + $0x148] sm:$0xf] }
 0x114   :  { %1493 = vst [vmem:[%s2236_s1 + $0x1f8] sm:$0xf] %v1297_v57  ;;  %v793_v62 = vld [vmem:[#allocation0 + $0x150] sm:$0xf]  ;;  %v799_v63 = vld [vmem:[#allocation0 + $0x158] sm:$0xf] }
 0x115   :  { %1494 = vst [vmem:[%s2236_s1 + $0x1fc] sm:$0xf] %v1303_v58 }
 0x116   :  { %449 = vst.msk [vmem:[#allocation0 + $0x143] ss:$8 sm:$0xf0] %vm3_vm0, %v1932_v28  }
 0x117   :  { %438 = vst.msk [vmem:[#allocation0 + $0x103] ss:$8 sm:$0xf] %vm3_vm0, %v435_v35  }
 0x118   :  { %440 = vst.msk [vmem:[#allocation0 + $0x103] ss:$8 sm:$0xf0] %vm3_vm0, %v435_v35  }
 0x119   :  { %1407 = vst [vmem:[%s2236_s1 + $0xa0] sm:$0xf] %v781_v60 }
 0x11a   :  { %1408 = vst [vmem:[%s2236_s1 + $0xa4] sm:$0xf] %v787_v61 }
 0x11b   :  { %1409 = vst [vmem:[%s2236_s1 + $0xa8] sm:$0xf] %v793_v62 }
 0x11c   :  { %1410 = vst [vmem:[%s2236_s1 + $0xac] sm:$0xf] %v799_v63 }
 0x11d   :  { %v805_v0 = vld [vmem:[#allocation0 + $0x160] sm:$0xf]  ;;  %v811_v2 = vld [vmem:[#allocation0 + $0x168] sm:$0xf]  ;;  %v817_v3 = vld [vmem:[#allocation0 + $0x170] sm:$0xf] }
 0x11e   :  { %v823_v4 = vld [vmem:[#allocation0 + $0x178] sm:$0xf]  ;;  %1411 = vst [vmem:[%s2236_s1 + $0xb0] sm:$0xf] %v805_v0  ;;  %v733_v5 = vld [vmem:[#allocation0 + $0x100] sm:$0xf] }
 0x11f   :  { %1412 = vst [vmem:[%s2236_s1 + $0xb4] sm:$0xf] %v811_v2  ;;  %v739_v6 = vld [vmem:[#allocation0 + $0x108] sm:$0xf]  ;;  %v745_v7 = vld [vmem:[#allocation0 + $0x110] sm:$0xf] }
 0x120   :  { %1413 = vst [vmem:[%s2236_s1 + $0xb8] sm:$0xf] %v817_v3  ;;  %v751_v8 = vld [vmem:[#allocation0 + $0x118] sm:$0xf]  ;;  %v757_v9 = vld [vmem:[#allocation0 + $0x120] sm:$0xf] }
 0x121   :  { %1414 = vst [vmem:[%s2236_s1 + $0xbc] sm:$0xf] %v823_v4  ;;  %v763_v10 = vld [vmem:[#allocation0 + $0x128] sm:$0xf]  ;;  %v769_v16 = vld [vmem:[#allocation0 + $0x130] sm:$0xf] }
 0x122   :  { %474 = vst.msk [vmem:[#allocation0 + $0x203] ss:$8 sm:$0xf] %vm3_vm0, %v471_v46   ;;  %v775_v17 = vld [vmem:[#allocation0 + $0x138] sm:$0xf] }
 0x123   :  { %476 = vst.msk [vmem:[#allocation0 + $0x203] ss:$8 sm:$0xf0] %vm3_vm0, %v471_v46  }
 0x124   :  { %1399 = vst [vmem:[%s2236_s1 + $0x80] sm:$0xf] %v733_v5 }
 0x125   :  { %1400 = vst [vmem:[%s2236_s1 + $0x84] sm:$0xf] %v739_v6 }
 0x126   :  { %1401 = vst [vmem:[%s2236_s1 + $0x88] sm:$0xf] %v745_v7 }
 0x127   :  { %1402 = vst [vmem:[%s2236_s1 + $0x8c] sm:$0xf] %v751_v8 }
 0x128   :  { %1403 = vst [vmem:[%s2236_s1 + $0x90] sm:$0xf] %v757_v9 }
 0x129   :  { %1404 = vst [vmem:[%s2236_s1 + $0x94] sm:$0xf] %v763_v10  ;;  %v925_v18 = vld [vmem:[#allocation0 + $0x200] sm:$0xf]  ;;  %v931_v19 = vld [vmem:[#allocation0 + $0x208] sm:$0xf] }
 0x12a   :  { %v949_v11 = vld [vmem:[#allocation0 + $0x220] sm:$0xf]  ;;  %v955_v12 = vld [vmem:[#allocation0 + $0x228] sm:$0xf]  ;;  %v961_v13 = vld [vmem:[#allocation0 + $0x230] sm:$0xf] }
 0x12b   :  { %1435 = vst [vmem:[%s2236_s1 + $0x110] sm:$0xf] %v949_v11  ;;  %v967_v15 = vld [vmem:[#allocation0 + $0x238] sm:$0xf]  ;;  %v937_v20 = vld [vmem:[#allocation0 + $0x210] sm:$0xf] }
 0x12c   :  { %1436 = vst [vmem:[%s2236_s1 + $0x114] sm:$0xf] %v955_v12  ;;  %v943_v21 = vld [vmem:[#allocation0 + $0x218] sm:$0xf] }
 0x12d   :  { %1437 = vst [vmem:[%s2236_s1 + $0x118] sm:$0xf] %v961_v13 }
 0x12e   :  { %1438 = vst [vmem:[%s2236_s1 + $0x11c] sm:$0xf] %v967_v15 }
 0x12f   :  { %1405 = vst [vmem:[%s2236_s1 + $0x98] sm:$0xf] %v769_v16 }
 0x130   :  { %1406 = vst [vmem:[%s2236_s1 + $0x9c] sm:$0xf] %v775_v17 }
 0x131   :  { %465 = vst.msk [vmem:[#allocation0 + $0x1c3] ss:$8 sm:$0xf] %vm3_vm0, %v462_v59  }
 0x132   :  { %467 = vst.msk [vmem:[#allocation0 + $0x1c3] ss:$8 sm:$0xf0] %vm3_vm0, %v462_v59  }
 0x133   :  { %1431 = vst [vmem:[%s2236_s1 + $0x100] sm:$0xf] %v925_v18 }
 0x134   :  { %1432 = vst [vmem:[%s2236_s1 + $0x104] sm:$0xf] %v931_v19 }
 0x135   :  { %1433 = vst [vmem:[%s2236_s1 + $0x108] sm:$0xf] %v937_v20 }
 0x136   :  { %1434 = vst [vmem:[%s2236_s1 + $0x10c] sm:$0xf] %v943_v21 }
 0x137   :  { %501 = vst.msk [vmem:[#allocation0 + $0x2c3] ss:$8 sm:$0xf] %vm3_vm0, %v498_v1  }
 0x138   :  { %v877_v23 = vld [vmem:[#allocation0 + $0x1c0] sm:$0xf]  ;;  %v883_v24 = vld [vmem:[#allocation0 + $0x1c8] sm:$0xf]  ;;  %v889_v25 = vld [vmem:[#allocation0 + $0x1d0] sm:$0xf] }
 0x139   :  { %1423 = vst [vmem:[%s2236_s1 + $0xe0] sm:$0xf] %v877_v23  ;;  %v895_v26 = vld [vmem:[#allocation0 + $0x1d8] sm:$0xf]  ;;  %v901_v31 = vld [vmem:[#allocation0 + $0x1e0] sm:$0xf] }
 0x13a   :  { %1424 = vst [vmem:[%s2236_s1 + $0xe4] sm:$0xf] %v883_v24  ;;  %v907_v37 = vld [vmem:[#allocation0 + $0x1e8] sm:$0xf]  ;;  %v913_v38 = vld [vmem:[#allocation0 + $0x1f0] sm:$0xf] }
 0x13b   :  { %1425 = vst [vmem:[%s2236_s1 + $0xe8] sm:$0xf] %v889_v25  ;;  %v919_v39 = vld [vmem:[#allocation0 + $0x1f8] sm:$0xf] }
 0x13c   :  { %1426 = vst [vmem:[%s2236_s1 + $0xec] sm:$0xf] %v895_v26 }
 0x13d   :  { %503 = vst.msk [vmem:[#allocation0 + $0x2c3] ss:$8 sm:$0xf0] %vm3_vm0, %v498_v1  }
 0x13e   :  { %v1069_v27 = vld [vmem:[#allocation0 + $0x2c0] sm:$0xf]  ;;  %v1075_v28 = vld [vmem:[#allocation0 + $0x2c8] sm:$0xf]  ;;  %v1081_v29 = vld [vmem:[#allocation0 + $0x2d0] sm:$0xf] }
 0x13f   :  { %1455 = vst [vmem:[%s2236_s1 + $0x160] sm:$0xf] %v1069_v27  ;;  %v1087_v30 = vld [vmem:[#allocation0 + $0x2d8] sm:$0xf] }
 0x140   :  { %1456 = vst [vmem:[%s2236_s1 + $0x164] sm:$0xf] %v1075_v28 }
 0x141   :  { %1457 = vst [vmem:[%s2236_s1 + $0x168] sm:$0xf] %v1081_v29 }
 0x142   :  { %1458 = vst [vmem:[%s2236_s1 + $0x16c] sm:$0xf] %v1087_v30 }
 0x143   :  { %1427 = vst [vmem:[%s2236_s1 + $0xf0] sm:$0xf] %v901_v31 }
 0x144   :  { %v1093_v33 = vld [vmem:[#allocation0 + $0x2e0] sm:$0xf]  ;;  %v1099_v34 = vld [vmem:[#allocation0 + $0x2e8] sm:$0xf]  ;;  %v1105_v35 = vld [vmem:[#allocation0 + $0x2f0] sm:$0xf] }
 0x145   :  { %1459 = vst [vmem:[%s2236_s1 + $0x170] sm:$0xf] %v1093_v33  ;;  %v1111_v36 = vld [vmem:[#allocation0 + $0x2f8] sm:$0xf] }
 0x146   :  { %1460 = vst [vmem:[%s2236_s1 + $0x174] sm:$0xf] %v1099_v34 }
 0x147   :  { %1461 = vst [vmem:[%s2236_s1 + $0x178] sm:$0xf] %v1105_v35 }
 0x148   :  { %1462 = vst [vmem:[%s2236_s1 + $0x17c] sm:$0xf] %v1111_v36 }
 0x149   :  { %1428 = vst [vmem:[%s2236_s1 + $0xf4] sm:$0xf] %v907_v37 }
 0x14a   :  { %1429 = vst [vmem:[%s2236_s1 + $0xf8] sm:$0xf] %v913_v38 }
 0x14b   :  { %1430 = vst [vmem:[%s2236_s1 + $0xfc] sm:$0xf] %v919_v39 }
 0x14c   :  { %492 = vst.msk [vmem:[#allocation0 + $0x283] ss:$8 sm:$0xf] %vm3_vm0, %v489_v14  }
 0x14d   :  { %494 = vst.msk [vmem:[#allocation0 + $0x283] ss:$8 sm:$0xf0] %vm3_vm0, %v489_v14  }
 0x14e   :  { %528 = vst.msk [vmem:[#allocation0 + $0x383] ss:$8 sm:$0xf] %vm3_vm0, %v525_v22  }
 0x14f   :  { %530 = vst.msk [vmem:[#allocation0 + $0x383] ss:$8 sm:$0xf0] %vm3_vm0, %v525_v22  }
 0x150   :  { %519 = vst.msk [vmem:[#allocation0 + $0x343] ss:$8 sm:$0xf] %vm3_vm0, %v516_v32  }
 0x151   :  { %521 = vst.msk [vmem:[#allocation0 + $0x343] ss:$8 sm:$0xf0] %vm3_vm0, %v516_v32  }
 0x153   :  { %v1021_v52 = vld [vmem:[#allocation0 + $0x280] sm:$0xf]  ;;  %v1027_v53 = vld [vmem:[#allocation0 + $0x288] sm:$0xf]  ;;  %v1033_v54 = vld [vmem:[#allocation0 + $0x290] sm:$0xf] }
 0x154   :  { %v1045_v40 = vld [vmem:[#allocation0 + $0x2a0] sm:$0xf]  ;;  %v1051_v41 = vld [vmem:[#allocation0 + $0x2a8] sm:$0xf]  ;;  %v1057_v42 = vld [vmem:[#allocation0 + $0x2b0] sm:$0xf] }
 0x155   :  { %1451 = vst [vmem:[%s2236_s1 + $0x150] sm:$0xf] %v1045_v40  ;;  %v1063_v43 = vld [vmem:[#allocation0 + $0x2b8] sm:$0xf]  ;;  %v1213_v44 = vld [vmem:[#allocation0 + $0x380] sm:$0xf] }
 0x156   :  { %1452 = vst [vmem:[%s2236_s1 + $0x154] sm:$0xf] %v1051_v41  ;;  %v1219_v45 = vld [vmem:[#allocation0 + $0x388] sm:$0xf]  ;;  %v1225_v46 = vld [vmem:[#allocation0 + $0x390] sm:$0xf] }
 0x157   :  { %1453 = vst [vmem:[%s2236_s1 + $0x158] sm:$0xf] %v1057_v42  ;;  %v1231_v47 = vld [vmem:[#allocation0 + $0x398] sm:$0xf]  ;;  %v1237_v48 = vld [vmem:[#allocation0 + $0x3a0] sm:$0xf] }
 0x158   :  { %1454 = vst [vmem:[%s2236_s1 + $0x15c] sm:$0xf] %v1063_v43  ;;  %v1243_v49 = vld [vmem:[#allocation0 + $0x3a8] sm:$0xf]  ;;  %v1249_v50 = vld [vmem:[#allocation0 + $0x3b0] sm:$0xf] }
 0x159   :  { %1479 = vst [vmem:[%s2236_s1 + $0x1c0] sm:$0xf] %v1213_v44  ;;  %v1255_v51 = vld [vmem:[#allocation0 + $0x3b8] sm:$0xf]  ;;  %v1165_v56 = vld [vmem:[#allocation0 + $0x340] sm:$0xf] }
 0x15a   :  { %1480 = vst [vmem:[%s2236_s1 + $0x1c4] sm:$0xf] %v1219_v45  ;;  %v1039_v55 = vld [vmem:[#allocation0 + $0x298] sm:$0xf]  ;;  %v1171_v57 = vld [vmem:[#allocation0 + $0x348] sm:$0xf] }
 0x15b   :  { %1481 = vst [vmem:[%s2236_s1 + $0x1c8] sm:$0xf] %v1225_v46  ;;  %v1177_v58 = vld [vmem:[#allocation0 + $0x350] sm:$0xf]  ;;  %v1183_v59 = vld [vmem:[#allocation0 + $0x358] sm:$0xf] }
 0x15c   :  { %1482 = vst [vmem:[%s2236_s1 + $0x1cc] sm:$0xf] %v1231_v47  ;;  %v1189_v60 = vld [vmem:[#allocation0 + $0x360] sm:$0xf]  ;;  %v1195_v61 = vld [vmem:[#allocation0 + $0x368] sm:$0xf] }
 0x15d   :  { %1483 = vst [vmem:[%s2236_s1 + $0x1d0] sm:$0xf] %v1237_v48  ;;  %v1201_v62 = vld [vmem:[#allocation0 + $0x370] sm:$0xf]  ;;  %v1207_v63 = vld [vmem:[#allocation0 + $0x378] sm:$0xf] }
 0x15e   :  { %1484 = vst [vmem:[%s2236_s1 + $0x1d4] sm:$0xf] %v1243_v49 }
 0x15f   :  { %1485 = vst [vmem:[%s2236_s1 + $0x1d8] sm:$0xf] %v1249_v50 }
 0x160   :  { %1486 = vst [vmem:[%s2236_s1 + $0x1dc] sm:$0xf] %v1255_v51 }
 0x161   :  { %1447 = vst [vmem:[%s2236_s1 + $0x140] sm:$0xf] %v1021_v52 }
 0x162   :  { %1448 = vst [vmem:[%s2236_s1 + $0x144] sm:$0xf] %v1027_v53 }
 0x163   :  { %1449 = vst [vmem:[%s2236_s1 + $0x148] sm:$0xf] %v1033_v54 }
 0x164   :  { %1450 = vst [vmem:[%s2236_s1 + $0x14c] sm:$0xf] %v1039_v55 }
 0x165   :  { %1471 = vst [vmem:[%s2236_s1 + $0x1a0] sm:$0xf] %v1165_v56 }
 0x166   :  { %1472 = vst [vmem:[%s2236_s1 + $0x1a4] sm:$0xf] %v1171_v57 }
 0x167   :  { %1473 = vst [vmem:[%s2236_s1 + $0x1a8] sm:$0xf] %v1177_v58 }
 0x168   :  { %1474 = vst [vmem:[%s2236_s1 + $0x1ac] sm:$0xf] %v1183_v59 }
 0x169   :  { %1475 = vst [vmem:[%s2236_s1 + $0x1b0] sm:$0xf] %v1189_v60 }
 0x16a   :  { %1476 = vst [vmem:[%s2236_s1 + $0x1b4] sm:$0xf] %v1195_v61 }
 0x16b   :  { %1477 = vst [vmem:[%s2236_s1 + $0x1b8] sm:$0xf] %v1201_v62 }
 0x16c   :  { %1478 = vst [vmem:[%s2236_s1 + $0x1bc] sm:$0xf] %v1207_v63 }

// kernel: tensor_display_forward.1
= control target key start
LH: loop header
LB: loop body
LE: loop exit
PB: predicated region body
PF: predicated region fallthrough
CT: control target
= control target key end

     0   :  { %s1182_s9 = smov 0   ;;  %s1184_s10 = smov 0   ;;  %s1508_s0 = inlined_call_operand.vmem [shape: f32[2,16,4,16], index: 0, kind: input, shape index: {}]   ;;  %s1509_s1 = inlined_call_operand.vmem [shape: f32[2,4,16,16], index: 1, kind: input, shape index: {}]   ;;  %s1510_s2 = inlined_call_operand.vmem [shape: f32[2,16,16,16], index: 2, kind: output, shape index: {}]  }
   0x1   :  { %s1186_s11 = smov 0  }
   0x2 LB: > { %s24_s12 = sadd.s32 1, %s1161_s10  ;;  %p921_p0 = scmp.ge.s32.totalorder %s1165_s11, 1  ;;  %s1165_s11 = sphi %s1186_s11, %s12_s11   ;;  %s1161_s10 = sphi %s1184_s10, %s1512_s10   ;;  %s1157_s9 = sphi %s1182_s9, %s1511_s9  }
   0x3   : > { %p26_p1 = scmp.ge.s32.totalorder %s24_s12, 2  ;;  %p146_p2 = scmp.lt.s32.totalorder %s1165_s11, 3 }
   0x5   : > { %s1514_s12 = smov (%p26_p1, %s24_s12), 0  ;;  %p147_p3 = pnand %p921_p0, %p146_p2 }
   0x6   : > { %p182_p4 = scmp.lt.s32.totalorder (!%p147_p3), %s1157_s9, 1 }
   0x7   : > { %150 = sbr.rel (%p147_p3) target bundleno = 113 (0x71), region = 28 }
   0xc   : > { %s1516_s9 = smov (!%p182_p4, %s1157_s9), 1  ;;  %vm243_vm0 = vcmask 130048  }
   0xd   : > { %s1116_s13 = sshll.u32 %s1516_s9, 6  ;;  %s1118_s20 = sshll.u32 %s1516_s9, 8 }
   0xe   : > { %s1206_s16 = scalar_lea.vmem %s1508_s0, %s1116_s13  ;;  %s1211_s19 = scalar_lea.vmem %s1509_s1, %s1116_s13 }
   0xf   : > { %v206_v0 = vld [vmem:[%s1206_s16] sm:$0x1]  ;;  %v213_v1 = vld [vmem:[%s1206_s16 + $0x1] sm:$0x1]  ;;  %v1219_v5 = vld [vmem:[%s1211_s19 + $0x10] sm:$0xff]  ;;  %s1259_s23 = scalar_lea.vmem %s1510_s2, %s1118_s20 }
  0x10   : > { %v207_v2 = vmul.f32 0.25, %v206_v0  ;;  %v1216_v3 = vld [vmem:[%s1211_s19] sm:$0xff]  ;;  %v214_v4 = vmul.f32 0.25, %v213_v1  ;;  %v1227_v10 = vld [vmem:[%s1211_s19 + $0x8] sm:$0xff]  ;;  %v1230_v14 = vld [vmem:[%s1211_s19 + $0x30] sm:$0xff] }
  0x11   : > { %v223_v6 = vld [vmem:[%s1206_s16 + $0x2] sm:$0x1]  ;;  %v233_v9 = vld [vmem:[%s1206_s16 + $0x3] sm:$0x1]  ;;  %v1233_v15 = vld [vmem:[%s1211_s19 + $0x18] sm:$0xff] }
  0x12   : > { %v224_v7 = vmul.f32 0.25, %v223_v6  ;;  %v1223_v8 = vld [vmem:[%s1211_s19 + $0x20] sm:$0xff]  ;;  %v210_v11 = vperm.slane %v207_v2, 0  ;;  %v218_v12 = vperm.slane %v214_v4, 0  ;;  %v234_v13 = vmul.f32 0.25, %v233_v9  ;;  %v1236_v16 = vld [vmem:[%s1211_s19 + $0x28] sm:$0xff] }
  0x13   : > { %v1239_v18 = vld [vmem:[%s1211_s19 + $0x38] sm:$0xff]  ;;  %v934_v19 = vld [vmem:[%s1206_s16 + $0x4] sm:$0x1]  ;;  %v935_v20 = vld [vmem:[%s1206_s16 + $0x5] sm:$0x1] }
  0x14   : > { %v228_v17 = vperm.slane %v224_v7, 0  ;;  %v211_v21 = vmul.f32 %v210_v11, %v1216_v3  ;;  %v219_v22 = vmul.f32 %v1219_v5, %v218_v12  ;;  %v238_v23 = vperm.slane %v234_v13, 0  ;;  %v938_v25 = vld [vmem:[%s1206_s16 + $0x6] sm:$0x1]  ;;  %v941_v26 = vld [vmem:[%s1206_s16 + $0x7] sm:$0x1] }
  0x15   : > { %v212_v24 = vmul.f32 %v210_v11, %v1227_v10  ;;  %v220_v28 = vmul.f32 %v1233_v15, %v218_v12  ;;  %v248_v30 = vmul.f32 0.25, %v934_v19  ;;  %v946_v31 = vld [vmem:[%s1206_s16 + $0x8] sm:$0x1]  ;;  %v947_v32 = vld [vmem:[%s1206_s16 + $0x9] sm:$0x1]  ;;  %v255_v36 = vmul.f32 0.25, %v935_v20 }
  0x16   : > { %v229_v27 = vmul.f32 %v1223_v8, %v228_v17  ;;  %v230_v29 = vmul.f32 %v1236_v16, %v228_v17  ;;  %v221_v33 = vadd.f32 %v219_v22, %v211_v21  ;;  %v239_v34 = vmul.f32 %v1230_v14, %v238_v23  ;;  %v950_v53 = vld [vmem:[%s1206_s16 + $0xa] sm:$0x1]  ;;  %v953_v54 = vld [vmem:[%s1206_s16 + $0xb] sm:$0x1]  ;;  %v958_v55 = vld [vmem:[%s1206_s16 + $0xc] sm:$0x1] }
  0x17   : > { %v240_v35 = vmul.f32 %v1239_v18, %v238_v23  ;;  %v222_v37 = vadd.f32 %v220_v28, %v212_v24  ;;  %v251_v38 = vperm.slane %v248_v30, 0  ;;  %v264_v39 = vmul.f32 0.25, %v938_v25  ;;  %v959_v0 = vld [vmem:[%s1206_s16 + $0xd] sm:$0x1]  ;;  %v962_v25 = vld [vmem:[%s1206_s16 + $0xe] sm:$0x1] }
  0x18   : > { %v273_v40 = vmul.f32 0.25, %v941_v26  ;;  %v231_v41 = vadd.f32 %v229_v27, %v221_v33  ;;  %v258_v42 = vperm.slane %v255_v36, 0  ;;  %v286_v43 = vmul.f32 0.25, %v946_v31  ;;  %v965_v26 = vld [vmem:[%s1206_s16 + $0xf] sm:$0x1] }
  0x19   : > { %v293_v44 = vmul.f32 0.25, %v947_v32  ;;  %v232_v45 = vadd.f32 %v230_v29, %v222_v37  ;;  %v252_v46 = vmul.f32 %v251_v38, %v1216_v3  ;;  %v267_v47 = vperm.slane %v264_v39, 0  ;;  %v970_v31 = vld [vmem:[%s1206_s16 + $0x10] sm:$0x1]  ;;  %v971_v36 = vld [vmem:[%s1206_s16 + $0x11] sm:$0x1] }
  0x1a   : > { %v276_v48 = vperm.slane %v273_v40, 0  ;;  %v241_v49 = vadd.f32 %v239_v34, %v231_v41  ;;  %v259_v50 = vmul.f32 %v1219_v5, %v258_v42  ;;  %v253_v51 = vmul.f32 %v251_v38, %v1227_v10 }
  0x1b   : > { %v260_v52 = vmul.f32 %v1233_v15, %v258_v42  ;;  %v242_v56 = vadd.f32 %v240_v35, %v232_v45  ;;  %v268_v57 = vmul.f32 %v1223_v8, %v267_v47  ;;  %v269_v59 = vmul.f32 %v1236_v16, %v267_v47  ;;  %v974_v45 = vld [vmem:[%s1206_s16 + $0x12] sm:$0x1] }
  0x1c   : > { %v277_v58 = vmul.f32 %v1230_v14, %v276_v48  ;;  %244 = vst.msk [vmem:[%s1259_s23] sm:$0xff] %vm243_vm0, %v241_v49  ;;  %v261_v60 = vadd.f32 %v259_v50, %v252_v46  ;;  %v278_v62 = vmul.f32 %v1239_v18, %v276_v48  ;;  %v289_v63 = vperm.slane %v286_v43, 0  ;;  %v977_v50 = vld [vmem:[%s1206_s16 + $0x13] sm:$0x1] }
  0x1d   : > { %v262_v61 = vadd.f32 %v260_v52, %v253_v51  ;;  %245 = vst.msk [vmem:[%s1259_s23 + $0x8] sm:$0xff] %vm243_vm0, %v242_v56  ;;  %v296_v1 = vperm.slane %v293_v44, 0  ;;  %v302_v2 = vmul.f32 0.25, %v950_v53  ;;  %v311_v4 = vmul.f32 0.25, %v953_v54 }
  0x1e   : > { %v324_v6 = vmul.f32 0.25, %v958_v55  ;;  %v270_v7 = vadd.f32 %v268_v57, %v261_v60  ;;  %v290_v11 = vmul.f32 %v289_v63, %v1216_v3  ;;  %v291_v12 = vmul.f32 %v289_v63, %v1227_v10  ;;  %v982_v55 = vld [vmem:[%s1206_s16 + $0x14] sm:$0x1] }
  0x1f   : > { %v271_v9 = vadd.f32 %v269_v59, %v262_v61  ;;  %v297_v13 = vmul.f32 %v1219_v5, %v296_v1  ;;  %v305_v17 = vperm.slane %v302_v2, 0  ;;  %v314_v19 = vperm.slane %v311_v4, 0 }
  0x20   : > { %v298_v20 = vmul.f32 %v1233_v15, %v296_v1  ;;  %v279_v21 = vadd.f32 %v277_v58, %v270_v7  ;;  %v327_v23 = vperm.slane %v324_v6, 0  ;;  %v331_v24 = vmul.f32 0.25, %v959_v0  ;;  %v983_v0 = vld [vmem:[%s1206_s16 + $0x15] sm:$0x1] }
  0x21   : > { %v280_v22 = vadd.f32 %v278_v62, %v271_v9  ;;  %v299_v27 = vadd.f32 %v297_v13, %v290_v11  ;;  %v306_v28 = vmul.f32 %v1223_v8, %v305_v17  ;;  %v315_v29 = vmul.f32 %v1230_v14, %v314_v19 }
  0x22   : > { %v300_v30 = vadd.f32 %v298_v20, %v291_v12  ;;  %944 = vst.msk [vmem:[%s1259_s23 + $0x10] sm:$0xff] %vm243_vm0, %v279_v21  ;;  %v307_v32 = vmul.f32 %v1236_v16, %v305_v17  ;;  %v316_v33 = vmul.f32 %v1239_v18, %v314_v19  ;;  %v328_v34 = vmul.f32 %v327_v23, %v1216_v3  ;;  %v986_v21 = vld [vmem:[%s1206_s16 + $0x16] sm:$0x1] }
  0x23   : > { %v334_v35 = vperm.slane %v331_v24, 0  ;;  %945 = vst.msk [vmem:[%s1259_s23 + $0x18] sm:$0xff] %vm243_vm0, %v280_v22  ;;  %v308_v37 = vadd.f32 %v306_v28, %v299_v27  ;;  %v340_v38 = vmul.f32 0.25, %v962_v25  ;;  %v349_v39 = vmul.f32 0.25, %v965_v26  ;;  %v989_v22 = vld [vmem:[%s1206_s16 + $0x17] sm:$0x1] }
  0x24   : > { %v329_v40 = vmul.f32 %v327_v23, %v1227_v10  ;;  %v309_v41 = vadd.f32 %v307_v32, %v300_v30  ;;  %v362_v44 = vmul.f32 0.25, %v970_v31  ;;  %v369_v49 = vmul.f32 0.25, %v971_v36  ;;  %v994_v27 = vld [vmem:[%s1206_s16 + $0x18] sm:$0x1]  ;;  %v995_v32 = vld [vmem:[%s1206_s16 + $0x19] sm:$0x1] }
  0x25   : > { %v335_v42 = vmul.f32 %v1219_v5, %v334_v35  ;;  %v336_v43 = vmul.f32 %v1233_v15, %v334_v35  ;;  %v317_v46 = vadd.f32 %v315_v29, %v308_v37  ;;  %v343_v47 = vperm.slane %v340_v38, 0 }
  0x26   : > { %v352_v48 = vperm.slane %v349_v39, 0  ;;  %v318_v51 = vadd.f32 %v316_v33, %v309_v41  ;;  %v365_v54 = vperm.slane %v362_v44, 0  ;;  %v372_v61 = vperm.slane %v369_v49, 0  ;;  %v998_v41 = vld [vmem:[%s1206_s16 + $0x1a] sm:$0x1] }
  0x27   : > { %v337_v52 = vadd.f32 %v335_v42, %v328_v34  ;;  %v338_v53 = vadd.f32 %v336_v43, %v329_v40  ;;  %956 = vst.msk [vmem:[%s1259_s23 + $0x20] sm:$0xff] %vm243_vm0, %v317_v46  ;;  %v344_v56 = vmul.f32 %v1223_v8, %v343_v47  ;;  %v345_v58 = vmul.f32 %v1236_v16, %v343_v47  ;;  %v1001_v46 = vld [vmem:[%s1206_s16 + $0x1b] sm:$0x1] }
  0x28   : > { %v353_v57 = vmul.f32 %v1230_v14, %v352_v48  ;;  %v354_v59 = vmul.f32 %v1239_v18, %v352_v48  ;;  %957 = vst.msk [vmem:[%s1259_s23 + $0x28] sm:$0xff] %vm243_vm0, %v318_v51  ;;  %v366_v60 = vmul.f32 %v365_v54, %v1216_v3  ;;  %v378_v62 = vmul.f32 0.25, %v974_v45  ;;  %v1006_v51 = vld [vmem:[%s1206_s16 + $0x1c] sm:$0x1] }
  0x29   : > { %v387_v63 = vmul.f32 0.25, %v977_v50  ;;  %v346_v1 = vadd.f32 %v344_v56, %v337_v52  ;;  %v347_v2 = vadd.f32 %v345_v58, %v338_v53  ;;  %v367_v4 = vmul.f32 %v365_v54, %v1227_v10 }
  0x2a   : > { %v400_v6 = vmul.f32 0.25, %v982_v55  ;;  %v373_v7 = vmul.f32 %v1219_v5, %v372_v61  ;;  %v381_v9 = vperm.slane %v378_v62, 0  ;;  %v374_v12 = vmul.f32 %v1233_v15, %v372_v61 }
  0x2b   : > { %v390_v11 = vperm.slane %v387_v63, 0  ;;  %v355_v13 = vadd.f32 %v353_v57, %v346_v1  ;;  %v356_v17 = vadd.f32 %v354_v59, %v347_v2  ;;  %v407_v20 = vmul.f32 0.25, %v983_v0 }
  0x2c   : > { %v403_v19 = vperm.slane %v400_v6, 0  ;;  %v375_v23 = vadd.f32 %v373_v7, %v366_v60  ;;  %v382_v24 = vmul.f32 %v1223_v8, %v381_v9  ;;  %v376_v26 = vadd.f32 %v374_v12, %v367_v4  ;;  %v1007_v60 = vld [vmem:[%s1206_s16 + $0x1d] sm:$0x1] }
  0x2d   : > { %v391_v25 = vmul.f32 %v1230_v14, %v390_v11  ;;  %968 = vst.msk [vmem:[%s1259_s23 + $0x30] sm:$0xff] %vm243_vm0, %v355_v13  ;;  %v383_v28 = vmul.f32 %v1236_v16, %v381_v9  ;;  %v392_v29 = vmul.f32 %v1239_v18, %v390_v11  ;;  %v410_v31 = vperm.slane %v407_v20, 0  ;;  %v1010_v13 = vld [vmem:[%s1206_s16 + $0x1e] sm:$0x1] }
  0x2e   : > { %v404_v30 = vmul.f32 %v403_v19, %v1216_v3  ;;  %969 = vst.msk [vmem:[%s1259_s23 + $0x38] sm:$0xff] %vm243_vm0, %v356_v17  ;;  %v384_v33 = vadd.f32 %v382_v24, %v375_v23  ;;  %v416_v34 = vmul.f32 0.25, %v986_v21  ;;  %v425_v35 = vmul.f32 0.25, %v989_v22  ;;  %v1013_v17 = vld [vmem:[%s1206_s16 + $0x1f] sm:$0x1] }
  0x2f   : > { %v405_v36 = vmul.f32 %v403_v19, %v1227_v10  ;;  %v385_v37 = vadd.f32 %v383_v28, %v376_v26  ;;  %v411_v38 = vmul.f32 %v1219_v5, %v410_v31  ;;  %v412_v39 = vmul.f32 %v1233_v15, %v410_v31  ;;  %v1018_v23 = vld [vmem:[%s1206_s16 + $0x20] sm:$0x1]  ;;  %v1019_v28 = vld [vmem:[%s1206_s16 + $0x21] sm:$0x1] }
  0x30   : > { %v438_v40 = vmul.f32 0.25, %v994_v27  ;;  %v393_v42 = vadd.f32 %v391_v25, %v384_v33  ;;  %v419_v43 = vperm.slane %v416_v34, 0  ;;  %v428_v44 = vperm.slane %v425_v35, 0 }
  0x31   : > { %v445_v45 = vmul.f32 0.25, %v995_v32  ;;  %v394_v47 = vadd.f32 %v392_v29, %v385_v37  ;;  %v413_v48 = vadd.f32 %v411_v38, %v404_v30  ;;  %v414_v49 = vadd.f32 %v412_v39, %v405_v36  ;;  %v1022_v37 = vld [vmem:[%s1206_s16 + $0x22] sm:$0x1] }
  0x32   : > { %v441_v50 = vperm.slane %v438_v40, 0  ;;  %980 = vst.msk [vmem:[%s1259_s23 + $0x40] sm:$0xff] %vm243_vm0, %v393_v42  ;;  %v420_v52 = vmul.f32 %v1223_v8, %v419_v43  ;;  %v429_v53 = vmul.f32 %v1230_v14, %v428_v44  ;;  %v421_v54 = vmul.f32 %v1236_v16, %v419_v43  ;;  %v1025_v42 = vld [vmem:[%s1206_s16 + $0x23] sm:$0x1] }
  0x33   : > { %v430_v55 = vmul.f32 %v1239_v18, %v428_v44  ;;  %981 = vst.msk [vmem:[%s1259_s23 + $0x48] sm:$0xff] %vm243_vm0, %v394_v47  ;;  %v448_v57 = vperm.slane %v445_v45, 0  ;;  %v454_v58 = vmul.f32 0.25, %v998_v41  ;;  %v463_v59 = vmul.f32 0.25, %v1001_v46  ;;  %v1030_v47 = vld [vmem:[%s1206_s16 + $0x24] sm:$0x1] }
  0x34   : > { %v442_v56 = vmul.f32 %v441_v50, %v1216_v3  ;;  %v422_v61 = vadd.f32 %v420_v52, %v413_v48  ;;  %v423_v62 = vadd.f32 %v421_v54, %v414_v49  ;;  %v443_v63 = vmul.f32 %v441_v50, %v1227_v10 }
  0x35   : > { %v476_v0 = vmul.f32 0.25, %v1006_v51  ;;  %v449_v1 = vmul.f32 %v1219_v5, %v448_v57  ;;  %v457_v2 = vperm.slane %v454_v58, 0  ;;  %v466_v4 = vperm.slane %v463_v59, 0 }
  0x36   : > { %v450_v6 = vmul.f32 %v1233_v15, %v448_v57  ;;  %v431_v7 = vadd.f32 %v429_v53, %v422_v61  ;;  %v432_v9 = vadd.f32 %v430_v55, %v423_v62  ;;  %v483_v12 = vmul.f32 0.25, %v1007_v60 }
  0x37   : > { %v479_v11 = vperm.slane %v476_v0, 0  ;;  %v451_v19 = vadd.f32 %v449_v1, %v442_v56  ;;  %v458_v20 = vmul.f32 %v1223_v8, %v457_v2  ;;  %v467_v21 = vmul.f32 %v1230_v14, %v466_v4  ;;  %v1031_v56 = vld [vmem:[%s1206_s16 + $0x25] sm:$0x1] }
  0x38   : > { %v452_v22 = vadd.f32 %v450_v6, %v443_v63  ;;  %992 = vst.msk [vmem:[%s1259_s23 + $0x50] sm:$0xff] %vm243_vm0, %v431_v7  ;;  %v459_v24 = vmul.f32 %v1236_v16, %v457_v2  ;;  %v468_v25 = vmul.f32 %v1239_v18, %v466_v4  ;;  %v486_v27 = vperm.slane %v483_v12, 0  ;;  %v1034_v7 = vld [vmem:[%s1206_s16 + $0x26] sm:$0x1] }
  0x39   : > { %v480_v26 = vmul.f32 %v479_v11, %v1216_v3  ;;  %993 = vst.msk [vmem:[%s1259_s23 + $0x58] sm:$0xff] %vm243_vm0, %v432_v9  ;;  %v460_v29 = vadd.f32 %v458_v20, %v451_v19  ;;  %v492_v30 = vmul.f32 0.25, %v1010_v13  ;;  %v501_v31 = vmul.f32 0.25, %v1013_v17  ;;  %v1037_v9 = vld [vmem:[%s1206_s16 + $0x27] sm:$0x1] }
  0x3a   : > { %v481_v32 = vmul.f32 %v479_v11, %v1227_v10  ;;  %v461_v33 = vadd.f32 %v459_v24, %v452_v22  ;;  %v487_v34 = vmul.f32 %v1219_v5, %v486_v27  ;;  %v488_v35 = vmul.f32 %v1233_v15, %v486_v27  ;;  %v1042_v19 = vld [vmem:[%s1206_s16 + $0x28] sm:$0x1]  ;;  %v1043_v24 = vld [vmem:[%s1206_s16 + $0x29] sm:$0x1] }
  0x3b   : > { %v514_v36 = vmul.f32 0.25, %v1018_v23  ;;  %v469_v38 = vadd.f32 %v467_v21, %v460_v29  ;;  %v495_v39 = vperm.slane %v492_v30, 0  ;;  %v504_v40 = vperm.slane %v501_v31, 0 }
  0x3c   : > { %v521_v41 = vmul.f32 0.25, %v1019_v28  ;;  %v470_v43 = vadd.f32 %v468_v25, %v461_v33  ;;  %v489_v44 = vadd.f32 %v487_v34, %v480_v26  ;;  %v490_v45 = vadd.f32 %v488_v35, %v481_v32  ;;  %v1046_v33 = vld [vmem:[%s1206_s16 + $0x2a] sm:$0x1] }
  0x3d   : > { %v517_v46 = vperm.slane %v514_v36, 0  ;;  %1004 = vst.msk [vmem:[%s1259_s23 + $0x60] sm:$0xff] %vm243_vm0, %v469_v38  ;;  %v496_v48 = vmul.f32 %v1223_v8, %v495_v39  ;;  %v505_v49 = vmul.f32 %v1230_v14, %v504_v40  ;;  %v497_v50 = vmul.f32 %v1236_v16, %v495_v39  ;;  %v1049_v38 = vld [vmem:[%s1206_s16 + $0x2b] sm:$0x1] }
  0x3e   : > { %v506_v51 = vmul.f32 %v1239_v18, %v504_v40  ;;  %1005 = vst.msk [vmem:[%s1259_s23 + $0x68] sm:$0xff] %vm243_vm0, %v470_v43  ;;  %v524_v53 = vperm.slane %v521_v41, 0  ;;  %v530_v54 = vmul.f32 0.25, %v1022_v37  ;;  %v539_v55 = vmul.f32 0.25, %v1025_v42  ;;  %v1054_v43 = vld [vmem:[%s1206_s16 + $0x2c] sm:$0x1] }
  0x3f   : > { %v518_v52 = vmul.f32 %v517_v46, %v1216_v3  ;;  %v498_v57 = vadd.f32 %v496_v48, %v489_v44  ;;  %v499_v58 = vadd.f32 %v497_v50, %v490_v45  ;;  %v519_v59 = vmul.f32 %v517_v46, %v1227_v10 }
  0x40   : > { %v552_v60 = vmul.f32 0.25, %v1030_v47  ;;  %v525_v61 = vmul.f32 %v1219_v5, %v524_v53  ;;  %v533_v62 = vperm.slane %v530_v54, 0  ;;  %v542_v63 = vperm.slane %v539_v55, 0 }
  0x41   : > { %v526_v0 = vmul.f32 %v1233_v15, %v524_v53  ;;  %v507_v1 = vadd.f32 %v505_v49, %v498_v57  ;;  %v508_v2 = vadd.f32 %v506_v51, %v499_v58  ;;  %v559_v6 = vmul.f32 0.25, %v1031_v56 }
  0x42   : > { %v555_v4 = vperm.slane %v552_v60, 0  ;;  %v527_v11 = vadd.f32 %v525_v61, %v518_v52  ;;  %v534_v12 = vmul.f32 %v1223_v8, %v533_v62  ;;  %v543_v13 = vmul.f32 %v1230_v14, %v542_v63  ;;  %v1055_v52 = vld [vmem:[%s1206_s16 + $0x2d] sm:$0x1] }
  0x43   : > { %v528_v17 = vadd.f32 %v526_v0, %v519_v59  ;;  %1016 = vst.msk [vmem:[%s1259_s23 + $0x70] sm:$0xff] %vm243_vm0, %v507_v1  ;;  %v535_v20 = vmul.f32 %v1236_v16, %v533_v62  ;;  %v544_v21 = vmul.f32 %v1239_v18, %v542_v63  ;;  %v562_v23 = vperm.slane %v559_v6, 0  ;;  %v1058_v1 = vld [vmem:[%s1206_s16 + $0x2e] sm:$0x1] }
  0x44   : > { %v556_v22 = vmul.f32 %v555_v4, %v1216_v3  ;;  %1017 = vst.msk [vmem:[%s1259_s23 + $0x78] sm:$0xff] %vm243_vm0, %v508_v2  ;;  %v536_v25 = vadd.f32 %v534_v12, %v527_v11  ;;  %v568_v26 = vmul.f32 0.25, %v1034_v7  ;;  %v577_v27 = vmul.f32 0.25, %v1037_v9  ;;  %v1061_v2 = vld [vmem:[%s1206_s16 + $0x2f] sm:$0x1] }
  0x45   : > { %v557_v28 = vmul.f32 %v555_v4, %v1227_v10  ;;  %v537_v29 = vadd.f32 %v535_v20, %v528_v17  ;;  %v563_v30 = vmul.f32 %v1219_v5, %v562_v23  ;;  %v564_v31 = vmul.f32 %v1233_v15, %v562_v23  ;;  %v1066_v11 = vld [vmem:[%s1206_s16 + $0x30] sm:$0x1]  ;;  %v1067_v20 = vld [vmem:[%s1206_s16 + $0x31] sm:$0x1] }
  0x46   : > { %v590_v32 = vmul.f32 0.25, %v1042_v19  ;;  %v545_v34 = vadd.f32 %v543_v13, %v536_v25  ;;  %v571_v35 = vperm.slane %v568_v26, 0  ;;  %v580_v36 = vperm.slane %v577_v27, 0 }
  0x47   : > { %v597_v37 = vmul.f32 0.25, %v1043_v24  ;;  %v546_v39 = vadd.f32 %v544_v21, %v537_v29  ;;  %v565_v40 = vadd.f32 %v563_v30, %v556_v22  ;;  %v566_v41 = vadd.f32 %v564_v31, %v557_v28  ;;  %v1070_v29 = vld [vmem:[%s1206_s16 + $0x32] sm:$0x1] }
  0x48   : > { %v593_v42 = vperm.slane %v590_v32, 0  ;;  %1028 = vst.msk [vmem:[%s1259_s23 + $0x80] sm:$0xff] %vm243_vm0, %v545_v34  ;;  %v572_v44 = vmul.f32 %v1223_v8, %v571_v35  ;;  %v581_v45 = vmul.f32 %v1230_v14, %v580_v36  ;;  %v573_v46 = vmul.f32 %v1236_v16, %v571_v35  ;;  %v1073_v34 = vld [vmem:[%s1206_s16 + $0x33] sm:$0x1] }
  0x49   : > { %v582_v47 = vmul.f32 %v1239_v18, %v580_v36  ;;  %1029 = vst.msk [vmem:[%s1259_s23 + $0x88] sm:$0xff] %vm243_vm0, %v546_v39  ;;  %v600_v49 = vperm.slane %v597_v37, 0  ;;  %v606_v50 = vmul.f32 0.25, %v1046_v33  ;;  %v615_v51 = vmul.f32 0.25, %v1049_v38  ;;  %v1078_v39 = vld [vmem:[%s1206_s16 + $0x34] sm:$0x1] }
  0x4a   : > { %v594_v48 = vmul.f32 %v593_v42, %v1216_v3  ;;  %v574_v53 = vadd.f32 %v572_v44, %v565_v40  ;;  %v575_v54 = vadd.f32 %v573_v46, %v566_v41  ;;  %v595_v55 = vmul.f32 %v593_v42, %v1227_v10 }
  0x4b   : > { %v628_v56 = vmul.f32 0.25, %v1054_v43  ;;  %v601_v57 = vmul.f32 %v1219_v5, %v600_v49  ;;  %v609_v58 = vperm.slane %v606_v50, 0  ;;  %v618_v59 = vperm.slane %v615_v51, 0 }
  0x4c   : > { %v602_v60 = vmul.f32 %v1233_v15, %v600_v49  ;;  %v583_v61 = vadd.f32 %v581_v45, %v574_v53  ;;  %v584_v62 = vadd.f32 %v582_v47, %v575_v54  ;;  %v635_v0 = vmul.f32 0.25, %v1055_v52 }
  0x4d   : > { %v631_v63 = vperm.slane %v628_v56, 0  ;;  %v603_v4 = vadd.f32 %v601_v57, %v594_v48  ;;  %v610_v6 = vmul.f32 %v1223_v8, %v609_v58  ;;  %v619_v7 = vmul.f32 %v1230_v14, %v618_v59  ;;  %v1079_v48 = vld [vmem:[%s1206_s16 + $0x35] sm:$0x1] }
  0x4e   : > { %v604_v9 = vadd.f32 %v602_v60, %v595_v55  ;;  %1040 = vst.msk [vmem:[%s1259_s23 + $0x90] sm:$0xff] %vm243_vm0, %v583_v61  ;;  %v611_v12 = vmul.f32 %v1236_v16, %v609_v58  ;;  %v620_v13 = vmul.f32 %v1239_v18, %v618_v59  ;;  %v638_v19 = vperm.slane %v635_v0, 0  ;;  %v1082_v61 = vld [vmem:[%s1206_s16 + $0x36] sm:$0x1] }
  0x4f   : > { %v632_v17 = vmul.f32 %v631_v63, %v1216_v3  ;;  %1041 = vst.msk [vmem:[%s1259_s23 + $0x98] sm:$0xff] %vm243_vm0, %v584_v62  ;;  %v612_v21 = vadd.f32 %v610_v6, %v603_v4  ;;  %v644_v22 = vmul.f32 0.25, %v1058_v1  ;;  %v653_v23 = vmul.f32 0.25, %v1061_v2  ;;  %v1085_v62 = vld [vmem:[%s1206_s16 + $0x37] sm:$0x1] }
  0x50   : > { %v633_v24 = vmul.f32 %v631_v63, %v1227_v10  ;;  %v613_v25 = vadd.f32 %v611_v12, %v604_v9  ;;  %v639_v26 = vmul.f32 %v1219_v5, %v638_v19  ;;  %v640_v27 = vmul.f32 %v1233_v15, %v638_v19  ;;  %v1090_v4 = vld [vmem:[%s1206_s16 + $0x38] sm:$0x1]  ;;  %v1091_v12 = vld [vmem:[%s1206_s16 + $0x39] sm:$0x1] }
  0x51   : > { %v666_v28 = vmul.f32 0.25, %v1066_v11  ;;  %v621_v30 = vadd.f32 %v619_v7, %v612_v21  ;;  %v647_v31 = vperm.slane %v644_v22, 0  ;;  %v656_v32 = vperm.slane %v653_v23, 0 }
  0x52   : > { %v673_v33 = vmul.f32 0.25, %v1067_v20  ;;  %v622_v35 = vadd.f32 %v620_v13, %v613_v25  ;;  %v641_v36 = vadd.f32 %v639_v26, %v632_v17  ;;  %v642_v37 = vadd.f32 %v640_v27, %v633_v24  ;;  %v1094_v25 = vld [vmem:[%s1206_s16 + $0x3a] sm:$0x1] }
  0x53   : > { %v669_v38 = vperm.slane %v666_v28, 0  ;;  %1052 = vst.msk [vmem:[%s1259_s23 + $0xa0] sm:$0xff] %vm243_vm0, %v621_v30  ;;  %v648_v40 = vmul.f32 %v1223_v8, %v647_v31  ;;  %v657_v41 = vmul.f32 %v1230_v14, %v656_v32  ;;  %v649_v42 = vmul.f32 %v1236_v16, %v647_v31  ;;  %v1097_v30 = vld [vmem:[%s1206_s16 + $0x3b] sm:$0x1] }
  0x54   : > { %v658_v43 = vmul.f32 %v1239_v18, %v656_v32  ;;  %1053 = vst.msk [vmem:[%s1259_s23 + $0xa8] sm:$0xff] %vm243_vm0, %v622_v35  ;;  %v676_v45 = vperm.slane %v673_v33, 0  ;;  %v682_v46 = vmul.f32 0.25, %v1070_v29  ;;  %v691_v47 = vmul.f32 0.25, %v1073_v34  ;;  %v1102_v35 = vld [vmem:[%s1206_s16 + $0x3c] sm:$0x1] }
  0x55   : > { %v670_v44 = vmul.f32 %v669_v38, %v1216_v3  ;;  %v650_v49 = vadd.f32 %v648_v40, %v641_v36  ;;  %v651_v50 = vadd.f32 %v649_v42, %v642_v37  ;;  %v671_v51 = vmul.f32 %v669_v38, %v1227_v10 }
  0x56   : > { %v704_v52 = vmul.f32 0.25, %v1078_v39  ;;  %v677_v53 = vmul.f32 %v1219_v5, %v676_v45  ;;  %v685_v54 = vperm.slane %v682_v46, 0  ;;  %v694_v55 = vperm.slane %v691_v47, 0 }
  0x57   : > { %v678_v56 = vmul.f32 %v1233_v15, %v676_v45  ;;  %v659_v57 = vadd.f32 %v657_v41, %v650_v49  ;;  %v660_v58 = vadd.f32 %v658_v43, %v651_v50  ;;  %v711_v60 = vmul.f32 0.25, %v1079_v48 }
  0x58   : > { %v707_v59 = vperm.slane %v704_v52, 0  ;;  %v679_v63 = vadd.f32 %v677_v53, %v670_v44  ;;  %v686_v0 = vmul.f32 %v1223_v8, %v685_v54  ;;  %v695_v1 = vmul.f32 %v1230_v14, %v694_v55  ;;  %v1103_v44 = vld [vmem:[%s1206_s16 + $0x3d] sm:$0x1]  ;;  %v781_v52 = vld [vmem:[%s1211_s19] sm:$0xff]  ;;  %v1106_v53 = vld [vmem:[%s1206_s16 + $0x3e] sm:$0x1] }
  0x59   : > { %v680_v2 = vadd.f32 %v678_v56, %v671_v51  ;;  %1064 = vst.msk [vmem:[%s1259_s23 + $0xb0] sm:$0xff] %vm243_vm0, %v659_v57  ;;  %v687_v6 = vmul.f32 %v1236_v16, %v685_v54  ;;  %v696_v7 = vmul.f32 %v1239_v18, %v694_v55  ;;  %v714_v11 = vperm.slane %v711_v60, 0 }
  0x5a   : > { %v708_v9 = vmul.f32 %v707_v59, %v1216_v3  ;;  %1065 = vst.msk [vmem:[%s1259_s23 + $0xb8] sm:$0xff] %vm243_vm0, %v660_v58  ;;  %v688_v13 = vadd.f32 %v686_v0, %v679_v63  ;;  %v720_v17 = vmul.f32 0.25, %v1082_v61  ;;  %v729_v19 = vmul.f32 0.25, %v1085_v62  ;;  %v1109_v58 = vld [vmem:[%s1206_s16 + $0x3f] sm:$0x1]  ;;  %v1104_v62 = vld [vmem:[%s1211_s19 + $0x10] sm:$0xff] }
  0x5b   : > { %v709_v20 = vmul.f32 %v707_v59, %v1227_v10  ;;  %v689_v21 = vadd.f32 %v687_v6, %v680_v2  ;;  %v715_v22 = vmul.f32 %v1219_v5, %v714_v11  ;;  %v716_v23 = vmul.f32 %v1233_v15, %v714_v11  ;;  %v1105_v63 = vld [vmem:[%s1211_s19 + $0x18] sm:$0xff] }
  0x5c   : > { %v742_v24 = vmul.f32 0.25, %v1090_v4  ;;  %v697_v26 = vadd.f32 %v695_v1, %v688_v13  ;;  %v723_v27 = vperm.slane %v720_v17, 0  ;;  %v732_v28 = vperm.slane %v729_v19, 0  ;;  %v1108_v17 = vld [vmem:[%s1211_s19 + $0x28] sm:$0xff]  ;;  %v1111_v19 = vld [vmem:[%s1211_s19 + $0x38] sm:$0xff] }
  0x5d   : > { %v749_v29 = vmul.f32 0.25, %v1091_v12  ;;  %v698_v31 = vadd.f32 %v696_v7, %v689_v21  ;;  %v717_v32 = vadd.f32 %v715_v22, %v708_v9  ;;  %v718_v33 = vadd.f32 %v716_v23, %v709_v20  ;;  %v1110_v12 = vld [vmem:[%s1211_s19 + $0x30] sm:$0xff] }
  0x5e   : > { %v745_v34 = vperm.slane %v742_v24, 0  ;;  %1076 = vst.msk [vmem:[%s1259_s23 + $0xc0] sm:$0xff] %vm243_vm0, %v697_v26  ;;  %v724_v36 = vmul.f32 %v1223_v8, %v723_v27  ;;  %v733_v37 = vmul.f32 %v1230_v14, %v732_v28  ;;  %v725_v38 = vmul.f32 %v1236_v16, %v723_v27 }
  0x5f   : > { %v734_v39 = vmul.f32 %v1239_v18, %v732_v28  ;;  %1077 = vst.msk [vmem:[%s1259_s23 + $0xc8] sm:$0xff] %vm243_vm0, %v698_v31  ;;  %v752_v41 = vperm.slane %v749_v29, 0  ;;  %v758_v42 = vmul.f32 0.25, %v1094_v25  ;;  %v767_v43 = vmul.f32 0.25, %v1097_v30 }
  0x60   : > { %v746_v40 = vmul.f32 %v745_v34, %v1216_v3  ;;  %v726_v45 = vadd.f32 %v724_v36, %v717_v32  ;;  %v727_v46 = vadd.f32 %v725_v38, %v718_v33  ;;  %v747_v47 = vmul.f32 %v745_v34, %v1227_v10  ;;  %v782_v10 = vld [vmem:[%s1211_s19 + $0x8] sm:$0xff] }
  0x61   : > { %v780_v48 = vmul.f32 0.25, %v1102_v35  ;;  %v753_v49 = vmul.f32 %v1219_v5, %v752_v41  ;;  %v761_v50 = vperm.slane %v758_v42, 0  ;;  %v770_v51 = vperm.slane %v767_v43, 0 }
  0x62   : > { %v754_v3 = vmul.f32 %v1233_v15, %v752_v41  ;;  %v735_v54 = vadd.f32 %v733_v37, %v726_v45  ;;  %v736_v55 = vadd.f32 %v734_v39, %v727_v46  ;;  %v787_v57 = vmul.f32 0.25, %v1103_v44 }
  0x63   : > { %v783_v56 = vperm.slane %v780_v48, 0  ;;  %v755_v59 = vadd.f32 %v753_v49, %v746_v40  ;;  %v762_v5 = vmul.f32 %v1223_v8, %v761_v50  ;;  %v771_v60 = vmul.f32 %v1230_v14, %v770_v51  ;;  %v1107_v14 = vld [vmem:[%s1211_s19 + $0x20] sm:$0xff] }
  0x64   : > { %v756_v61 = vadd.f32 %v754_v3, %v747_v47  ;;  %1088 = vst.msk [vmem:[%s1259_s23 + $0xd0] sm:$0xff] %vm243_vm0, %v735_v54  ;;  %v763_v15 = vmul.f32 %v1236_v16, %v761_v50  ;;  %v772_v0 = vmul.f32 %v1239_v18, %v770_v51  ;;  %v790_v2 = vperm.slane %v787_v57, 0 }
  0x65   : > { %v784_v1 = vmul.f32 %v783_v56, %v781_v52  ;;  %1089 = vst.msk [vmem:[%s1259_s23 + $0xd8] sm:$0xff] %vm243_vm0, %v736_v55  ;;  %v764_v4 = vadd.f32 %v762_v5, %v755_v59  ;;  %v796_v8 = vmul.f32 0.25, %v1106_v53  ;;  %v805_v6 = vmul.f32 0.25, %v1109_v58 }
  0x66   : > { %v785_v7 = vmul.f32 %v783_v56, %v782_v10  ;;  %v765_v9 = vadd.f32 %v763_v15, %v756_v61  ;;  %v791_v11 = vmul.f32 %v1104_v62, %v790_v2  ;;  %v792_v13 = vmul.f32 %v1105_v63, %v790_v2 }
  0x67   : > { %v773_v16 = vadd.f32 %v771_v60, %v764_v4  ;;  %v799_v18 = vperm.slane %v796_v8, 0  ;;  %v808_v20 = vperm.slane %v805_v6, 0 }
  0x68   : > { %v774_v21 = vadd.f32 %v772_v0, %v765_v9  ;;  %v793_v22 = vadd.f32 %v791_v11, %v784_v1  ;;  %v794_v23 = vadd.f32 %v792_v13, %v785_v7 }
  0x69   : > { %1100 = vst.msk [vmem:[%s1259_s23 + $0xe0] sm:$0xff] %vm243_vm0, %v773_v16  ;;  %v800_v24 = vmul.f32 %v1107_v14, %v799_v18  ;;  %v809_v25 = vmul.f32 %v1110_v12, %v808_v20  ;;  %v801_v26 = vmul.f32 %v1108_v17, %v799_v18  ;;  %v810_v27 = vmul.f32 %v1111_v19, %v808_v20 }
  0x6a   : > { %1101 = vst.msk [vmem:[%s1259_s23 + $0xe8] sm:$0xff] %vm243_vm0, %v774_v21 }
  0x6b   : > { %v802_v28 = vadd.f32 %v800_v24, %v793_v22  ;;  %v803_v29 = vadd.f32 %v801_v26, %v794_v23 }
  0x6d   : > { %v811_v30 = vadd.f32 %v809_v25, %v802_v28  ;;  %v812_v31 = vadd.f32 %v810_v27, %v803_v29 }
  0x6f   : > { %1112 = vst.msk [vmem:[%s1259_s23 + $0xf0] sm:$0xff] %vm243_vm0, %v811_v30 }
  0x70   : > { %1113 = vst.msk [vmem:[%s1259_s23 + $0xf8] sm:$0xff] %vm243_vm0, %v812_v31 }
  0x71 PF: > { %s12_s11 = sadd.s32 1, %s1165_s11   ;;  %s1511_s9 = smov %s1161_s10 }
  0x72   : > { %p9_p5 = scmp.ge.s32.totalorder %s12_s11, 4   ;;  %s1512_s10 = smov %s1514_s12 }
  0x74   :  { %11 = sbr.rel (!%p9_p5) target bundleno = 2 (0x2), region = 94 }

</bundles_post_ra>
